<compile_context>
chip_gen: v6e
topology: v6e:2x2x1
jax: 0.10.0
libtpu: 0.0.40
codegen_flags: <defaults>
</compile_context>

<pallas_src>
import functools

import jax
import jax.numpy as jnp
from jax import lax
from jax.experimental import pallas as pl
from jax.experimental.pallas import tpu as pltpu

BN_EPS = 1e-5
LANE = 128


def _round_up(x, m):
    return (x + m - 1) // m * m


def bottleneck_kernel(x_ref, w1_ref, b1_ref, w2_ref, b2_ref, w3_ref, b3_ref,
                      o_ref, pad_ref, *, W, base):
    HW = x_ref.shape[1]
    Pp = w1_ref.shape[1]
    total = pad_ref.shape[0]
    tail = total - base - HW

    # ---- conv1 (1x1, BN folded) + relu --------------------------------------
    x = x_ref[0]                                                # (HW, Cin_p) bf16
    t1 = jnp.dot(x, w1_ref[...], preferred_element_type=jnp.float32)
    t1 = jnp.maximum(t1 + b1_ref[...], 0.0)                     # (HW, Pp) f32

    # ---- flattened, vertically padded scratch -------------------------------
    # Only the halo rows [0, base) and [base+HW, total) are zeroed; the body
    # is fully overwritten every grid step.
    pad_ref[pl.ds(0, base), :] = jnp.zeros((base, Pp), jnp.bfloat16)
    pad_ref[pl.ds(base, HW), :] = t1.astype(jnp.bfloat16)
    pad_ref[pl.ds(base + HW, tail), :] = jnp.zeros((tail, Pp), jnp.bfloat16)

    # Column masks for the +/-1 horizontal taps (flattened slices wrap across
    # row boundaries exactly where the 3x3 conv needs zero padding).
    col = lax.broadcasted_iota(jnp.int32, (HW, 1), 0) % W
    not_left = col > 0            # tap reads column w-1
    not_right = col < (W - 1)     # tap reads column w+1

    # ---- conv2 (3x3, pad=1, BN folded): single K = 9*Pp matmul ---------------
    patches = []
    for dy in range(3):
        for dx in range(3):
            start = base + (dy - 1) * W + (dx - 1)
            p = pad_ref[pl.ds(start, HW), :]                    # (HW, Pp) bf16
            if dx == 0:
                p = jnp.where(not_left, p, jnp.zeros_like(p))
            elif dx == 2:
                p = jnp.where(not_right, p, jnp.zeros_like(p))
            patches.append(p)
    cat = jnp.concatenate(patches, axis=1)                      # (HW, 9*Pp) bf16
    t2 = jnp.dot(cat, w2_ref[...], preferred_element_type=jnp.float32)
    t2 = jnp.maximum(t2 + b2_ref[...], 0.0)                     # (HW, Pp) f32

    # ---- conv3 (1x1, BN folded) + residual + relu ---------------------------
    t3 = jnp.dot(t2.astype(jnp.bfloat16), w3_ref[...],
                 preferred_element_type=jnp.float32)
    t3 = t3 + b3_ref[...]
    residual = x_ref[0].astype(jnp.float32)     # re-read right before the add
    o_ref[0] = jnp.maximum(t3 + residual, 0.0).astype(o_ref.dtype)


def fold_and_pad_params(params, inplanes, planes):
    """Fold BN scale into conv weights, pad channels to LANE, cast to bf16."""
    w1, s1, b1, w2, s2, b2, w3, s3, b3 = params
    P, Cout = planes, planes * 4
    Cin_p = _round_up(inplanes, LANE)
    P_p = _round_up(P, LANE)
    Cout_p = _round_up(Cout, LANE)

    w1f = w1 * s1.reshape(1, P)          # exact rewrite: scale on out-channels
    w2f = w2 * s2.reshape(1, 1, P)
    w3f = w3 * s3.reshape(1, Cout)

    w1p = jnp.zeros((Cin_p, P_p), jnp.float32).at[:inplanes, :P].set(w1f)
    w2p = jnp.zeros((9, P_p, P_p), jnp.float32).at[:, :P, :P].set(w2f)
    w3p = jnp.zeros((P_p, Cout_p), jnp.float32).at[:P, :Cout].set(w3f)
    b1p = jnp.zeros((1, P_p), jnp.float32).at[:, :P].set(b1)
    b2p = jnp.zeros((1, P_p), jnp.float32).at[:, :P].set(b2)
    b3p = jnp.zeros((1, Cout_p), jnp.float32).at[:, :Cout].set(b3)

    prepared = (w1p.astype(jnp.bfloat16), b1p,
                w2p.reshape(9 * P_p, P_p).astype(jnp.bfloat16), b2p,
                w3p.astype(jnp.bfloat16), b3p)
    return prepared, (Cin_p, P_p, Cout_p)


def bottleneck_pallas(x_nhwc, prepared, dims):
    """x_nhwc: (N, H, W, Cin) float32. Returns (N, H, W, Cin) float32."""
    N, H, W, Cin = x_nhwc.shape
    w1p, b1p, w2p, b2p, w3p, b3p = prepared
    Cin_p, P_p, Cout_p = dims
    assert Cin_p == Cout_p, "residual add requires inplanes == planes * 4"
    HW = H * W
    base = _round_up(W + 1, 16)          # aligned top halo, >= W+1 rows
    total = base + HW + base             # bottom halo mirrors the top

    # Pad channels to dense 128-lane layout, cast to bf16, flatten spatial.
    xp = jnp.zeros((N, H, W, Cin_p), jnp.float32).at[..., :Cin].set(x_nhwc)
    xp = xp.astype(jnp.bfloat16).reshape(N, HW, Cin_p)

    flops = 2 * N * HW * (Cin_p * P_p + 9 * P_p * P_p + P_p * Cout_p)
    bytes_accessed = (2 * xp.size + 4 * N * HW * Cout_p
                      + 2 * (w1p.size + w2p.size + w3p.size)
                      + 4 * (b1p.size + b2p.size + b3p.size))

    kernel = functools.partial(bottleneck_kernel, W=W, base=base)

    # TODO(synk): for large ResNet shapes (e.g. 56x56x256 on v7x) add a
    # halo-aware H-tiling grid axis and single-buffer (pl.Buffered(1)) the
    # constant-index weight inputs.
    out = pl.pallas_call(
        kernel,
        out_shape=jax.ShapeDtypeStruct((N, HW, Cout_p), jnp.float32),
        grid_spec=pltpu.PrefetchScalarGridSpec(
            num_scalar_prefetch=0,
            grid=(N,),
            in_specs=[
                pl.BlockSpec((1, HW, Cin_p), lambda n: (n, 0, 0)),   # x
                pl.BlockSpec(w1p.shape, lambda n: (0, 0)),
                pl.BlockSpec(b1p.shape, lambda n: (0, 0)),
                pl.BlockSpec(w2p.shape, lambda n: (0, 0)),
                pl.BlockSpec(b2p.shape, lambda n: (0, 0)),
                pl.BlockSpec(w3p.shape, lambda n: (0, 0)),
                pl.BlockSpec(b3p.shape, lambda n: (0, 0)),
            ],
            out_specs=pl.BlockSpec((1, HW, Cout_p), lambda n: (n, 0, 0)),
            scratch_shapes=[pltpu.VMEM((total, P_p), jnp.bfloat16)],
        ),
        compiler_params=pltpu.CompilerParams(
            dimension_semantics=("parallel",),
            vmem_limit_bytes=64 * 1024 * 1024),
        cost_estimate=pl.CostEstimate(
            flops=flops, transcendentals=0, bytes_accessed=bytes_accessed),
    )(xp, w1p, b1p, w2p, b2p, w3p, b3p)

    return out.reshape(N, H, W, Cout_p)[..., :Cin]


def make_params(key, inplanes, planes):
    """Deterministic params. BN in inference (scale/shift) form."""
    ks = jax.random.split(key, 12)
    P, Cout = planes, planes * 4

    def bn_scale_shift(kg, kb, km, kv, c):
        gamma = 1.0 + 0.1 * jax.random.normal(kg, (c,), jnp.float32)
        beta = 0.1 * jax.random.normal(kb, (c,), jnp.float32)
        mean = 0.1 * jax.random.normal(km, (c,), jnp.float32)
        var = jnp.abs(jax.random.normal(kv, (c,), jnp.float32)) + 0.5
        scale = gamma / jnp.sqrt(var + BN_EPS)
        shift = beta - mean * scale
        return scale.reshape(1, c), shift.reshape(1, c)

    w1 = 0.1 * jax.random.normal(ks[0], (inplanes, P), jnp.float32)   # (Cin, P)
    w2 = 0.1 * jax.random.normal(ks[1], (9, P, P), jnp.float32)       # (tap, Pin, Pout)
    w3 = 0.1 * jax.random.normal(ks[2], (P, Cout), jnp.float32)       # (P, Cout)
    s1, b1 = bn_scale_shift(ks[3], ks[4], ks[5], ks[6], P)
    s2, b2 = bn_scale_shift(ks[7], ks[8], ks[9], ks[10], P)
    s3, b3 = bn_scale_shift(ks[11], ks[3], ks[7], ks[0], Cout)
    return (w1, s1, b1, w2, s2, b2, w3, s3, b3)


def bottleneck_reference(x_nhwc, prepared, dims):
    """Plain-JAX reference using the same folded/padded bf16 params."""
    w1p, b1p, w2p, b2p, w3p, b3p = prepared
    Cin_p, P_p, Cout_p = dims
    N, H, W, Cin = x_nhwc.shape
    f32 = jnp.float32
    xp = jnp.zeros((N, H, W, Cin_p), f32).at[..., :Cin].set(x_nhwc)
    xp = xp.astype(jnp.bfloat16).astype(f32)           # match kernel's bf16 x
    w1 = w1p.astype(f32)
    w2 = w2p.astype(f32).reshape(3, 3, P_p, P_p)       # HWIO
    w3 = w3p.astype(f32)

    t = jax.nn.relu(jnp.einsum('nhwc,cp->nhwp', xp, w1) + b1p.reshape(1, 1, 1, -1))
    t = t.astype(jnp.bfloat16).astype(f32)             # kernel stores t1 as bf16
    t = lax.conv_general_dilated(t, w2, (1, 1), 'SAME',
                                 dimension_numbers=('NHWC', 'HWIO', 'NHWC'))
    t = jax.nn.relu(t + b2p.reshape(1, 1, 1, -1))
    t = t.astype(jnp.bfloat16).astype(f32)             # kernel casts t2 to bf16
    t = jnp.einsum('nhwp,po->nhwo', t, w3) + b3p.reshape(1, 1, 1, -1)
    return jax.nn.relu(t + xp)[..., :Cin]


if __name__ == "__main__":
    key = jax.random.PRNGKey(0)
    k_x, k_p = jax.random.split(key)

    N, H, W = 2, 16, 16
    planes = 4
    inplanes = planes * 4  # 16 -> residual add works with downsample=None

    # PyTorch input would be NCHW (2, 16, 16, 16); we work in NHWC.
    x_nchw = jax.random.normal(k_x, (N, inplanes, H, W), jnp.float32)
    x_nhwc = jnp.transpose(x_nchw, (0, 2, 3, 1))

    raw_params = make_params(k_p, inplanes, planes)
    prepared, dims = fold_and_pad_params(raw_params, inplanes, planes)

    out = bottleneck_pallas(x_nhwc, prepared, dims)
    out = jax.block_until_ready(out)

    ref = bottleneck_reference(x_nhwc, prepared, dims)
    assert out.shape == (N, H, W, inplanes)
    max_err = float(jnp.max(jnp.abs(out - ref)))
    assert jnp.allclose(out, ref, atol=2e-3, rtol=2e-3), max_err

    print("KERNEL_OK")
</pallas_src>

<mosaic_0001>
module attributes {stable_mosaic.version = 11 : i64} {
  func.func @bottleneck_kernel(%arg0: i32, %arg1: memref<1x256x128xbf16, #tpu.memory_space<vmem>>, %arg2: memref<128x128xbf16, #tpu.memory_space<vmem>>, %arg3: memref<1x128xf32, #tpu.memory_space<vmem>>, %arg4: memref<1152x128xbf16, #tpu.memory_space<vmem>>, %arg5: memref<1x128xf32, #tpu.memory_space<vmem>>, %arg6: memref<128x128xbf16, #tpu.memory_space<vmem>>, %arg7: memref<1x128xf32, #tpu.memory_space<vmem>>, %arg8: memref<1x256x128xf32, #tpu.memory_space<vmem>>, %arg9: memref<320x128xbf16, #tpu.memory_space<vmem>>) attributes {dimension_semantics = [#tpu.dimension_semantics<parallel>], iteration_bounds = array<i64: 2>, scalar_prefetch = 0 : i64, scratch_operands = 1 : i64, tpu.core_type = #tpu.core_type<tc>, window_params = [{transform_indices = @transform_0, window_bounds = array<i64: 1, 256, 128>}, {pipeline_mode = #tpu.pipeline_mode<synchronous>, transform_indices = @transform_1, window_bounds = array<i64: 128, 128>}, {pipeline_mode = #tpu.pipeline_mode<synchronous>, transform_indices = @transform_2, window_bounds = array<i64: 1, 128>}, {pipeline_mode = #tpu.pipeline_mode<synchronous>, transform_indices = @transform_3, window_bounds = array<i64: 1152, 128>}, {pipeline_mode = #tpu.pipeline_mode<synchronous>, transform_indices = @transform_4, window_bounds = array<i64: 1, 128>}, {pipeline_mode = #tpu.pipeline_mode<synchronous>, transform_indices = @transform_5, window_bounds = array<i64: 128, 128>}, {pipeline_mode = #tpu.pipeline_mode<synchronous>, transform_indices = @transform_6, window_bounds = array<i64: 1, 128>}, {transform_indices = @transform_7, window_bounds = array<i64: 1, 256, 128>}]} {
    %c0 = arith.constant 0 : index
    %c0_0 = arith.constant 0 : index
    %c0_1 = arith.constant 0 : index
    %0 = vector.load %arg1[%c0, %c0_0, %c0_1] : memref<1x256x128xbf16, #tpu.memory_space<vmem>>, vector<1x256x128xbf16>
    %1 = vector.shape_cast %0 : vector<1x256x128xbf16> to vector<256x128xbf16>
    %c0_2 = arith.constant 0 : index
    %c0_3 = arith.constant 0 : index
    %2 = vector.load %arg2[%c0_2, %c0_3] : memref<128x128xbf16, #tpu.memory_space<vmem>>, vector<128x128xbf16>
    %cst = arith.constant dense<0.000000e+00> : vector<256x128xf32>
    %3 = tpu.matmul %1, %2, %cst {dimension_numbers = #tpu.dot_dimension_numbers<[1], [0], [0], [1], [0, 0, 1, 1], [], []>} : vector<256x128xbf16>, vector<128x128xbf16>, vector<256x128xf32> -> vector<256x128xf32>
    %c0_4 = arith.constant 0 : index
    %c0_5 = arith.constant 0 : index
    %4 = vector.load %arg3[%c0_4, %c0_5] : memref<1x128xf32, #tpu.memory_space<vmem>>, vector<1x128xf32>
    %5 = vector.broadcast %4 : vector<1x128xf32> to vector<256x128xf32>
    %6 = arith.addf %3, %5 : vector<256x128xf32>
    %cst_6 = arith.constant 0.000000e+00 : f32
    %7 = vector.broadcast %cst_6 : f32 to vector<256x128xf32>
    %8 = arith.maximumf %6, %7 : vector<256x128xf32>
    %cst_7 = arith.constant 0.000000e+00 : bf16
    %9 = vector.broadcast %cst_7 : bf16 to vector<32x128xbf16>
    %c0_8 = arith.constant 0 : index
    %c0_9 = arith.constant 0 : index
    %10 = vector.load %arg9[%c0_8, %c0_9] : memref<320x128xbf16, #tpu.memory_space<vmem>>, vector<32x128xbf16>
    tpu.vector_store %arg9[%c0_8, %c0_9], %9 {strides = array<i32>} : memref<320x128xbf16, #tpu.memory_space<vmem>>, vector<32x128xbf16>,
    %11 = arith.truncf %8 : vector<256x128xf32> to vector<256x128xbf16>
    %c32 = arith.constant 32 : index
    %c0_10 = arith.constant 0 : index
    %12 = vector.load %arg9[%c32, %c0_10] : memref<320x128xbf16, #tpu.memory_space<vmem>>, vector<256x128xbf16>
    tpu.vector_store %arg9[%c32, %c0_10], %11 {strides = array<i32>} : memref<320x128xbf16, #tpu.memory_space<vmem>>, vector<256x128xbf16>,
    %cst_11 = arith.constant 0.000000e+00 : bf16
    %13 = vector.broadcast %cst_11 : bf16 to vector<32x128xbf16>
    %c288 = arith.constant 288 : index
    %c0_12 = arith.constant 0 : index
    %14 = vector.load %arg9[%c288, %c0_12] : memref<320x128xbf16, #tpu.memory_space<vmem>>, vector<32x128xbf16>
    tpu.vector_store %arg9[%c288, %c0_12], %13 {strides = array<i32>} : memref<320x128xbf16, #tpu.memory_space<vmem>>, vector<32x128xbf16>,
    %15 = tpu.iota {dimensions = array<i32: 0>} : vector<256x1xi32>
    %c16_i32 = arith.constant 16 : i32
    %c0_i32 = arith.constant 0 : i32
    %16 = arith.cmpi eq, %c16_i32, %c0_i32 : i32
    %c1_i32 = arith.constant 1 : i32
    %17 = arith.select %16, %c1_i32, %c16_i32 : i32
    %18 = vector.broadcast %17 : i32 to vector<256x1xi32>
    %19 = arith.remsi %15, %18 : vector<256x1xi32>
    %c0_i32_13 = arith.constant 0 : i32
    %20 = vector.broadcast %c0_i32_13 : i32 to vector<256x1xi32>
    %21 = arith.cmpi ne, %19, %20 : vector<256x1xi32>
    %c0_i32_14 = arith.constant 0 : i32
    %22 = vector.broadcast %c0_i32_14 : i32 to vector<256x1xi32>
    %23 = arith.cmpi slt, %19, %22 : vector<256x1xi32>
    %c0_i32_15 = arith.constant 0 : i32
    %24 = arith.cmpi slt, %17, %c0_i32_15 : i32
    %25 = vector.broadcast %24 : i1 to vector<256x1xi1>
    %26 = vector.broadcast %25 : vector<256x1xi1> to vector<256x1xi1>
    %27 = arith.xori %23, %26 : vector<256x1xi1>
    %28 = arith.andi %27, %21 : vector<256x1xi1>
    %29 = vector.broadcast %17 : i32 to vector<256x1xi32>
    %30 = arith.addi %19, %29 : vector<256x1xi32>
    %31 = arith.select %28, %30, %19 : vector<256x1xi1>, vector<256x1xi32>
    %c0_i32_16 = arith.constant 0 : i32
    %32 = vector.broadcast %c0_i32_16 : i32 to vector<256x1xi32>
    %33 = arith.cmpi sgt, %31, %32 : vector<256x1xi32>
    %c15_i32 = arith.constant 15 : i32
    %34 = vector.broadcast %c15_i32 : i32 to vector<256x1xi32>
    %35 = arith.cmpi slt, %31, %34 : vector<256x1xi32>
    %c15 = arith.constant 15 : index
    %c0_17 = arith.constant 0 : index
    %36 = vector.load %arg9[%c15, %c0_17] : memref<320x128xbf16, #tpu.memory_space<vmem>>, vector<256x128xbf16>
    %cst_18 = arith.constant 0.000000e+00 : bf16
    %37 = vector.broadcast %cst_18 : bf16 to vector<256x128xbf16>
    %38 = vector.shape_cast %33 : vector<256x1xi1> to vector<256x1xi1>
    %39 = vector.broadcast %38 : vector<256x1xi1> to vector<256x128xi1>
    %40 = arith.select %39, %36, %37 : vector<256x128xi1>, vector<256x128xbf16>
    %c16 = arith.constant 16 : index
    %c0_19 = arith.constant 0 : index
    %41 = vector.load %arg9[%c16, %c0_19] : memref<320x128xbf16, #tpu.memory_space<vmem>>, vector<256x128xbf16>
    %c17 = arith.constant 17 : index
    %c0_20 = arith.constant 0 : index
    %42 = vector.load %arg9[%c17, %c0_20] : memref<320x128xbf16, #tpu.memory_space<vmem>>, vector<256x128xbf16>
    %cst_21 = arith.constant 0.000000e+00 : bf16
    %43 = vector.broadcast %cst_21 : bf16 to vector<256x128xbf16>
    %44 = vector.shape_cast %35 : vector<256x1xi1> to vector<256x1xi1>
    %45 = vector.broadcast %44 : vector<256x1xi1> to vector<256x128xi1>
    %46 = arith.select %45, %42, %43 : vector<256x128xi1>, vector<256x128xbf16>
    %c31 = arith.constant 31 : index
    %c0_22 = arith.constant 0 : index
    %47 = vector.load %arg9[%c31, %c0_22] : memref<320x128xbf16, #tpu.memory_space<vmem>>, vector<256x128xbf16>
    %cst_23 = arith.constant 0.000000e+00 : bf16
    %48 = vector.broadcast %cst_23 : bf16 to vector<256x128xbf16>
    %49 = vector.shape_cast %33 : vector<256x1xi1> to vector<256x1xi1>
    %50 = vector.broadcast %49 : vector<256x1xi1> to vector<256x128xi1>
    %51 = arith.select %50, %47, %48 : vector<256x128xi1>, vector<256x128xbf16>
    %c32_24 = arith.constant 32 : index
    %c0_25 = arith.constant 0 : index
    %52 = vector.load %arg9[%c32_24, %c0_25] : memref<320x128xbf16, #tpu.memory_space<vmem>>, vector<256x128xbf16>
    %c33 = arith.constant 33 : index
    %c0_26 = arith.constant 0 : index
    %53 = vector.load %arg9[%c33, %c0_26] : memref<320x128xbf16, #tpu.memory_space<vmem>>, vector<256x128xbf16>
    %cst_27 = arith.constant 0.000000e+00 : bf16
    %54 = vector.broadcast %cst_27 : bf16 to vector<256x128xbf16>
    %55 = vector.shape_cast %35 : vector<256x1xi1> to vector<256x1xi1>
    %56 = vector.broadcast %55 : vector<256x1xi1> to vector<256x128xi1>
    %57 = arith.select %56, %53, %54 : vector<256x128xi1>, vector<256x128xbf16>
    %c47 = arith.constant 47 : index
    %c0_28 = arith.constant 0 : index
    %58 = vector.load %arg9[%c47, %c0_28] : memref<320x128xbf16, #tpu.memory_space<vmem>>, vector<256x128xbf16>
    %cst_29 = arith.constant 0.000000e+00 : bf16
    %59 = vector.broadcast %cst_29 : bf16 to vector<256x128xbf16>
    %60 = vector.shape_cast %33 : vector<256x1xi1> to vector<256x1xi1>
    %61 = vector.broadcast %60 : vector<256x1xi1> to vector<256x128xi1>
    %62 = arith.select %61, %58, %59 : vector<256x128xi1>, vector<256x128xbf16>
    %c48 = arith.constant 48 : index
    %c0_30 = arith.constant 0 : index
    %63 = vector.load %arg9[%c48, %c0_30] : memref<320x128xbf16, #tpu.memory_space<vmem>>, vector<256x128xbf16>
    %c49 = arith.constant 49 : index
    %c0_31 = arith.constant 0 : index
    %64 = vector.load %arg9[%c49, %c0_31] : memref<320x128xbf16, #tpu.memory_space<vmem>>, vector<256x128xbf16>
    %cst_32 = arith.constant 0.000000e+00 : bf16
    %65 = vector.broadcast %cst_32 : bf16 to vector<256x128xbf16>
    %66 = vector.shape_cast %35 : vector<256x1xi1> to vector<256x1xi1>
    %67 = vector.broadcast %66 : vector<256x1xi1> to vector<256x128xi1>
    %68 = arith.select %67, %64, %65 : vector<256x128xi1>, vector<256x128xbf16>
    %69 = tpu.concatenate %40, %41, %46, %51, %52, %57, %62, %63, %68 in 1 : vector<256x128xbf16>, vector<256x128xbf16>, vector<256x128xbf16>, vector<256x128xbf16>, vector<256x128xbf16>, vector<256x128xbf16>, vector<256x128xbf16>, vector<256x128xbf16>, vector<256x128xbf16> -> vector<256x1152xbf16>
    %c0_33 = arith.constant 0 : index
    %c0_34 = arith.constant 0 : index
    %70 = vector.load %arg4[%c0_33, %c0_34] : memref<1152x128xbf16, #tpu.memory_space<vmem>>, vector<1152x128xbf16>
    %cst_35 = arith.constant dense<0.000000e+00> : vector<256x128xf32>
    %71 = tpu.matmul %69, %70, %cst_35 {dimension_numbers = #tpu.dot_dimension_numbers<[1], [0], [0], [1], [0, 0, 1, 1], [], []>} : vector<256x1152xbf16>, vector<1152x128xbf16>, vector<256x128xf32> -> vector<256x128xf32>
    %c0_36 = arith.constant 0 : index
    %c0_37 = arith.constant 0 : index
    %72 = vector.load %arg5[%c0_36, %c0_37] : memref<1x128xf32, #tpu.memory_space<vmem>>, vector<1x128xf32>
    %73 = vector.broadcast %72 : vector<1x128xf32> to vector<256x128xf32>
    %74 = arith.addf %71, %73 : vector<256x128xf32>
    %cst_38 = arith.constant 0.000000e+00 : f32
    %75 = vector.broadcast %cst_38 : f32 to vector<256x128xf32>
    %76 = arith.maximumf %74, %75 : vector<256x128xf32>
    %77 = arith.truncf %76 : vector<256x128xf32> to vector<256x128xbf16>
    %c0_39 = arith.constant 0 : index
    %c0_40 = arith.constant 0 : index
    %78 = vector.load %arg6[%c0_39, %c0_40] : memref<128x128xbf16, #tpu.memory_space<vmem>>, vector<128x128xbf16>
    %cst_41 = arith.constant dense<0.000000e+00> : vector<256x128xf32>
    %79 = tpu.matmul %77, %78, %cst_41 {dimension_numbers = #tpu.dot_dimension_numbers<[1], [0], [0], [1], [0, 0, 1, 1], [], []>} : vector<256x128xbf16>, vector<128x128xbf16>, vector<256x128xf32> -> vector<256x128xf32>
    %c0_42 = arith.constant 0 : index
    %c0_43 = arith.constant 0 : index
    %80 = vector.load %arg7[%c0_42, %c0_43] : memref<1x128xf32, #tpu.memory_space<vmem>>, vector<1x128xf32>
    %81 = vector.broadcast %80 : vector<1x128xf32> to vector<256x128xf32>
    %82 = arith.addf %79, %81 : vector<256x128xf32>
    %c0_44 = arith.constant 0 : index
    %c0_45 = arith.constant 0 : index
    %c0_46 = arith.constant 0 : index
    %83 = vector.load %arg1[%c0_44, %c0_45, %c0_46] : memref<1x256x128xbf16, #tpu.memory_space<vmem>>, vector<1x256x128xbf16>
    %84 = vector.shape_cast %83 : vector<1x256x128xbf16> to vector<256x128xbf16>
    %85 = arith.extf %84 : vector<256x128xbf16> to vector<256x128xf32>
    %86 = arith.addf %82, %85 : vector<256x128xf32>
    %cst_47 = arith.constant 0.000000e+00 : f32
    %87 = vector.broadcast %cst_47 : f32 to vector<256x128xf32>
    %88 = arith.maximumf %86, %87 : vector<256x128xf32>
    %c0_48 = arith.constant 0 : index
    %c0_49 = arith.constant 0 : index
    %c0_50 = arith.constant 0 : index
    %89 = vector.load %arg8[%c0_48, %c0_49, %c0_50] : memref<1x256x128xf32, #tpu.memory_space<vmem>>, vector<1x256x128xf32>
    %90 = vector.shape_cast %89 : vector<1x256x128xf32> to vector<256x128xf32>
    %91 = vector.shape_cast %88 : vector<256x128xf32> to vector<1x256x128xf32>
    tpu.vector_store %arg8[%c0_48, %c0_49, %c0_50], %91 {strides = array<i32>} : memref<1x256x128xf32, #tpu.memory_space<vmem>>, vector<1x256x128xf32>,
    return
  }
  func.func @transform_0(%arg0: i32) -> (i32, i32, i32) {
    %c0_i32 = arith.constant 0 : i32
    %c0_i32_0 = arith.constant 0 : i32
    %c0_i32_1 = arith.constant 0 : i32
    return %arg0, %c0_i32, %c0_i32_0 : i32, i32, i32
  }
  func.func @transform_1(%arg0: i32) -> (i32, i32) {
    %c0_i32 = arith.constant 0 : i32
    %c0_i32_0 = arith.constant 0 : i32
    %c0_i32_1 = arith.constant 0 : i32
    return %c0_i32, %c0_i32_0 : i32, i32
  }
  func.func @transform_2(%arg0: i32) -> (i32, i32) {
    %c0_i32 = arith.constant 0 : i32
    %c0_i32_0 = arith.constant 0 : i32
    %c0_i32_1 = arith.constant 0 : i32
    return %c0_i32, %c0_i32_0 : i32, i32
  }
  func.func @transform_3(%arg0: i32) -> (i32, i32) {
    %c0_i32 = arith.constant 0 : i32
    %c0_i32_0 = arith.constant 0 : i32
    %c0_i32_1 = arith.constant 0 : i32
    return %c0_i32, %c0_i32_0 : i32, i32
  }
  func.func @transform_4(%arg0: i32) -> (i32, i32) {
    %c0_i32 = arith.constant 0 : i32
    %c0_i32_0 = arith.constant 0 : i32
    %c0_i32_1 = arith.constant 0 : i32
    return %c0_i32, %c0_i32_0 : i32, i32
  }
  func.func @transform_5(%arg0: i32) -> (i32, i32) {
    %c0_i32 = arith.constant 0 : i32
    %c0_i32_0 = arith.constant 0 : i32
    %c0_i32_1 = arith.constant 0 : i32
    return %c0_i32, %c0_i32_0 : i32, i32
  }
  func.func @transform_6(%arg0: i32) -> (i32, i32) {
    %c0_i32 = arith.constant 0 : i32
    %c0_i32_0 = arith.constant 0 : i32
    %c0_i32_1 = arith.constant 0 : i32
    return %c0_i32, %c0_i32_0 : i32, i32
  }
  func.func @transform_7(%arg0: i32) -> (i32, i32, i32) {
    %c0_i32 = arith.constant 0 : i32
    %c0_i32_0 = arith.constant 0 : i32
    %c0_i32_1 = arith.constant 0 : i32
    return %arg0, %c0_i32, %c0_i32_0 : i32, i32, i32
  }
}

</mosaic_0001>

<bundles_post_ra>
// kernel: tpu_custom_call.1
= control target key start
LH: loop header
LB: loop body
LE: loop exit
PB: predicated region body
PF: predicated region fallthrough
CT: control target
= control target key end

     0   :  { %s11965_s0 = inlined_call_operand.hbm [shape: bf16[2,256,128], index: 0, kind: input, shape index: {}]   ;;  %s11966_s1 = inlined_call_operand.hbm [shape: bf16[128,128], index: 1, kind: input, shape index: {}]   ;;  %s11967_s2 = inlined_call_operand.vmem [shape: f32[1,128], index: 2, kind: input, shape index: {}]   ;;  %s11968_s3 = inlined_call_operand.hbm [shape: bf16[1152,128], index: 3, kind: input, shape index: {}]   ;;  %s11969_s4 = inlined_call_operand.vmem [shape: f32[1,128], index: 4, kind: input, shape index: {}]   ;;  %s11970_s5 = inlined_call_operand.hbm [shape: bf16[128,128], index: 5, kind: input, shape index: {}]   ;;  %s11971_s6 = inlined_call_operand.vmem [shape: f32[1,128], index: 6, kind: input, shape index: {}]   ;;  %s11972_s7 = inlined_call_operand.hbm [shape: f32[2,256,128], index: 7, kind: output, shape index: {}]  }
   0x1   :  { %12211 = sst [smem:[#allocation101_spill]] %s11966_s1 }
   0x2   :  { %12 = vsyncpa [#allocation4], 0 }
   0x3   :  { %14 = vsyncpa [#allocation4 + $0x1], 0 }
   0x4   :  { %15 = vsyncpa [#allocation7], 0 }
   0x5   :  { %16 = vsyncpa [#allocation10], 0 }
   0x6   :  { %17 = vsyncpa [#allocation5], 0 }
   0x7   :  { %19 = vsyncpa [#allocation5 + $0x1], 0  ;;  %s8231_s24 = smov 0   ;;  %s8233_s25 = smov 0  }
   0x8   :  { %s8235_s26 = smov 0   ;;  %s8237_s27 = smov 0  }
   0x9 LB: > { %s8252_s28 = sadd.s32 4294967295, %s8178_s27   ;;  %s6589_s29 = sadd.s32 4294967294, %s8178_s27   ;;  %s8178_s27 = sphi %s8237_s27, %s13066_s27   ;;  %s8174_s26 = sphi %s8235_s26, %s13065_s26   ;;  %s8170_s25 = sphi %s8233_s25, %s13064_s25   ;;  %s8166_s24 = sphi %s8231_s24, %s13063_s24  }
   0xa   : > { %p45_p0 = scmp.ne.s32.totalorder %s8170_s25, %s8166_s24  ;;  %p11973_p1 = scmp.eq.s32.totalorder %s8252_s28, 0 }
   0xb   : > { %p195_p2 = scmp.eq.s32.totalorder %s8252_s28, 1  ;;  %p201_p3 = scmp.eq.s32.totalorder %s6589_s29, 1 }
   0xc   : > { %p8261_p4 = por %p11973_p1, %p45_p0  ;;  %p6590_p5 = scmp.ge.s32.totalorder %s8178_s27, 1 }
   0xd   : > { %p8266_p6 = por %p201_p3, %p45_p0  ;;  %p208_p7 = scmp.lt.s32.totalorder %s8178_s27, 3 }
   0xe   : > { %s12212_s30 = scalar_select %p8261_p4, 1, 0 }
   0xf   : > { %s12213_s8 = scalar_select %p8266_p6, 1, 0 }
  0x10   : > { %p8271_p8 = pnand %p6590_p5, %p208_p7  ;;  %s8180_s10 = smov [#allocation6]  }
  0x11   : > { %s220_s11 = sshll.u32 %s8180_s10, 4  ;;  %s8181_s13 = smov [#allocation8]   ;;  %s221_s11 = int_to_ptr.vmem [resolvable:$true] %s220_s11 }
  0x12   : > { %s12214_s9 = scalar_select %p8271_p8, 1, 0 }
  0x13   : > { %p7773_p9 = pneg %p8271_p8  ;;  %s236_s14 = sshll.u32 %s8181_s13, 4  ;;  %s237_s14 = int_to_ptr.vmem [resolvable:$true] %s236_s14 }
  0x14   : > { %s8182_s15 = smov [#allocation9]   ;;  %s8011_s17 = scalar_lea.vmem %s221_s11, 1024 }
  0x15   : > { %p8280_p11 = pnand %p7773_p9, %p11973_p1  ;;  %s252_s16 = sshll.u32 %s8182_s15, 4  ;;  %s253_s16 = int_to_ptr.vmem [resolvable:$true] %s252_s16 }
  0x16   : > { %p8012_p13 = scmp.ne.s32.totalorder %s221_s11, %s8011_s17  ;;  %p8019_p5 = scmp.lt.s32.totalorder %s221_s11, %s221_s11 }
  0x17   : > { %p8002_p12 = pneg %p8280_p11  ;;  %p8020_p7 = scmp.lt.s32.totalorder %s8011_s17, %s8011_s17 }
  0x19   : > { %p8014_p0 = pnand %p8012_p13, %p8002_p12  ;;  %p8021_p9 = por %p8020_p7, %p8019_p5 }
  0x1b   : > { %p8015_p3 = pneg %p8014_p0 }
  0x1d   : > { %p8022_p10 = pnand %p8021_p9, %p8015_p3 }
  0x1f   : > { %8025 = shalt.err (!%p8022_p10)
}
  0x20   : > { %s11974_s18 = smov 64   ;;  %s11975_s19 = smov 4  }
  0x21   : > { %s12216_s1 = sld [smem:[#allocation101_spill]]  ;;  %s8037_s22 = scalar_lea.vmem %s237_s14, 9216 }
  0x22   : > { %p8038_p13 = scmp.ne.s32.totalorder %s237_s14, %s8037_s22  ;;  %p8045_p3 = scmp.lt.s32.totalorder %s237_s14, %s237_s14 }
  0x23   : > { %p8046_p10 = scmp.lt.s32.totalorder %s8037_s22, %s8037_s22 }
  0x24   : > { %p8040_p0 = pnand %p8038_p13, %p8002_p12 }
  0x25   : > { %p8047_p7 = por %p8046_p10, %p8045_p3 }
  0x26   : > { %p8041_p5 = pneg %p8040_p0 }
  0x27   : > { %7776 = dma.hbm_to_vmem [thread:$0]  (!%p8280_p11), %s12216_s1, 1024, %s221_s11, [#allocation7], %s11974_s18, %s11974_s18, %s11975_s19  }
  0x28   : > { %p8048_p9 = pnand %p8047_p7, %p8041_p5 }
  0x2a   : > { %8051 = shalt.err (!%p8048_p9)
}
  0x2b   : > { %7779 = dma.hbm_to_vmem [thread:$0]  (!%p8280_p11), %s11968_s3, 9216, %s237_s14, [#allocation7], %s11974_s18, %s11974_s18, %s11975_s19  }
  0x2c   : > { %s8063_s10 = scalar_lea.vmem %s253_s16, 1024  ;;  %p8071_p3 = scmp.lt.s32.totalorder %s253_s16, %s253_s16 }
  0x2d   : > { %p8064_p1 = scmp.ne.s32.totalorder %s253_s16, %s8063_s10  ;;  %p8072_p5 = scmp.lt.s32.totalorder %s8063_s10, %s8063_s10 }
  0x2f   : > { %p8066_p13 = pnand %p8064_p1, %p8002_p12  ;;  %p8073_p10 = por %p8072_p5, %p8071_p3 }
  0x31   : > { %p8067_p0 = pneg %p8066_p13 }
  0x33   : > { %p8074_p7 = pnand %p8073_p10, %p8067_p0 }
  0x35   : > { %8077 = shalt.err (!%p8074_p7)
}
  0x36   : > { %7782 = dma.hbm_to_vmem [thread:$0]  (!%p8280_p11), %s11970_s5, 1024, %s253_s16, [#allocation10], %s11974_s18, %s11974_s18, %s11975_s19  }
  0x37   : > { %s8320_s14 = sadd.s32 1, %s8178_s27   ;;  %s32_s15 = sadd.s32 1, %s8174_s26 }
  0x38   : > { %s29_s12 = ssub.s32 %s8178_s27, %s8320_s14  ;;  %p39_p12 = scmp.ne.s32.totalorder %s8174_s26, %s8170_s25 }
  0x39   : > { %p30_p1 = scmp.eq.s32.totalorder %s29_s12, 0  ;;  %p40_p9 = scmp.eq.s32.totalorder %s8178_s27, 0 }
  0x3a   : > { %p7794_p13 = scmp.lt.s32.totalorder %s8178_s27, 2  ;;  %p8334_p3 = por %p195_p2, %p39_p12 }
  0x3b   : > { %s8330_s17 = scalar_select %p30_p1, %s8174_s26, %s32_s15  }
  0x3c   : > { %p41_p0 = por %p40_p9, %p39_p12  ;;  %s269_s21 = sand.u32 1, %s8174_s26  }
  0x3d   : > { %s12217_s20 = scalar_select %p8334_p3, 1, 0 }
  0x3e   : > { %s6868_s22 = sshll.u32 %s8178_s27, 11  ;;  %s6595_s16 = sshll.u32 %s269_s21, 7 }
  0x3f   : > { %s8343_s10 = scalar_lea.hbm %s11965_s0, %s6868_s22  ;;  %s273_s11 = scalar_lea.vmem [#allocation3], %s6595_s16 }
  0x40   : > { %s280_s13 = sshll.u32 %s273_s11, 4  ;;  %p8345_p11 = pnand %p7794_p13, %p41_p0  ;;  %s8349_s13 = int_to_ptr.vmem [resolvable:$true] %s280_s13 }
  0x41   : > { %s8351_s15 = scalar_lea.sflag [#allocation4], %s269_s21  ;;  %s8078_s18 = scalar_lea.hbm %s8343_s10, 2048 }
  0x42   : > { %p8079_p2 = scmp.ne.s32.totalorder %s8343_s10, %s8078_s18  ;;  %p8080_p5 = pneg %p8345_p11 }
  0x43   : > { %s8083_s16 = scalar_lea.hbm %s11965_s0, 4096  ;;  %p8084_p1 = scmp.lt.s32.totalorder %s8343_s10, %s11965_s0 }
  0x44   : > { %p8081_p10 = pnand %p8080_p5, %p8079_p2  ;;  %p8085_p12 = scmp.lt.s32.totalorder %s8083_s16, %s8078_s18 }
  0x46   : > { %p8082_p7 = pneg %p8081_p10  ;;  %p8086_p9 = por %p8085_p12, %p8084_p1 }
  0x48   : > { %p8087_p13 = pnand %p8086_p9, %p8082_p7 }
  0x4a   : > { %8090 = shalt.err (!%p8087_p13)
}
  0x4b   : > { %s8091_s21 = scalar_lea.vmem %s8349_s13, 2048  ;;  %s8185_s19 = smov [#allocation3]  }
  0x4c   : > { %p8092_p0 = scmp.ne.s32.totalorder %s8349_s13, %s8091_s21  ;;  %s8096_s1 = sshll.u32 %s8185_s19, 4  ;;  %s8097_s1 = int_to_ptr.vmem [resolvable:$false] %s8096_s1 }
  0x4d   : > { %s8098_s22 = scalar_lea.vmem %s8097_s1, 4096  ;;  %p8099_p10 = scmp.lt.s32.totalorder %s8349_s13, %s8097_s1 }
  0x4e   : > { %p8094_p6 = pnand %p8092_p0, %p8080_p5  ;;  %p8100_p3 = scmp.lt.s32.totalorder %s8098_s22, %s8091_s21 }
  0x50   : > { %p8095_p2 = pneg %p8094_p6  ;;  %p8101_p4 = por %p8100_p3, %p8099_p10 }
  0x52   : > { %p8102_p8 = pnand %p8101_p4, %p8095_p2 }
  0x54   : > { %8105 = shalt.err (!%p8102_p8)
}
  0x55   : > { %s12219_s18 = smov 4   ;;  %s12220_s23 = smov 64  }
  0x56   : > { %7786 = dma.hbm_to_vmem [thread:$0]  (!%p8345_p11), %s8343_s10, 2048, %s8349_s13, %s8351_s15, %s12220_s23, %s12220_s23, %s12219_s18  }
  0x57   : > { %p12221_p6 = scmp.ne.s32.totalorder %s12214_s9, 0 }
  0x59   : > { %292 = sbr.rel (%p12221_p6) target bundleno = 1242 (0x4da), region = 48 }
  0x5e   : > { %s8378_s19 = sand.u32 1, %s8170_s25   ;;  %p12222_p4 = scmp.ne.s32.totalorder %s12212_s30, 0 }
  0x5f   : > { %s6599_s1 = sshll.u32 %s8378_s19, 7  ;;  %s295_s16 = scalar_lea.sflag [#allocation4], %s8378_s19 }
  0x60   : > { %s8382_s29 = scalar_lea.vmem [#allocation3], %s6599_s1 }
  0x61   : > { %8149 = dma.done.wait (%p12222_p4), %s295_s16, 2048  }
  0x62   : > { %8151 = vsyncadd (%p12222_p4), %s295_s16, 4294965248  ;;  %p12223_p8 = scmp.eq.s32.totalorder %s8252_s28, 0 }
  0x64   : > { %8153 = dma.done.wait (%p12223_p8), [#allocation7], 10240   ;;  %p12224_p3 = pmov %p12223_p8 }
  0x66   : > { %8155 = vsyncadd (%p12224_p3), [#allocation7], 4294957056  ;;  %p12225_p11 = pmov %p12224_p3 }
  0x67   : > { %p12226_p5 = pmov %p12224_p3 }
  0x68   : > { %8157 = dma.done.wait (%p12225_p11), [#allocation10], 1024  }
  0x69   : > { %8159 = vsyncadd (%p12226_p5), [#allocation10], 4294966272  ;;  %v11984_v0 = vmov 0   ;;  %v7840_v1 = vld [vmem:[#allocation6 + $0x38] sm:$0xff]   ;;  %v7841_v2 = vld [vmem:[#allocation6 + $0x30] sm:$0xff]   ;;  %v904_v55 = vlaneseq  ;;  %vm8187_vm5 = vmmov 1  }
  0x6a   : > { %737 = vst [vmem:[#allocation2 + $0x4] sm:$0xf] %v11984_v0  ;;  %738 = vst [vmem:[#allocation2 + $0x8] sm:$0xf] %v11984_v0  ;;  %7597 = vmatprep.subr.bf16.mxu0 %v7840_v1  ;;  %7741 = vmatprep.subr.bf16.mxu1 %v7840_v1  ;;  %v7842_v3 = vld [vmem:[#allocation6 + $0x28] sm:$0xff]   ;;  %v7843_v4 = vld [vmem:[#allocation6 + $0x20] sm:$0xff]  }
  0x6b   : > { %739 = vst [vmem:[#allocation2 + $0xc] sm:$0xf] %v11984_v0  ;;  %900 = vst [vmem:[#allocation2 + $0x90] sm:$0xf] %v11984_v0  ;;  %7598 = vmatpush3.bf16.msra.mxu0 %v7840_v1  ;;  %7749 = vmatpush3.bf16.msra.mxu1 %v7840_v1  ;;  %v7848_v5 = vld [vmem:[%s8382_s29] sm:$0xff]   ;;  %v7844_v6 = vld [vmem:[#allocation6 + $0x18] sm:$0xff]  }
  0x6c   : > { %901 = vst [vmem:[#allocation2 + $0x94] sm:$0xf] %v11984_v0  ;;  %902 = vst [vmem:[#allocation2 + $0x98] sm:$0xf] %v11984_v0  ;;  %7599 = vmatprep.subr.bf16.mxu0 %v7841_v2  ;;  %7742 = vmatprep.subr.bf16.mxu1 %v7841_v2  ;;  %v7845_v7 = vld [vmem:[#allocation6 + $0x10] sm:$0xff]   ;;  %v7856_v8 = vld [vmem:[%s8382_s29 + $0x40] sm:$0xff]  }
  0x6d   : > { %7613 = vmatprep.mubr.bf16.mxu0 %v7848_v5  ;;  %7629 = vmatprep.mubr.bf16.mxu1 %v7856_v8  ;;  %v7846_v9 = vld [vmem:[#allocation6 + $0x8] sm:$0xff]   ;;  %v7847_v10 = vld [vmem:[#allocation6] sm:$0xff]   ;;  %v7850_v13 = vld [vmem:[%s8382_s29 + $0x10] sm:$0xff]   ;;  %v8418_v58 = vshrl.u32 %v904_v55, 7  ;;  %vm2063_vm8 = vsmask.f32 256 }
  0x6e   : > { %v7849_v11 = vld [vmem:[%s8382_s29 + $0x8] sm:$0xff]   ;;  %v7858_v14 = vld [vmem:[%s8382_s29 + $0x50] sm:$0xff]   ;;  %v7851_v15 = vld [vmem:[%s8382_s29 + $0x18] sm:$0xff]   ;;  %vm2064_vm9 = vsmask.f32 4368  ;;  %s6603_s23 = sshll.u32 %s8378_s19, 8 }
  0x6f   : > { %7600 = vmatpush3.bf16.msra.mxu0 %v7841_v2  ;;  %7750 = vmatpush3.bf16.msra.mxu1 %v7841_v2  ;;  %v7857_v12 = vld [vmem:[%s8382_s29 + $0x48] sm:$0xff]   ;;  %v7859_v16 = vld [vmem:[%s8382_s29 + $0x58] sm:$0xff]   ;;  %v7852_v17 = vld [vmem:[%s8382_s29 + $0x20] sm:$0xff]   ;;  %12227 = vst [vmem:[#allocation16_spill] sm:$0xff] %v8418_v58  ;;  %v906_v59 = vadd.s32 8, %v8418_v58  ;;  %v907_v61 = vadd.s32 16, %v8418_v58 }
  0x70   : > { %7601 = vmatprep.subr.bf16.mxu0 %v7842_v3  ;;  %7743 = vmatprep.subr.bf16.mxu1 %v7842_v3  ;;  %v7860_v18 = vld [vmem:[%s8382_s29 + $0x60] sm:$0xff]   ;;  %v7853_v19 = vld [vmem:[%s8382_s29 + $0x28] sm:$0xff]   ;;  %v7854_v21 = vld [vmem:[%s8382_s29 + $0x30] sm:$0xff]   ;;  %v941_v62 = vand.u32 15, %v8418_v58  ;;  %v908_v5 = vadd.s32 24, %v8418_v58  ;;  %v913_v55 = vadd.s32 64, %v8418_v58 }
  0x71   : > { %v7861_v20 = vld [vmem:[%s8382_s29 + $0x68] sm:$0xff]   ;;  %v7862_v22 = vld [vmem:[%s8382_s29 + $0x70] sm:$0xff]   ;;  %v7855_v23 = vld [vmem:[%s8382_s29 + $0x38] sm:$0xff]   ;;  %v948_v60 = vand.u32 15, %v906_v59  ;;  %v955_v1 = vand.u32 15, %v907_v61  ;;  %s11840_s1 = scalar_lea.vmem [#allocation11], %s6603_s23 }
  0x72   : > { %v7863_v24 = vld [vmem:[%s8382_s29 + $0x78] sm:$0xff]   ;;  %v7868_v28 = vld [vmem:[#allocation8 + $0xf0] sm:$0xff]   ;;  %v7872_v32 = vld [vmem:[#allocation8 + $0xe8] sm:$0xff]   ;;  %vm1321_vm1 = vcmp.gt.s32.totalorder %v941_v62, 0  ;;  %vm12021_vm13 = vsmask.f32 3328 }
  0x73   : > { %7602 = vmatpush3.bf16.msra.mxu0 %v7842_v3  ;;  %7751 = vmatpush3.bf16.msra.mxu1 %v7842_v3  ;;  %v7864_v25 = vld [vmem:[#allocation8 + $0xf8] sm:$0xff]   ;;  %v7869_v30 = vld [vmem:[#allocation8 + $0xb0] sm:$0xff]   ;;  %v7873_v34 = vld [vmem:[#allocation8 + $0xa8] sm:$0xff]   ;;  %vm1354_vm0 = vcmp.lt.s32.totalorder %v948_v60, 15  ;;  %vm1323_vm4 = vcmp.gt.s32.totalorder %v955_v1, 0  ;;  %v12244_v60 = vmov 0 }
  0x74   : > { %7603 = vmatprep.subr.bf16.mxu0 %v7843_v4  ;;  %7744 = vmatprep.subr.bf16.mxu1 %v7843_v4  ;;  %v7865_v26 = vld [vmem:[#allocation8 + $0xb8] sm:$0xff]   ;;  %v7870_v31 = vld [vmem:[#allocation8 + $0x70] sm:$0xff]   ;;  %v7874_v35 = vld [vmem:[#allocation8 + $0x68] sm:$0xff]   ;;  %vm1547_vm14 = vsmask.f32 7440  ;;  %s6901_s16 = sshll.u32 %s8252_s28, 12 }
  0x75   : > { %v7866_v27 = vld [vmem:[#allocation8 + $0x78] sm:$0xff]   ;;  %v7871_v33 = vld [vmem:[#allocation8 + $0x30] sm:$0xff]   ;;  %v7876_v36 = vld [vmem:[#allocation8 + $0xe0] sm:$0xff]   ;;  %s11918_s10 = scalar_lea.hbm %s11972_s7, %s6901_s16  ;;  %s6474_s13 = scalar_lea.sflag [#allocation5], %s8378_s19 }
  0x76   : > { %v7867_v29 = vld [vmem:[#allocation8 + $0x38] sm:$0xff]   ;;  %v7875_v37 = vld [vmem:[#allocation8 + $0x28] sm:$0xff]   ;;  %v7877_v38 = vld [vmem:[#allocation8 + $0xa0] sm:$0xff]   ;;  %p13060_p1 = scmp.ne.s32.totalorder %s12217_s20, 0  ;;  %s8188_s28 = smov [#allocation11]  }
  0x77   : > { %7604 = vmatpush3.bf16.msra.mxu0 %v7843_v4  ;;  %7752 = vmatpush3.bf16.msra.mxu1 %v7843_v4  ;;  %v7878_v39 = vld [vmem:[#allocation8 + $0x60] sm:$0xff]   ;;  %v7880_v40 = vld [vmem:[#allocation8 + $0xd8] sm:$0xff]   ;;  %v7884_v44 = vld [vmem:[#allocation8 + $0xd0] sm:$0xff]   ;;  %s8110_s15 = sshll.u32 %s8188_s28, 4  ;;  %s8111_s15 = int_to_ptr.vmem [resolvable:$false] %s8110_s15 }
  0x78   : > { %7605 = vmatprep.subr.bf16.mxu0 %v7844_v6  ;;  %7745 = vmatprep.subr.bf16.mxu1 %v7844_v6  ;;  %v7879_v41 = vld [vmem:[#allocation8 + $0x20] sm:$0xff]   ;;  %v7881_v42 = vld [vmem:[#allocation8 + $0x98] sm:$0xff]   ;;  %v7885_v46 = vld [vmem:[#allocation8 + $0x90] sm:$0xff]   ;;  %s8112_s11 = scalar_lea.vmem %s8111_s15, 8192 }
  0x79   : > { %v7882_v43 = vld [vmem:[#allocation8 + $0x58] sm:$0xff]   ;;  %v7886_v47 = vld [vmem:[#allocation8 + $0x50] sm:$0xff]   ;;  %v7888_v48 = vld [vmem:[#allocation8 + $0xc8] sm:$0xff]  }
  0x7a   : > { %v7883_v45 = vld [vmem:[#allocation8 + $0x18] sm:$0xff]   ;;  %v7887_v49 = vld [vmem:[#allocation8 + $0x10] sm:$0xff]   ;;  %v7889_v50 = vld [vmem:[#allocation8 + $0x88] sm:$0xff]  }
  0x7b   : > { %7606 = vmatpush3.bf16.msra.mxu0 %v7844_v6  ;;  %7753 = vmatpush3.bf16.msra.mxu1 %v7844_v6  ;;  %v7890_v51 = vld [vmem:[#allocation8 + $0x48] sm:$0xff]   ;;  %v7892_v52 = vld [vmem:[#allocation8 + $0xc0] sm:$0xff]   ;;  %v7898_v63 = vld [vmem:[#allocation8 + $0x178] sm:$0xff]  }
  0x7c   : > { %7607 = vmatprep.subr.bf16.mxu0 %v7845_v7  ;;  %7746 = vmatprep.subr.bf16.mxu1 %v7845_v7  ;;  %v7891_v53 = vld [vmem:[#allocation8 + $0x8] sm:$0xff]   ;;  %v7893_v54 = vld [vmem:[#allocation8 + $0x80] sm:$0xff]   ;;  %vm2000_vm2 = vmpackc.low %vm1354_vm0, %vm1354_vm0 }
  0x7d   : > { %v7894_v56 = vld [vmem:[#allocation8 + $0x40] sm:$0xff]   ;;  %vm1482_vm3 = vmpackc.low %vm1321_vm1, %vm1321_vm1  ;;  %v2032_v2 = vsel %vm2000_vm2, 65537, %v11984_v0 }
  0x7e   : > { %v7895_v57 = vld [vmem:[#allocation8] sm:$0xff]   ;;  %vm1483_vm6 = vmpackc.low %vm8187_vm5, %vm8187_vm5  ;;  %v1514_v3 = vsel %vm1482_vm3, 65537, %v11984_v0  ;;  %v2075_v6 = vshrl.u32 %v2032_v2, 16 }
  0x7f   : > { %7608 = vmatpush3.bf16.msra.mxu0 %v7845_v7  ;;  %7754 = vmatpush3.bf16.msra.mxu1 %v7845_v7  ;;  %vm1484_vm7 = vmpackc.low %vm1323_vm4, %vm1323_vm4  ;;  %v1515_v4 = vsel %vm1483_vm6, 65537, %v11984_v0  ;;  %v1550_v7 = vshll.u32 %v1514_v3, 16  ;;  %v1553_v8 = vshrl.u32 %v1514_v3, 16  ;;  %v1385_v59 = vld [vmem:[#allocation2 + $0x4] sm:$0x8] }
  0x80   : > { %7609 = vmatprep.subr.bf16.mxu0 %v7846_v9  ;;  %7747 = vmatprep.subr.bf16.mxu1 %v7846_v9  ;;  %vm8442_vm11 = vmor %vm2063_vm8, %vm2064_vm9 }
  0x81   : > { %vm8463_vm15 = vmor %vm12021_vm13, %vm1547_vm14 }
  0x83   : > { %7610 = vmatpush3.bf16.msra.mxu0 %v7846_v9  ;;  %7755 = vmatpush3.bf16.msra.mxu1 %v7846_v9  ;;  %v1516_v9 = vsel %vm1484_vm7, 65537, %v11984_v0 }
  0x84   : > { %7611 = vmatprep.subr.bf16.mxu0 %v7847_v10  ;;  %7748 = vmatprep.subr.bf16.mxu1 %v7847_v10 }
  0x87   : > { %7612 = vmatpush3.bf16.msra.mxu0 %v7847_v10  ;;  %7756 = vmatpush3.bf16.msra.mxu1 %v7847_v10  ;;  %v1559_v10 = vshll.u32 %v1515_v4, 16 }
  0x88   : > { %7213 = vmatprep.subr.bf16.mxu0 %v7864_v25  ;;  %7101 = vmatprep.subr.bf16.mxu1 %v7866_v27 }
  0x8a   : > { %7614 = vmatmul.mubr.bf16.vlgmr.msra.gmra.mxu0 %v7849_v11  ;;  %7630 = vmatmul.mubr.bf16.vlgmr.msra.gmra.mxu1 %v7857_v12  ;;  %v1563_v11 = vshrl.u32 %v1515_v4, 16  ;;  %v912_v4 = vadd.s32 56, %v8418_v58 }
  0x8b   : > { %7617 = vmatprep.mubr.bf16.mxu0 %v7850_v13  ;;  %7633 = vmatprep.mubr.bf16.mxu1 %v7858_v14  ;;  %v962_v13 = vand.u32 15, %v908_v5  ;;  %v8428_v14 = vrot.slane %v2075_v6, 7 }
  0x8c   : > { %7214 = vmatpush3.bf16.msra.mxu0 %v7865_v26  ;;  %7102 = vmatpush3.bf16.msra.mxu1 %v7867_v29  ;;  %v2069_v12 = vrot.slane %v1563_v11, 7 }
  0x8d   : > { %7215 = vmatprep.subr.bf16.mxu0 %v7868_v28  ;;  %7103 = vmatprep.subr.bf16.mxu1 %v7870_v31  ;;  %vm8435_vm10 = vcmp.lt.s32.totalorder %v962_v13, 15 }
  0x8e   : > { %vm2002_vm12 = vmpackc.low %vm8435_vm10, %vm8435_vm10  ;;  %v8451_v31 = vor.u32 %v2069_v12, %v1559_v10 }
  0x90   : > { %7216 = vmatpush3.bf16.msra.mxu0 %v7869_v30  ;;  %7104 = vmatpush3.bf16.msra.mxu1 %v7871_v33  ;;  %12233 = vst [vmem:[#allocation18_spill] sm:$0xff] %v8451_v31  ;;  %v910_v33 = vadd.s32 40, %v8418_v58  ;;  %vm12018_vm0 = vcmp.ne.s16.totalorder %v8451_v31, 0 }
  0x91   : > { %7217 = vmatprep.subr.bf16.mxu0 %v7872_v32  ;;  %7105 = vmatprep.subr.bf16.mxu1 %v7874_v35  ;;  %v1386_v35 = vld [vmem:[#allocation2 + $0x8] sm:$0xf] }
  0x92   : > { %7618 = vmatmul.mubr.bf16.gmra.mxu0 %v7851_v15  ;;  %7634 = vmatmul.mubr.bf16.gmra.mxu1 %v7859_v16  ;;  %v2078_v15 = vshll.u32 %v2032_v2, 16  ;;  %v8430_v16 = vrot.slane %v1550_v7, 5 }
  0x93   : > { %7621 = vmatprep.mubr.bf16.mxu0 %v7852_v17  ;;  %7637 = vmatprep.mubr.bf16.mxu1 %v7860_v18  ;;  %v1555_v17 = vrot.slane %v1553_v8, 4  ;;  %v1569_v18 = vshll.u32 %v1516_v9, 16  ;;  %v997_v8 = vand.u32 15, %v913_v55 }
  0x94   : > { %7218 = vmatpush3.bf16.msra.mxu0 %v7873_v34  ;;  %7106 = vmatpush3.bf16.msra.mxu1 %v7875_v37  ;;  %12228 = vst [vmem:[#allocation17_spill] sm:$0xff] %v8430_v16  ;;  %v2080_v25 = vor.u32 %v2078_v15, %v8428_v14  ;;  %vm12007_vm5 = vcmp.ne.s16.totalorder %v8430_v16, 0  ;;  %v2082_v15 = vrot.slane %v8428_v14, 4 }
  0x95   : > { %7219 = vmatprep.subr.bf16.mxu0 %v7876_v36  ;;  %7107 = vmatprep.subr.bf16.mxu1 %v7878_v39  ;;  %v1556_v27 = vor.u32 %v1555_v17, %v8430_v16  ;;  %v1571_v29 = vrot.slane %v1569_v18, 5  ;;  %v8457_v36 = vld [vmem:[#allocation2 + $0xc] sm:$0xf]  ;;  %v1901_v6 = vsel %vm12007_vm5, %v1385_v59, 0  ;;  %vm8542_vm10 = vcmp.gt.s32.totalorder %v997_v8, 0 }
  0x97   : > { %v1557_v37 = vrot.slane %v1556_v27, 4 }
  0x98   : > { %7220 = vmatpush3.bf16.msra.mxu0 %v7877_v38  ;;  %7108 = vmatpush3.bf16.msra.mxu1 %v7879_v41 }
  0x99   : > { %7221 = vmatprep.subr.bf16.mxu0 %v7880_v40  ;;  %7109 = vmatprep.subr.bf16.mxu1 %v7882_v43  ;;  %v2034_v40 = vsel %vm2002_vm12, 65537, %v11984_v0 }
  0x9a   : > { %7622 = vmatmul.mubr.bf16.gmra.mxu0 %v7853_v19  ;;  %7638 = vmatmul.mubr.bf16.gmra.mxu1 %v7861_v20  ;;  %v1573_v19 = vshrl.u32 %v1516_v9, 16  ;;  %v8432_v20 = vrot.slane %v1559_v10, 5  ;;  %v2096_v62 = vshll.u32 %v2034_v40, 16  ;;  %v2419_v9 = vld [vmem:[#allocation2 + $0xc] sm:$0x8] }
  0x9b   : > { %7625 = vmatprep.mubr.bf16.mxu0 %v7854_v21  ;;  %7641 = vmatprep.mubr.bf16.mxu1 %v7862_v22  ;;  %v1565_v21 = vrot.slane %v1563_v11, 4  ;;  %v909_v22 = vadd.s32 32, %v8418_v58  ;;  %v8538_v27 = vsel %vm12007_vm5, %v2419_v9, 0  ;;  %v917_v9 = vadd.s32 96, %v8418_v58 }
  0x9c   : > { %7222 = vmatpush3.bf16.msra.mxu0 %v7881_v42  ;;  %7110 = vmatpush3.bf16.msra.mxu1 %v7883_v45  ;;  %v1575_v30 = vrot.slane %v1573_v19, 4  ;;  %v12237_v42 = vmov 0  ;;  %v2386_v45 = vsel %vm12018_vm0, %v1386_v35, 0  ;;  %v914_v19 = vadd.s32 72, %v8418_v58 }
  0x9d   : > { %7223 = vmatprep.subr.bf16.mxu0 %v7884_v44  ;;  %7111 = vmatprep.subr.bf16.mxu1 %v7886_v47  ;;  %v1566_v28 = vor.u32 %v1565_v21, %v8432_v20  ;;  %v969_v32 = vand.u32 15, %v909_v22  ;;  %v976_v44 = vand.u32 15, %v910_v33  ;;  %v6678_v47 = vcombine.low %v1386_v35, %v8457_v36 }
  0x9e   : > { %v1576_v39 = vor.u32 %v1575_v30, %v1571_v29  ;;  %vm12019_vm5 = vcmask 1042432  }
  0x9f   : > { %v8459_v38 = vrot.slane %v1566_v28, 4  ;;  %vm8472_vm2 = vcmp.gt.s32.totalorder %v969_v32, 0  ;;  %vm8494_vm4 = vcmp.lt.s32.totalorder %v976_v44, 15 }
  0xa0   : > { %7224 = vmatpush3.bf16.msra.mxu0 %v7885_v46  ;;  %7112 = vmatpush3.bf16.msra.mxu1 %v7887_v49  ;;  %v1562_v49 = vsel %vm8463_vm15, %v1557_v37, %v8432_v20  ;;  %vm1486_vm3 = vmpackc.low %vm8472_vm2, %vm8472_vm2 }
  0xa1   : > { %7225 = vmatprep.subr.bf16.mxu0 %v7888_v48  ;;  %7113 = vmatprep.subr.bf16.mxu1 %v7890_v51  ;;  %12234 = vst [vmem:[#allocation19_spill] sm:$0xff] %v8459_v38  ;;  %v2093_v48 = vshrl.u32 %v2034_v40, 16  ;;  %v911_v51 = vadd.s32 48, %v8418_v58  ;;  %vm8500_vm6 = vcmp.ne.s16.totalorder %v1562_v49, 0  ;;  %vm2004_vm8 = vmpackc.low %vm8494_vm4, %vm8494_vm4  ;;  %v1004_v40 = vand.u32 15, %v914_v19 }
  0xa2   : > { %7626 = vmatmul.mubr.bf16.gmra.mxu0 %v7855_v23  ;;  %7642 = vmatmul.mubr.bf16.gmra.mxu1 %v7863_v24  ;;  %v8439_v24 = vrot.slane %v2069_v12, 4  ;;  %v12245_v60 = vsel %vm8500_vm6, 4294967295, %v12244_v60  ;;  %v1902_v7 = vsel %vm8500_vm6, %v1386_v35, 0  ;;  %v2036_v18 = vsel %vm2004_vm8, 65537, %v11984_v0  ;;  %vm1490_vm2 = vmpackc.low %vm8542_vm10, %vm8542_vm10 }
  0xa3   : > { %12246 = vst [vmem:[#allocation21_spill] sm:$0xff] %v12245_v60  ;;  %v8504_v61 = vrot.slane %v2093_v48, 7  ;;  %v983_v3 = vand.u32 15, %v911_v51  ;;  %v6661_v21 = vcombine.low %v1901_v6, %v1902_v7  ;;  %v990_v23 = vand.u32 15, %v912_v4 }
  0xa4   : > { %7226 = vmatpush3.bf16.msra.mxu0 %v7889_v50  ;;  %7114 = vmatpush3.bf16.msra.mxu1 %v7891_v53  ;;  %v2081_v34 = vsel %vm8442_vm11, %v8439_v24, %v2080_v25  ;;  %v8485_v50 = vrot.slane %v1576_v39, 4  ;;  %v915_v25 = vadd.s32 80, %v8418_v58  ;;  %v8553_v35 = vsel %vm8442_vm11, %v2082_v15, %v8451_v31 }
  0xa5   : > { %7227 = vmatprep.subr.bf16.mxu0 %v7892_v52  ;;  %7115 = vmatprep.subr.bf16.mxu1 %v7894_v56  ;;  %vm8468_vm1 = vcmp.ne.s16.totalorder %v2081_v34, 0  ;;  %v1572_v52 = vsel %vm8463_vm15, %v8459_v38, %v1571_v29  ;;  %v2723_v56 = vshrl.u32 %v6678_v47, 16  ;;  %v8527_v17 = vor.u32 %v2096_v62, %v8504_v61  ;;  %12253 = vst [vmem:[#allocation22_spill] sm:$0xff] %v8553_v35 }
  0xa6   : > { %v12238_v42 = vsel %vm8468_vm1, 4294967295, %v12237_v42  ;;  %v2387_v46 = vsel %vm8468_vm1, %v8457_v36, 0  ;;  %vm8511_vm7 = vcmp.ne.s16.totalorder %v1572_v52, 0  ;;  %vm8531_vm9 = vcmp.gt.s32.totalorder %v983_v3, 0 }
  0xa7   : > { %12239 = vst [vmem:[#allocation20_spill] sm:$0xff] %v12238_v42  ;;  %v6694_v53 = vcombine.low %v2386_v45, %v2387_v46  ;;  %v2725_v10 = vrot.slane %v2723_v56, 4  ;;  %v2111_v34 = vshrl.u32 %v2036_v18, 16  ;;  %vm1488_vm12 = vmpackc.low %vm8531_vm9, %vm8531_vm9  ;;  %v3561_v43 = vshrl.u32 %v6661_v21, 16 }
  0xa8   : > { %7228 = vmatpush3.bf16.msra.mxu0 %v7893_v54  ;;  %7116 = vmatpush3.bf16.msra.mxu1 %v7895_v57  ;;  %v2726_v57 = vshll.u32 %v6678_v47, 16  ;;  %v3564_v44 = vshll.u32 %v6661_v21, 16  ;;  %vm8565_vm14 = vcmp.lt.s32.totalorder %v990_v23, 15  ;;  %v1011_v46 = vand.u32 15, %v915_v25 }
  0xa9   : > { %7325 = vmatprep.subr.bf16.mxu1 %v7898_v63  ;;  %v1518_v63 = vsel %vm1486_vm3, 65537, %v11984_v0  ;;  %v8519_v5 = vrot.slane %v6694_v53, 5  ;;  %v2100_v49 = vrot.slane %v8504_v61, 4  ;;  %v2114_v51 = vshll.u32 %v2036_v18, 16  ;;  %vm2006_vm3 = vmpackc.low %vm8565_vm14, %vm8565_vm14 }
  0xaa   : > { %v2728_v11 = vrot.slane %v2726_v57, 5  ;;  %v1589_v12 = vshll.u32 %v1518_v63, 16  ;;  %v1593_v13 = vshrl.u32 %v1518_v63, 16  ;;  %v8579_v54 = vrot.slane %v2111_v34, 7 }
  0xab   : > { %v3595_v14 = vshrl.u32 %v8519_v5, 16  ;;  %v3598_v28 = vshll.u32 %v8519_v5, 16  ;;  %v1520_v55 = vsel %vm1488_vm12, 65537, %v11984_v0  ;;  %v1522_v57 = vsel %vm1490_vm2, 65537, %v11984_v0 }
  0xac   : > { %v8546_v30 = vor.u32 %v2728_v11, %v2725_v10  ;;  %v8548_v32 = vrot.slane %v1589_v12, 5  ;;  %v1595_v33 = vrot.slane %v1593_v13, 4  ;;  %v1613_v56 = vshrl.u32 %v1520_v55, 16 }
  0xad   : > { %v8572_v47 = vrot.slane %v3595_v14, 3  ;;  %v8574_v48 = vrot.slane %v3598_v28, 4  ;;  %vm8586_vm4 = vcmp.lt.s32.totalorder %v1004_v40, 15  ;;  %v916_v61 = vadd.s32 88, %v8418_v58 }
  0xae   : > { %v3578_v52 = vshrl.u32 %v8546_v30, 16  ;;  %v1596_v53 = vor.u32 %v1595_v33, %v8548_v32  ;;  %v3581_v62 = vshll.u32 %v8546_v30, 16  ;;  %v8592_v63 = vrot.slane %v3561_v43, 3  ;;  %vm2008_vm9 = vmpackc.low %vm8586_vm4, %vm8586_vm4 }
  0xaf   : > { %v8594_v3 = vrot.slane %v3564_v44, 4  ;;  %vm8596_vm8 = vcmp.gt.s32.totalorder %v1011_v46, 0  ;;  %v8605_v7 = vsel %vm8442_vm11, %v2100_v49, %v8451_v31  ;;  %v1609_v8 = vshll.u32 %v1520_v55, 16 }
  0xb0   : > { %12260 = vst [vmem:[#allocation23_spill] sm:$0xff] %v8605_v7  ;;  %v2038_v11 = vsel %vm2006_vm3, 65537, %v11984_v0  ;;  %v1629_v12 = vshll.u32 %v1522_v57, 16  ;;  %v1633_v13 = vshrl.u32 %v1522_v57, 16  ;;  %v8616_v15 = vrot.slane %v1596_v53, 4  ;;  %vm1492_vm10 = vmpackc.low %vm8596_vm8, %vm8596_vm8 }
  0xb1   : > { %v8619_v18 = vor.u32 %v2114_v51, %v8579_v54  ;;  %v1615_v19 = vrot.slane %v1613_v56, 4  ;;  %v1018_v21 = vand.u32 15, %v916_v61  ;;  %v8624_v22 = vrot.slane %v3578_v52, 3 }
  0xb2   : > { %v8626_v23 = vrot.slane %v3581_v62, 4  ;;  %v919_v14 = vadd.s32 112, %v8418_v58  ;;  %v8631_v28 = vrot.slane %v1609_v8, 5  ;;  %v2129_v29 = vshrl.u32 %v2038_v11, 16 }
  0xb3   : > { %v2040_v33 = vsel %vm2008_vm9, 65537, %v11984_v0  ;;  %v1025_v34 = vand.u32 15, %v917_v9  ;;  %v8634_v40 = vrot.slane %v1629_v12, 5  ;;  %v1635_v43 = vrot.slane %v1633_v13, 4 }
  0xb4   : > { %v1524_v44 = vsel %vm1492_vm10, 65537, %v11984_v0  ;;  %v918_v45 = vadd.s32 104, %v8418_v58  ;;  %v1616_v46 = vor.u32 %v1615_v19, %v8631_v28  ;;  %vm8639_vm12 = vcmp.lt.s32.totalorder %v1018_v21, 15 }
  0xb5   : > { %v1653_v49 = vshrl.u32 %v1524_v44, 16  ;;  %v921_v52 = vadd.s32 128, %v8418_v58  ;;  %v2147_v55 = vshrl.u32 %v2040_v33, 16  ;;  %v1039_v56 = vand.u32 15, %v919_v14  ;;  %vm2010_vm2 = vmpackc.low %vm8639_vm12, %vm8639_vm12 }
  0xb6   : > { %v920_v57 = vadd.s32 120, %v8418_v58  ;;  %v2131_v59 = vrot.slane %v2129_v29, 7  ;;  %v2132_v61 = vshll.u32 %v2038_v11, 16  ;;  %v1649_v62 = vshll.u32 %v1524_v44, 16 }
  0xb7   : > { %vm8649_vm14 = vcmp.gt.s32.totalorder %v1025_v34, 0  ;;  %v1636_v9 = vor.u32 %v1635_v43, %v8634_v40  ;;  %v1032_v12 = vand.u32 15, %v918_v45  ;;  %v922_v13 = vadd.s32 136, %v8418_v58 }
  0xb8   : > { %v8664_v19 = vrot.slane %v1616_v46, 4  ;;  %v1655_v21 = vrot.slane %v1653_v49, 4  ;;  %v1053_v14 = vand.u32 15, %v921_v52  ;;  %v8666_v29 = vrot.slane %v2147_v55, 7  ;;  %vm1494_vm3 = vmpackc.low %vm8649_vm14, %vm8649_vm14 }
  0xb9   : > { %v2150_v34 = vshll.u32 %v2040_v33, 16  ;;  %vm8671_vm4 = vcmp.gt.s32.totalorder %v1039_v56, 0  ;;  %v1046_v44 = vand.u32 15, %v920_v57  ;;  %v2118_v45 = vrot.slane %v8579_v54, 4 }
  0xba   : > { %v8676_v51 = vor.u32 %v2132_v61, %v2131_v59  ;;  %v8678_v46 = vrot.slane %v1649_v62, 5  ;;  %v2042_v49 = vsel %vm2010_vm2, 65537, %v11984_v0  ;;  %v8685_v52 = vrot.slane %v1636_v9, 4  ;;  %vm1496_vm9 = vmpackc.low %vm8671_vm4, %vm8671_vm4 }
  0xbb   : > { %vm8687_vm8 = vcmp.lt.s32.totalorder %v1032_v12, 15  ;;  %v1060_v56 = vand.u32 15, %v922_v13  ;;  %v2136_v57 = vrot.slane %v2131_v59, 4  ;;  %v1526_v61 = vsel %vm1494_vm3, 65537, %v11984_v0 }
  0xbc   : > { %12267 = vst [vmem:[#allocation24_spill] sm:$0xff] %v8678_v46  ;;  %v1656_v54 = vor.u32 %v1655_v21, %v8678_v46  ;;  %vm8696_vm10 = vcmp.gt.s32.totalorder %v1053_v14, 0  ;;  %v8705_v9 = vor.u32 %v2150_v34, %v8666_v29  ;;  %v2165_v59 = vshrl.u32 %v2042_v49, 16  ;;  %vm2012_vm14 = vmpackc.low %vm8687_vm8, %vm8687_vm8 }
  0xbd   : > { %vm8707_vm12 = vcmp.lt.s32.totalorder %v1046_v44, 15  ;;  %v8714_v13 = vsel %vm8442_vm11, %v2118_v45, %v8451_v31  ;;  %v923_v34 = vadd.s32 144, %v8418_v58  ;;  %v1669_v43 = vshll.u32 %v1526_v61, 16  ;;  %vm1498_vm2 = vmpackc.low %vm8696_vm10, %vm8696_vm10 }
  0xbe   : > { %12272 = vst [vmem:[#allocation25_spill] sm:$0xff] %v8705_v9  ;;  %12275 = vst [vmem:[#allocation26_spill] sm:$0xff] %v8714_v13  ;;  %v1673_v44 = vshrl.u32 %v1526_v61, 16  ;;  %v1528_v45 = vsel %vm1496_vm9, 65537, %v11984_v0  ;;  %vm8732_vm3 = vcmp.lt.s32.totalorder %v1060_v56, 15  ;;  %v8743_v14 = vsel %vm8442_vm11, %v2136_v57, %v8451_v31 }
  0xbf   : > { %12278 = vst [vmem:[#allocation27_spill] sm:$0xff] %v8743_v14  ;;  %v8745_v61 = vrot.slane %v1656_v54, 4  ;;  %vm2014_vm4 = vmpackc.low %vm8707_vm12, %vm8707_vm12  ;;  %v1067_v56 = vand.u32 15, %v923_v34  ;;  %v8754_v25 = vrot.slane %v2165_v59, 7  ;;  %v2168_v55 = vshll.u32 %v2042_v49, 16 }
  0xc0   : > { %v2044_v21 = vsel %vm2012_vm14, 65537, %v11984_v0  ;;  %v1689_v6 = vshll.u32 %v1528_v45, 16  ;;  %v1693_v57 = vshrl.u32 %v1528_v45, 16  ;;  %v1530_v54 = vsel %vm1498_vm2, 65537, %v11984_v0  ;;  %vm2016_vm8 = vmpackc.low %vm8732_vm3, %vm8732_vm3 }
  0xc1   : > { %12279 = vst [vmem:[#allocation28_spill] sm:$0xff] %v8745_v61  ;;  %vm1339_vm9 = vcmp.gt.s32.totalorder %v1067_v56, 0  ;;  %v8765_v34 = vrot.slane %v1669_v43, 5  ;;  %v1675_v59 = vrot.slane %v1673_v44, 4  ;;  %v2046_v49 = vsel %vm2014_vm4, 65537, %v11984_v0 }
  0xc2   : > { %vm1500_vm10 = vmpackc.low %vm1339_vm9, %vm1339_vm9  ;;  %v2154_v62 = vrot.slane %v8666_v29, 4  ;;  %v2183_v33 = vshrl.u32 %v2044_v21, 16  ;;  %v8775_v39 = vor.u32 %v2168_v55, %v8754_v25  ;;  %v1709_v12 = vshll.u32 %v1530_v54, 16 }
  0xc3   : > { %12280 = vst [vmem:[#allocation29_spill] sm:$0xff] %v8765_v34  ;;  %v1532_v56 = vsel %vm1500_vm10, 65537, %v11984_v0  ;;  %v1713_v43 = vshrl.u32 %v1530_v54, 16  ;;  %v925_v44 = vadd.s32 160, %v8418_v58  ;;  %v8778_v4 = vrot.slane %v1689_v6, 5 }
  0xc4   : > { %v1695_v8 = vrot.slane %v1693_v57, 4  ;;  %v2201_v53 = vshrl.u32 %v2046_v49, 16  ;;  %v2048_v29 = vsel %vm2016_vm8, 65537, %v11984_v0  ;;  %v1729_v45 = vshll.u32 %v1532_v56, 16 }
  0xc5   : > { %12281 = vst [vmem:[#allocation30_spill] sm:$0xff] %v8778_v4  ;;  %v1733_v37 = vshrl.u32 %v1532_v56, 16  ;;  %v924_v55 = vadd.s32 152, %v8418_v58  ;;  %v1081_v10 = vand.u32 15, %v925_v44  ;;  %v1676_v54 = vor.u32 %v1675_v59, %v8765_v34 }
  0xc6   : > { %v2185_v1 = vrot.slane %v2183_v33, 7  ;;  %v2186_v16 = vshll.u32 %v2044_v21, 16  ;;  %v926_v6 = vadd.s32 168, %v8418_v58  ;;  %v8789_v57 = vrot.slane %v1709_v12, 5 }
  0xc7   : > { %v1715_v42 = vrot.slane %v1713_v43, 4  ;;  %v1074_v46 = vand.u32 15, %v924_v55  ;;  %vm1341_vm12 = vcmp.gt.s32.totalorder %v1081_v10, 0  ;;  %v1696_v11 = vor.u32 %v1695_v8, %v8778_v4 }
  0xc8   : > { %12282 = vst [vmem:[#allocation31_spill] sm:$0xff] %v8789_v57  ;;  %v2203_v61 = vrot.slane %v2201_v53, 7  ;;  %v2219_v0 = vshrl.u32 %v2048_v29, 16  ;;  %vm1502_vm14 = vmpackc.low %vm1341_vm12, %vm1341_vm12  ;;  %v1088_v56 = vand.u32 15, %v926_v6  ;;  %v8792_v9 = vrot.slane %v1729_v45, 5 }
  0xc9   : > { %v1735_v44 = vrot.slane %v1733_v37, 4  ;;  %vm1372_vm2 = vcmp.lt.s32.totalorder %v1074_v46, 15  ;;  %v12284_v59 = vmov 0   ;;  %v2204_v21 = vshll.u32 %v2046_v49, 16 }
  0xca   : > { %12283 = vst [vmem:[#allocation32_spill] sm:$0xff] %v8792_v9  ;;  %v1534_v33 = vsel %vm1502_vm14, 65537, %v12284_v59  ;;  %vm2018_vm3 = vmpackc.low %vm1372_vm2, %vm1372_vm2  ;;  %vm8795_vm4 = vcmp.lt.s32.totalorder %v1088_v56, 15  ;;  %v8802_v10 = vsel %vm8442_vm11, %v2154_v62, %v8451_v31  ;;  %v8804_v53 = vrot.slane %v1676_v54, 4 }
  0xcb   : > { %v1749_v14 = vshll.u32 %v1534_v33, 16  ;;  %v1753_v12 = vshrl.u32 %v1534_v33, 16  ;;  %12287 = vst [vmem:[#allocation33_spill] sm:$0xff] %v8802_v10  ;;  %v1716_v37 = vor.u32 %v1715_v42, %v8789_v57  ;;  %v2050_v8 = vsel %vm2018_vm3, 65537, %v12284_v59  ;;  %vm2020_vm8 = vmpackc.low %vm8795_vm4, %vm8795_vm4 }
  0xcc   : > { %12288 = vst [vmem:[#allocation34_spill] sm:$0xff] %v8804_v53  ;;  %v2221_v49 = vrot.slane %v2219_v0, 7  ;;  %v2222_v45 = vshll.u32 %v2048_v29, 16  ;;  %v2237_v55 = vshrl.u32 %v2050_v8, 16  ;;  %v2172_v6 = vrot.slane %v8754_v25, 4 }
  0xcd   : > { %v8813_v56 = vor.u32 %v2186_v16, %v2185_v1  ;;  %v8815_v62 = vrot.slane %v1696_v11, 4  ;;  %v1736_v54 = vor.u32 %v1735_v44, %v8792_v9  ;;  %v2190_v42 = vrot.slane %v2185_v1, 4 }
  0xce   : > { %v8821_v33 = vor.u32 %v2204_v21, %v2203_v61  ;;  %v8823_v10 = vrot.slane %v1749_v14, 5  ;;  %v1755_v0 = vrot.slane %v1753_v12, 4  ;;  %v8833_v29 = vrot.slane %v1716_v37, 4 }
  0xcf   : > { %12289 = vst [vmem:[#allocation35_spill] sm:$0xff] %v8813_v56  ;;  %12290 = vst [vmem:[#allocation36_spill] sm:$0xff] %v8815_v62  ;;  %v2208_v11 = vrot.slane %v2203_v61, 4  ;;  %v8835_v44 = vor.u32 %v2222_v45, %v2221_v49  ;;  %v8837_v1 = vrot.slane %v2237_v55, 7  ;;  %v2240_v14 = vshll.u32 %v2050_v8, 16 }
  0xd0   : > { %12291 = vst [vmem:[#allocation37_spill] sm:$0xff] %v8821_v33  ;;  %12292 = vst [vmem:[#allocation38_spill] sm:$0xff] %v8833_v29  ;;  %v8840_v21 = vsel %vm2020_vm8, 65537, %v12284_v59  ;;  %v8845_v12 = vsel %vm8442_vm11, %v2172_v6, %v8451_v31  ;;  %v8855_v37 = vrot.slane %v1736_v54, 4  ;;  %v8860_v8 = vld [vmem:[%s11967_s2] ss:$0 sm:$0xff]  ;;  %v8869_v55 = vsel %vm8442_vm11, %v2190_v42, %v8451_v31 }
  0xd1   : > { %12293 = vst [vmem:[#allocation39_spill] sm:$0xff] %v8835_v44  ;;  %12294 = vst [vmem:[#allocation40_spill] sm:$0xff] %v8845_v12  ;;  %v1756_v54 = vor.u32 %v1755_v0, %v8823_v10  ;;  %v2226_v43 = vrot.slane %v2221_v49, 4  ;;  %v2255_v42 = vshrl.u32 %v8840_v21, 16  ;;  %v8888_v6 = vsel %vm8442_vm11, %v2208_v11, %v8451_v31 }
  0xd2   : > { %12295 = vst [vmem:[#allocation41_spill] sm:$0xff] %v8855_v37  ;;  %12296 = vst [vmem:[#allocation42_spill] sm:$0xff] %v8869_v55  ;;  %v8895_v61 = vor.u32 %v2240_v14, %v8837_v1  ;;  %v927_v45 = vadd.s32 176, %v8418_v58  ;;  %v7914_v14 = vld [vmem:[#allocation8 + $0x1f8] sm:$0xff]   ;;  %v928_v4 = vadd.s32 184, %v8418_v58  ;;  %vm12017_vm8 = vcmp.ne.s16.totalorder %v8553_v35, 0 }
  0xd3   : > { %12297 = vst [vmem:[#allocation43_spill] sm:$0xff] %v8888_v6  ;;  %v8908_v29 = vrot.slane %v1756_v54, 4  ;;  %v8917_v11 = vsel %vm8442_vm11, %v2226_v43, %v8451_v31  ;;  %v8919_v6 = vrot.slane %v2255_v42, 7  ;;  %7437 = vmatprep.subr.bf16.mxu0 %v7914_v14 }
  0xd4   : > { %12298 = vst [vmem:[#allocation44_spill] sm:$0xff] %v8895_v61  ;;  %12299 = vst [vmem:[#allocation45_spill] sm:$0xff] %v8917_v11 }
 0x14a   : > { %v7615_v25 = vpop.f32.mrf.mxu0  ;;  %v7631_v16 = vpop.f32.mrf.mxu1 }
 0x14b   : > { %v586_v49 = vadd.f32 %v7615_v25, %v8860_v8  ;;  %v650_v46 = vadd.f32 %v7631_v16, %v8860_v8  ;;  %v2258_v25 = vshll.u32 %v8840_v21, 16  ;;  %v1095_v16 = vand.u32 15, %v927_v45 }
 0x14c   : > { %v577_v0 = vpop.f32.mrf.mxu0  ;;  %v641_v44 = vpop.f32.mrf.mxu1  ;;  %v929_v45 = vadd.s32 192, %v8418_v58 }
 0x14d   : > { %v578_v33 = vadd.f32 %v8860_v8, %v577_v0  ;;  %v642_v55 = vadd.f32 %v8860_v8, %v641_v44  ;;  %v706_v37 = vmax.f32 %v586_v49, 0.0  ;;  %vm1343_vm9 = vcmp.gt.s32.totalorder %v1095_v16, 0 }
 0x14e   : > { %v7616_v9 = vpop.f32.mrf.mxu0  ;;  %v7632_v54 = vpop.f32.mrf.mxu1  ;;  %v722_v57 = vmax.f32 %v650_v46, 0.0  ;;  %vm1504_vm10 = vmpackc.low %vm1343_vm9, %vm1343_vm9  ;;  %v1109_v56 = vand.u32 15, %v929_v45  ;;  %v12302_v45 = vsel %vm8463_vm15, %v8485_v50, %v8432_v20 }
 0x14f   : > { %v704_v44 = vmax.f32 %v578_v33, 0.0  ;;  %v589_v0 = vadd.f32 %v7616_v9, %v8860_v8  ;;  %v653_v43 = vadd.f32 %v7632_v54, %v8860_v8  ;;  %v720_v49 = vmax.f32 %v642_v55, 0.0 }
 0x150   : > { %v580_v42 = vpop.f32.mrf.mxu0  ;;  %v644_v11 = vpop.f32.mrf.mxu1  ;;  %v1536_v62 = vsel %vm1504_vm10, 65537, %v12284_v59  ;;  %v1102_v54 = vand.u32 15, %v928_v4  ;;  %vm8932_vm12 = vcmp.gt.s32.totalorder %v1109_v56, 0  ;;  %vm8942_vm14 = vcmp.ne.s16.totalorder %v12302_v45, 0 }
 0x151   : > { %v707_v21 = vmax.f32 %v589_v0, 0.0  ;;  %v581_v14 = vadd.f32 %v8860_v8, %v580_v42  ;;  %v723_v16 = vmax.f32 %v653_v43, 0.0  ;;  %v645_v33 = vadd.f32 %v8860_v8, %v644_v11  ;;  %vm1506_vm4 = vmpackc.low %vm8932_vm12, %vm8932_vm12 }
 0x152   : > { %v7619_v61 = vpop.f32.mrf.mxu0  ;;  %v7635_v9 = vpop.f32.mrf.mxu1  ;;  %v1769_v46 = vshll.u32 %v1536_v62, 16  ;;  %v1773_v12 = vshrl.u32 %v1536_v62, 16  ;;  %v12303_v11 = vmov 0  ;;  %v12305_v4 = vsel %vm8463_vm15, %v8459_v38, %v8548_v32 }
 0x153   : > { %v6910_v55 = vpack.c.bf16 %v707_v21, %v706_v37  ;;  %v705_v34 = vmax.f32 %v581_v14, 0.0  ;;  %v602_v58 = vadd.f32 %v7619_v61, %v8860_v8  ;;  %v12304_v11 = vsel %vm8942_vm14, 4294967295, %v12303_v11 }
 0x154   : > { %vm8951_vm2 = vcmp.ne.s16.totalorder %v12305_v4, 0  ;;  %v12306_v56 = vmov 0  ;;  %v6950_v62 = vpack.c.bf16 %v723_v16, %v722_v57  ;;  %v593_v61 = vpop.f32.mrf.mxu0  ;;  %v721_v37 = vmax.f32 %v645_v33, 0.0  ;;  %v657_v0 = vpop.f32.mrf.mxu1 }
 0x155   : > { %v12307_v56 = vsel %vm8951_vm2, 4294967295, %v12306_v56  ;;  %v666_v21 = vadd.f32 %v7635_v9, %v8860_v8  ;;  %v8956_v50 = vrot.slane %v1769_v46, 5  ;;  %v1775_v43 = vrot.slane %v1773_v12, 4  ;;  %7047 = vst [vmem:[#allocation2 + $0x18] sm:$0xff] %v6910_v55  }
 0x156   : > { %12308 = vst [vmem:[#allocation46_spill] sm:$0xff] %v12307_v56  ;;  %v6905_v42 = vpack.c.bf16 %v705_v34, %v704_v44  ;;  %v594_v14 = vadd.f32 %v8860_v8, %v593_v61  ;;  %7055 = vst [vmem:[#allocation2 + $0x58] sm:$0xff] %v6950_v62   ;;  %v8964_v57 = vor.u32 %v2258_v25, %v8919_v6  ;;  %v7620_v16 = vpop.f32.mrf.mxu0  ;;  %v7636_v46 = vpop.f32.mrf.mxu1  ;;  %vm8968_vm3 = vcmp.lt.s32.totalorder %v1102_v54, 15 }
 0x157   : > { %v6945_v33 = vpack.c.bf16 %v721_v37, %v720_v49  ;;  %v658_v9 = vadd.f32 %v8860_v8, %v657_v0  ;;  %v1776_v12 = vor.u32 %v1775_v43, %v8956_v50  ;;  %v710_v44 = vmax.f32 %v602_v58, 0.0  ;;  %vm2022_vm10 = vmpackc.low %vm8968_vm3, %vm8968_vm3 }
 0x158   : > { %7046 = vst [vmem:[#allocation2 + $0x10] sm:$0xff] %v6905_v42   ;;  %v605_v25 = vadd.f32 %v7620_v16, %v8860_v8  ;;  %v12311_v49 = vsel %vm8442_vm11, %v8439_v24, %v8527_v17  ;;  %v12312_v54 = vmov 0  ;;  %v726_v55 = vmax.f32 %v666_v21, 0.0  ;;  %v596_v4 = vpop.f32.mrf.mxu0  ;;  %v660_v62 = vpop.f32.mrf.mxu1 }
 0x159   : > { %vm8982_vm9 = vcmp.ne.s16.totalorder %v12311_v49, 0  ;;  %v669_v45 = vadd.f32 %v7636_v46, %v8860_v8  ;;  %v708_v58 = vmax.f32 %v594_v14, 0.0  ;;  %7054 = vst [vmem:[#allocation2 + $0x50] sm:$0xff] %v6945_v33   ;;  %v12315_v61 = vrot.slane %v8837_v1, 4 }
 0x15a   : > { %v12313_v54 = vsel %vm8982_vm9, 4294967295, %v12312_v54  ;;  %v9001_v21 = vrot.slane %v1776_v12, 4  ;;  %v711_v0 = vmax.f32 %v605_v25, 0.0  ;;  %v597_v43 = vadd.f32 %v8860_v8, %v596_v4  ;;  %v7623_v16 = vpop.f32.mrf.mxu0 }
 0x15b   : > { %12314 = vst [vmem:[#allocation47_spill] sm:$0xff] %v12313_v54  ;;  %v8999_v37 = vsel %vm8442_vm11, %v12315_v61, %v8451_v31  ;;  %v727_v42 = vmax.f32 %v669_v45, 0.0  ;;  %v661_v14 = vadd.f32 %v8860_v8, %v660_v62  ;;  %v724_v33 = vmax.f32 %v658_v9, 0.0 }
 0x15c   : > { %12316 = vst [vmem:[#allocation48_spill] sm:$0xff] %v8999_v37  ;;  %v9015_v46 = vsel %vm2022_vm10, 65537, %v12284_v59  ;;  %v9023_v9 = vsel %vm1506_vm4, 65537, %v12284_v59  ;;  %v6920_v12 = vpack.c.bf16 %v711_v0, %v710_v44  ;;  %v709_v25 = vmax.f32 %v597_v43, 0.0  ;;  %v609_v4 = vpop.f32.mrf.mxu0  ;;  %v9026_v62 = vld [vmem:[#allocation2 + $0x18] sm:$0xf] }
 0x15d   : > { %12317 = vst [vmem:[#allocation49_spill] sm:$0xff] %v9015_v46  ;;  %12318 = vst [vmem:[#allocation50_spill] sm:$0xff] %v9023_v9  ;;  %v618_v49 = vadd.f32 %v7623_v16, %v8860_v8  ;;  %v6960_v45 = vpack.c.bf16 %v727_v42, %v726_v55  ;;  %v9028_v34 = vld [vmem:[#allocation2 + $0x1c] sm:$0xf]  ;;  %v725_v61 = vmax.f32 %v661_v14, 0.0  ;;  %v610_v43 = vadd.f32 %v8860_v8, %v609_v4 }
 0x15e   : > { %7049 = vst [vmem:[#allocation2 + $0x28] sm:$0xff] %v6920_v12   ;;  %v6915_v55 = vpack.c.bf16 %v709_v25, %v708_v58  ;;  %vm12024_vm12 = vsmask.f32 4352  ;;  %v7624_v14 = vpop.f32.mrf.mxu0  ;;  %v2425_v53 = vsel %vm8942_vm14, %v9026_v62, 0  ;;  %v9050_v12 = vcombine.low %v9026_v62, %v9028_v34 }
 0x15f   : > { %v714_v0 = vmax.f32 %v618_v49, 0.0  ;;  %7057 = vst [vmem:[#allocation2 + $0x68] sm:$0xff] %v6960_v45   ;;  %v9041_v16 = vld [vmem:[#allocation2 + $0x10] sm:$0xf]  ;;  %v9043_v1 = vld [vmem:[#allocation2 + $0x14] sm:$0xf]  ;;  %v6955_v25 = vpack.c.bf16 %v725_v61, %v724_v33  ;;  %v621_v45 = vadd.f32 %v7624_v14, %v8860_v8  ;;  %v12319_v54 = vsel %vm8463_vm15, %v8616_v15, %v8432_v20 }
 0x160   : > { %7048 = vst [vmem:[#allocation2 + $0x20] sm:$0xff] %v6915_v55   ;;  %v712_v49 = vmax.f32 %v610_v43, 0.0  ;;  %v2423_v4 = vsel %vm8500_vm6, %v9041_v16, 0  ;;  %v2424_v42 = vsel %vm8511_vm7, %v9043_v1, 0  ;;  %v612_v17 = vpop.f32.mrf.mxu0  ;;  %v2388_v33 = vsel %vm12017_vm8, %v9041_v16, 0 }
 0x161   : > { %v6711_v32 = vcombine.low %v8538_v27, %v2423_v4  ;;  %v6712_v44 = vcombine.low %v2424_v42, %v2425_v53  ;;  %v2389_v61 = vsel %vm8982_vm9, %v9043_v1, 0  ;;  %7056 = vst [vmem:[#allocation2 + $0x60] sm:$0xff] %v6955_v25   ;;  %v715_v55 = vmax.f32 %v621_v45, 0.0 }
 0x162   : > { %v613_v43 = vadd.f32 %v8860_v8, %v612_v17  ;;  %v9070_v14 = vcombine.low %v2388_v33, %v2389_v61  ;;  %v6679_v58 = vcombine.low %v9041_v16, %v9043_v1  ;;  %v7627_v60 = vpop.f32.mrf.mxu0  ;;  %vm9079_vm3 = vcmp.ne.s16.totalorder %v12319_v54, 0 }
 0x163   : > { %v3612_v27 = vshrl.u32 %v6711_v32, 16  ;;  %v3615_v53 = vshll.u32 %v6711_v32, 16  ;;  %v3620_v42 = vshrl.u32 %v6712_v44, 16  ;;  %v3623_v4 = vshll.u32 %v6712_v44, 16 }
 0x164   : > { %v12320_v25 = vmov 0  ;;  %v6930_v17 = vpack.c.bf16 %v715_v55, %v714_v0  ;;  %v713_v45 = vmax.f32 %v613_v43, 0.0  ;;  %v634_v33 = vadd.f32 %v7627_v60, %v8860_v8  ;;  %v625_v35 = vpop.f32.mrf.mxu0 }
 0x165   : > { %v12321_v25 = vsel %vm9079_vm3, 4294967295, %v12320_v25  ;;  %v2950_v61 = vrot.slane %v9070_v14, 5  ;;  %v3614_v59 = vrot.slane %v3612_v27, 3  ;;  %v3617_v32 = vrot.slane %v3615_v53, 4 }
 0x166   : > { %12322 = vst [vmem:[#allocation51_spill] sm:$0xff] %v12321_v25  ;;  %v3622_v9 = vrot.slane %v3620_v42, 3  ;;  %v3625_v44 = vrot.slane %v3623_v4, 4  ;;  %vm12020_vm4 = vcmp.ne.s16.totalorder %v8605_v7, 0  ;;  %7051 = vst [vmem:[#allocation2 + $0x38] sm:$0xff] %v6930_v17   ;;  %v6925_v46 = vpack.c.bf16 %v713_v45, %v712_v49  ;;  %v7628_v43 = vpop.f32.mrf.mxu0 }
 0x167   : > { %v718_v15 = vmax.f32 %v634_v33, 0.0  ;;  %v626_v54 = vadd.f32 %v8860_v8, %v625_v35  ;;  %v2951_v0 = vsel %vm12019_vm5, %v8519_v5, %v2950_v61  ;;  %v12323_v60 = vsel %vm8442_vm11, %v8439_v24, %v8619_v18 }
 0x168   : > { %vm9096_vm10 = vcmp.ne.s16.totalorder %v12323_v60, 0  ;;  %v12324_v55 = vmov 0  ;;  %v3618_v27 = vor.u32 %v3617_v32, %v3614_v59  ;;  %v9100_v49 = vor.u32 %v3625_v44, %v3622_v9  ;;  %7050 = vst [vmem:[#allocation2 + $0x30] sm:$0xff] %v6925_v46   ;;  %v628_v18 = vpop.f32.mrf.mxu0  ;;  %v9108_v9 = vld [vmem:[#allocation2 + $0x20] sm:$0xf] }
 0x169   : > { %v12325_v55 = vsel %vm9096_vm10, 4294967295, %v12324_v55  ;;  %v3603_v53 = vshrl.u32 %v2951_v0, 16  ;;  %v3606_v35 = vshll.u32 %v2951_v0, 16  ;;  %v716_v42 = vmax.f32 %v626_v54, 0.0 }
 0x16a   : > { %12326 = vst [vmem:[#allocation52_spill] sm:$0xff] %v12325_v55  ;;  %v637_v4 = vadd.f32 %v7628_v43, %v8860_v8  ;;  %v2731_v5 = vshrl.u32 %v6679_v58, 16  ;;  %v2734_v17 = vshll.u32 %v6679_v58, 16  ;;  %v3627_v45 = vsel %vm12024_vm12, %v3618_v27, %v9100_v49 }
 0x16b   : > { %v3605_v33 = vrot.slane %v3603_v53, 3  ;;  %v3608_v60 = vrot.slane %v3606_v35, 4  ;;  %v1904_v59 = vsel %vm8942_vm14, %v9041_v16, 0  ;;  %5421 = vmatprep.mubr.bf16.mxu0 %v3627_v45  ;;  %v629_v46 = vadd.f32 %v8860_v8, %v628_v18 }
 0x16c   : > { %v719_v32 = vmax.f32 %v637_v4, 0.0  ;;  %v2733_v44 = vrot.slane %v2731_v5, 4  ;;  %v2736_v54 = vrot.slane %v2734_v17, 5  ;;  %v12327_v58 = vsel %vm8463_vm15, %v8664_v19, %v8432_v20  ;;  %v7915_v5 = vld [vmem:[#allocation8 + $0x1b8] sm:$0xff]  }
 0x16d   : > { %vm9116_vm8 = vcmp.ne.s16.totalorder %v12327_v58, 0  ;;  %v12328_v0 = vmov 0  ;;  %v9120_v43 = vor.u32 %v3608_v60, %v3605_v33  ;;  %v12331_v16 = vsel %vm8511_vm7, %v8457_v36, 0 }
 0x16e   : > { %v12329_v0 = vsel %vm9116_vm8, 4294967295, %v12328_v0  ;;  %v6662_v27 = vcombine.low %v12331_v16, %v1904_v59  ;;  %v2740_v53 = vshrl.u32 %v9050_v12, 16  ;;  %v2743_v35 = vshll.u32 %v9050_v12, 16  ;;  %v7920_v12 = vld [vmem:[#allocation8 + $0x1f0] sm:$0xff]  }
 0x16f   : > { %12330 = vst [vmem:[#allocation53_spill] sm:$0xff] %v12329_v0  ;;  %v12332_v19 = vsel %vm8463_vm15, %v8459_v38, %v8631_v28  ;;  %v12333_v4 = vmov 0  ;;  %v6940_v17 = vpack.c.bf16 %v719_v32, %v718_v15  ;;  %v717_v45 = vmax.f32 %v629_v46, 0.0 }
 0x170   : > { %vm9133_vm0 = vcmp.ne.s16.totalorder %v12332_v19, 0  ;;  %v9137_v18 = vor.u32 %v2736_v54, %v2733_v44  ;;  %v2427_v36 = vsel %vm9079_vm3, %v9108_v9, 0  ;;  %v12337_v28 = vor.u32 %v8574_v48, %v8572_v47 }
 0x171   : > { %v12334_v4 = vsel %vm9133_vm0, 4294967295, %v12333_v4  ;;  %v3569_v60 = vshrl.u32 %v6662_v27, 16  ;;  %v3572_v59 = vshll.u32 %v6662_v27, 16  ;;  %v2742_v58 = vrot.slane %v2740_v53, 4  ;;  %7053 = vst [vmem:[#allocation2 + $0x48] sm:$0xff] %v6940_v17   ;;  %v7921_v27 = vld [vmem:[#allocation8 + $0x1b0] sm:$0xff]  }
 0x172   : > { %12335 = vst [vmem:[#allocation54_spill] sm:$0xff] %v12334_v4  ;;  %12336 = vst [vmem:[#allocation55_spill] sm:$0xff] %v9137_v18  ;;  %v3610_v33 = vsel %vm12024_vm12, %v12337_v28, %v9120_v43  ;;  %v6935_v15 = vpack.c.bf16 %v717_v45, %v716_v42  ;;  %v2738_v32 = vsel %vm12021_vm13, %v8546_v30, %v9137_v18  ;;  %v2745_v46 = vrot.slane %v2743_v35, 5 }
 0x173   : > { %5422 = vmatmul.mubr.bf16.vlgmr.msra.gmra.mxu0 %v3610_v33  ;;  %v12338_v44 = vsel %vm8951_vm2, %v9028_v34, 0  ;;  %v3586_v16 = vshrl.u32 %v2738_v32, 16  ;;  %v3589_v47 = vshll.u32 %v2738_v32, 16  ;;  %v3571_v48 = vrot.slane %v3569_v60, 3  ;;  %v9179_v32 = vld [vmem:[#allocation2 + $0x28] sm:$0xf] }
 0x174   : > { %v6713_v54 = vcombine.low %v12338_v44, %v2427_v36  ;;  %v3574_v19 = vrot.slane %v3572_v59, 4  ;;  %7438 = vmatpush3.bf16.msra.mxu0 %v7915_v5  ;;  %7052 = vst [vmem:[#allocation2 + $0x40] sm:$0xff] %v6935_v15   ;;  %v9155_v53 = vor.u32 %v2745_v46, %v2742_v58  ;;  %v2390_v30 = vsel %vm12020_vm4, %v9026_v62, 0  ;;  %v9165_v5 = vld [vmem:[#allocation2 + $0x24] sm:$0xf] }
 0x175   : > { %7439 = vmatprep.subr.bf16.mxu0 %v7920_v12  ;;  %v3588_v35 = vrot.slane %v3586_v16, 3  ;;  %v3591_v45 = vrot.slane %v3589_v47, 4  ;;  %v2391_v36 = vsel %vm9096_vm10, %v9028_v34, 0  ;;  %v12339_v33 = vsel %vm8442_vm11, %v8439_v24, %v8676_v51  ;;  %v7639_v12 = vpop.f32.mrf.mxu1 }
 0x176   : > { %v3733_v42 = vshrl.u32 %v6713_v54, 16  ;;  %v3736_v17 = vshll.u32 %v6713_v54, 16  ;;  %v9160_v28 = vor.u32 %v3574_v19, %v3571_v48  ;;  %vm9172_vm5 = vcmp.ne.s16.totalorder %v12339_v33, 0 }
 0x177   : > { %v12340_v60 = vmov 0  ;;  %v2747_v59 = vsel %vm12021_vm13, %v9137_v18, %v9155_v53  ;;  %v9182_v46 = vadd.f32 %v7639_v12, %v8860_v8  ;;  %v3592_v44 = vor.u32 %v3591_v45, %v3588_v35  ;;  %v9331_v18 = vld [vmem:[#allocation2 + $0x34] sm:$0xf] }
 0x178   : > { %v12341_v60 = vsel %vm9172_vm5, 4294967295, %v12340_v60  ;;  %v3735_v58 = vrot.slane %v3733_v42, 3  ;;  %v3738_v15 = vrot.slane %v3736_v17, 4  ;;  %v3637_v54 = vshrl.u32 %v2747_v59, 16  ;;  %7440 = vmatpush3.bf16.msra.mxu0 %v7921_v27  ;;  %v7899_v42 = vld [vmem:[#allocation8 + $0x138] sm:$0xff]  }
 0x179   : > { %12342 = vst [vmem:[#allocation56_spill] sm:$0xff] %v12341_v60  ;;  %v3640_v16 = vshll.u32 %v2747_v59, 16  ;;  %v12343_v51 = vrot.slane %v8919_v6, 4  ;;  %v12345_v48 = vor.u32 %v8594_v3, %v8592_v63  ;;  %v9196_v33 = vcombine.low %v2390_v30, %v2391_v36  ;;  %v7902_v59 = vld [vmem:[#allocation8 + $0x170] sm:$0xff]  }
 0x17a   : > { %v3739_v17 = vor.u32 %v3738_v15, %v3735_v58  ;;  %v2428_v35 = vsel %vm9133_vm0, %v9165_v5, 0  ;;  %v12346_v6 = vsel %vm8463_vm15, %v8459_v38, %v8634_v40  ;;  %v12347_v27 = vmov 0  ;;  %v12355_v58 = vld [vmem:[#allocation27_spill] sm:$0xff] }
 0x17b   : > { %v9189_v47 = vsel %vm8442_vm11, %v12343_v51, %v8451_v31  ;;  %v3576_v19 = vsel %vm12024_vm12, %v12345_v48, %v9160_v28  ;;  %vm9206_vm4 = vcmp.ne.s16.totalorder %v12346_v6, 0  ;;  %v12350_v63 = vor.u32 %v8626_v23, %v8624_v22  ;;  %v7903_v6 = vld [vmem:[#allocation8 + $0x130] sm:$0xff]  }
 0x17c   : > { %12344 = vst [vmem:[#allocation57_spill] sm:$0xff] %v9189_v47  ;;  %v12348_v27 = vsel %vm9206_vm4, 4294967295, %v12347_v27  ;;  %v3639_v30 = vrot.slane %v3637_v54, 3  ;;  %v3642_v45 = vrot.slane %v3640_v16, 4  ;;  %v2429_v36 = vsel %vm9116_vm8, %v9179_v32, 0 }
 0x17d   : > { %12349 = vst [vmem:[#allocation58_spill] sm:$0xff] %v12348_v27  ;;  %v3593_v3 = vsel %vm12024_vm12, %v12350_v63, %v3592_v44  ;;  %v12351_v40 = vsel %vm8463_vm15, %v8685_v52, %v8432_v20  ;;  %v12352_v12 = vmov 0  ;;  %v3740_v22 = vsel %vm12024_vm12, %v9100_v49, %v3739_v17  ;;  %v9501_v27 = vld [vmem:[#allocation2 + $0x48] sm:$0xf] }
 0x17e   : > { %vm9222_vm13 = vcmp.ne.s16.totalorder %v12351_v40, 0  ;;  %5260 = vmatprep.mubr.bf16.mxu1 %v3593_v3  ;;  %v12028_v23 = vrot.slane %v9196_v33, 5  ;;  %v6714_v15 = vcombine.low %v2428_v35, %v2429_v36  ;;  %v1905_v54 = vsel %vm8951_vm2, %v9043_v1, 0  ;;  %5429 = vmatprep.mubr.bf16.mxu0 %v3740_v22 }
 0x17f   : > { %v12353_v12 = vsel %vm9222_vm13, 4294967295, %v12352_v12  ;;  %5261 = vmatmul.mubr.bf16.vlgmr.msra.gmra.mxu1 %v3576_v19  ;;  %v9233_v52 = vor.u32 %v3642_v45, %v3639_v30  ;;  %v1906_v16 = vsel %vm9079_vm3, %v9026_v62, 0  ;;  %v6681_v51 = vcombine.low %v9108_v9, %v9165_v5  ;;  %v7906_v45 = vld [vmem:[#allocation8 + $0x168] sm:$0xff]  }
 0x180   : > { %12354 = vst [vmem:[#allocation59_spill] sm:$0xff] %v12353_v12  ;;  %vm12356_vm10 = vcmp.ne.s16.totalorder %v8714_v13, 0  ;;  %7326 = vmatpush3.bf16.msra.mxu1 %v7899_v42  ;;  %vm12357_vm12 = vcmask 1042432   ;;  %v3797_v48 = vshrl.u32 %v6714_v15, 16  ;;  %v3800_v19 = vshll.u32 %v6714_v15, 16 }
 0x181   : > { %v2392_v49 = vsel %vm12356_vm10, %v9108_v9, 0  ;;  %v2953_v1 = vsel %vm12357_vm12, %v2950_v61, %v12028_v23  ;;  %v6663_v35 = vcombine.low %v1905_v54, %v1906_v16  ;;  %vm12358_vm3 = vsmask.f32 4352  ;;  %7327 = vmatprep.subr.bf16.mxu1 %v7902_v59  ;;  %v9250_v15 = vld [vmem:[#allocation2 + $0x30] sm:$0xf] }
 0x182   : > { %v3722_v62 = vsel %vm12358_vm3, %v3592_v44, %v9233_v52  ;;  %v3724_v63 = vshrl.u32 %v2953_v1, 16  ;;  %v3727_v3 = vshll.u32 %v2953_v1, 16  ;;  %v2749_v30 = vshrl.u32 %v6681_v51, 16  ;;  %v12359_v44 = vld [vmem:[#allocation25_spill] sm:$0xff]  ;;  %v9420_v12 = vld [vmem:[#allocation2 + $0x40] sm:$0xf] }
 0x183   : > { %5268 = vmatprep.mubr.bf16.mxu1 %v3722_v62  ;;  %v3799_v42 = vrot.slane %v3797_v48, 3  ;;  %v3802_v36 = vrot.slane %v3800_v19, 4  ;;  %v3714_v40 = vshrl.u32 %v6663_v35, 16  ;;  %v3717_v22 = vshll.u32 %v6663_v35, 16  ;;  %v9261_v59 = vld [vmem:[#allocation2 + $0x2c] sm:$0xf] }
 0x184   : > { %v3726_v14 = vrot.slane %v3724_v63, 3  ;;  %v3729_v13 = vrot.slane %v3727_v3, 4  ;;  %v2751_v61 = vrot.slane %v2749_v30, 4  ;;  %v2752_v23 = vshll.u32 %v6681_v51, 16  ;;  %7328 = vmatpush3.bf16.msra.mxu1 %v7903_v6  ;;  %v7907_v35 = vld [vmem:[#allocation8 + $0x128] sm:$0xff]  }
 0x185   : > { %v12360_v54 = vsel %vm8442_vm11, %v8439_v24, %v12359_v44  ;;  %v12361_v16 = vmov 0  ;;  %v9263_v1 = vor.u32 %v3802_v36, %v3799_v42  ;;  %v3716_v48 = vrot.slane %v3714_v40, 3  ;;  %7329 = vmatprep.subr.bf16.mxu1 %v7906_v45 }
 0x186   : > { %vm9257_vm12 = vcmp.ne.s16.totalorder %v12360_v54, 0  ;;  %v3719_v19 = vrot.slane %v3717_v22, 4  ;;  %v2393_v51 = vsel %vm9172_vm5, %v9165_v5, 0  ;;  %v9268_v62 = vor.u32 %v3729_v13, %v3726_v14  ;;  %vm12374_vm5 = vmmov %vm12358_vm3 }
 0x187   : > { %v12362_v16 = vsel %vm9257_vm12, 4294967295, %v12361_v16  ;;  %v2754_v63 = vrot.slane %v2752_v23, 5  ;;  %v9270_v3 = vcombine.low %v2392_v49, %v2393_v51  ;;  %v2430_v30 = vsel %vm9206_vm4, %v9261_v59, 0  ;;  %v12364_v23 = vld [vmem:[#allocation28_spill] sm:$0xff] }
 0x188   : > { %12363 = vst [vmem:[#allocation25_spill] sm:$0xff] %v12362_v16  ;;  %v3804_v42 = vsel %vm12358_vm3, %v3739_v17, %v9263_v1  ;;  %v9277_v36 = vor.u32 %v3719_v19, %v3716_v48  ;;  %v2431_v6 = vsel %vm9222_vm13, %v9250_v15, 0  ;;  %v1907_v13 = vsel %vm9133_vm0, %v9028_v34, 0  ;;  %v7910_v17 = vld [vmem:[#allocation8 + $0x160] sm:$0xff]   ;;  %7330 = vmatpush3.bf16.msra.mxu1 %v7907_v35  ;;  %v12471_v16 = vld [vmem:[#allocation45_spill] sm:$0xff] }
 0x189   : > { %v12365_v49 = vsel %vm8463_vm15, %v12364_v23, %v8432_v20  ;;  %v12366_v45 = vmov 0  ;;  %v3731_v40 = vsel %vm12358_vm3, %v9120_v43, %v9268_v62  ;;  %v9297_v22 = vor.u32 %v2754_v63, %v2751_v61  ;;  %v12369_v34 = vld [vmem:[#allocation24_spill] sm:$0xff]  ;;  %v12376_v63 = vld [vmem:[#allocation33_spill] sm:$0xff]  ;;  %7331 = vmatprep.subr.bf16.mxu1 %v7910_v17 }
 0x18a   : > { %vm9290_vm10 = vcmp.ne.s16.totalorder %v12365_v49, 0  ;;  %v12045_v14 = vrot.slane %v9270_v3, 5  ;;  %v6715_v44 = vcombine.low %v2430_v30, %v2431_v6  ;;  %v12370_v54 = vsel %vm8463_vm15, %v8459_v38, %v12369_v34  ;;  %5430 = vmatmul.mubr.bf16.gmra.mxu0 %v3731_v40  ;;  %v7911_v30 = vld [vmem:[#allocation8 + $0x120] sm:$0xff]   ;;  %v7916_v40 = vld [vmem:[#allocation8 + $0x158] sm:$0xff]  }
 0x18b   : > { %v12367_v45 = vsel %vm9290_vm10, 4294967295, %v12366_v45  ;;  %vm9305_vm0 = vcmp.ne.s16.totalorder %v12370_v54, 0  ;;  %v12371_v48 = vmov 0  ;;  %v3721_v19 = vsel %vm12374_vm5, %v9160_v28, %v9277_v36  ;;  %5437 = vmatprep.mubr.bf16.mxu0 %v3804_v42 }
 0x18c   : > { %12368 = vst [vmem:[#allocation28_spill] sm:$0xff] %v12367_v45  ;;  %v12372_v48 = vsel %vm9305_vm0, 4294967295, %v12371_v48  ;;  %v1908_v43 = vsel %vm9116_vm8, %v9108_v9, 0  ;;  %v6682_v61 = vcombine.low %v9179_v32, %v9261_v59  ;;  %vm12375_vm3 = vcmp.ne.s16.totalorder %v12355_v58, 0  ;;  %5269 = vmatmul.mubr.bf16.gmra.mxu1 %v3721_v19 }
 0x18d   : > { %12373 = vst [vmem:[#allocation24_spill] sm:$0xff] %v12372_v48  ;;  %v2394_v51 = vsel %vm12375_vm3, %v9179_v32, 0  ;;  %vm12377_vm5 = vsmask.f32 3328  ;;  %v12378_v9 = vrot.slane %v9196_v33, 5  ;;  %vm12379_vm8 = vcmask 1042432   ;;  %7332 = vmatpush3.bf16.msra.mxu1 %v7911_v30 }
 0x18e   : > { %v2756_v28 = vsel %vm12377_vm5, %v9155_v53, %v9297_v22  ;;  %v3860_v23 = vshrl.u32 %v6715_v44, 16  ;;  %v3863_v49 = vshll.u32 %v6715_v44, 16  ;;  %v6664_v0 = vcombine.low %v1907_v13, %v1908_v43  ;;  %v7917_v33 = vld [vmem:[#allocation8 + $0x118] sm:$0xff]   ;;  %7333 = vmatprep.subr.bf16.mxu1 %v7916_v40 }
 0x18f   : > { %v2955_v6 = vsel %vm12379_vm8, %v12378_v9, %v12045_v14  ;;  %v3688_v34 = vshrl.u32 %v2756_v28, 16  ;;  %v3691_v54 = vshll.u32 %v2756_v28, 16  ;;  %v2758_v4 = vshrl.u32 %v6682_v61, 16  ;;  %v9340_v43 = vld [vmem:[#allocation2 + $0x38] sm:$0xf] }
 0x190   : > { %v3788_v58 = vshrl.u32 %v2955_v6, 16  ;;  %v3791_v35 = vshll.u32 %v2955_v6, 16  ;;  %v3862_v42 = vrot.slane %v3860_v23, 3  ;;  %v3865_v19 = vrot.slane %v3863_v49, 4 }
 0x191   : > { %v3690_v60 = vrot.slane %v3688_v34, 3  ;;  %v3693_v25 = vrot.slane %v3691_v54, 4  ;;  %v3779_v9 = vshrl.u32 %v6664_v0, 16  ;;  %v3782_v44 = vshll.u32 %v6664_v0, 16  ;;  %7334 = vmatpush3.bf16.msra.mxu1 %v7917_v33 }
 0x192   : > { %v3790_v56 = vrot.slane %v3788_v58, 3  ;;  %v3793_v55 = vrot.slane %v3791_v35, 4  ;;  %v9329_v7 = vor.u32 %v3865_v19, %v3862_v42  ;;  %v2760_v14 = vrot.slane %v2758_v4, 4  ;;  %v7923_v35 = vld [vmem:[#allocation8 + $0x110] sm:$0xff]  }
 0x193   : > { %v9333_v28 = vor.u32 %v3693_v25, %v3690_v60  ;;  %v2761_v13 = vshll.u32 %v6682_v61, 16  ;;  %v2395_v58 = vsel %vm9257_vm12, %v9261_v59, 0  ;;  %v12380_v0 = vsel %vm8442_vm11, %v8439_v24, %v8775_v39  ;;  %v7922_v25 = vld [vmem:[#allocation8 + $0x150] sm:$0xff]  }
 0x194   : > { %v9335_v17 = vor.u32 %v3793_v55, %v3790_v56  ;;  %vm9347_vm8 = vcmp.ne.s16.totalorder %v12380_v0, 0  ;;  %v12381_v4 = vmov 0  ;;  %vm12384_vm3 = vsmask.f32 4352  ;;  %7335 = vmatprep.subr.bf16.mxu1 %v7922_v25 }
 0x195   : > { %v12382_v4 = vsel %vm9347_vm8, 4294967295, %v12381_v4  ;;  %v3867_v56 = vsel %vm12384_vm3, %v9263_v1, %v9329_v7  ;;  %v3781_v55 = vrot.slane %v3779_v9, 3  ;;  %v3784_v60 = vrot.slane %v3782_v44, 4  ;;  %vm12385_vm5 = vmmov %vm12384_vm3  ;;  %v12388_v1 = vld [vmem:[#allocation29_spill] sm:$0xff]  ;;  %v12393_v44 = vld [vmem:[#allocation34_spill] sm:$0xff]  ;;  %7336 = vmatpush3.bf16.msra.mxu1 %v7923_v35 }
 0x196   : > { %12383 = vst [vmem:[#allocation60_spill] sm:$0xff] %v12382_v4  ;;  %v9354_v61 = vcombine.low %v2394_v51, %v2395_v58  ;;  %v9359_v30 = vsel %vm12385_vm5, %v9233_v52, %v9333_v28  ;;  %vm12387_vm2 = vmmov %vm12384_vm3  ;;  %v2763_v6 = vrot.slane %v2761_v13, 5  ;;  %v2432_v23 = vsel %vm9305_vm0, %v9331_v18, 0 }
 0x197   : > { %12386 = vst [vmem:[#allocation61_spill] sm:$0xff] %v9359_v30  ;;  %v3795_v39 = vsel %vm12387_vm2, %v9268_v62, %v9335_v17  ;;  %v12389_v51 = vsel %vm8463_vm15, %v8459_v38, %v12388_v1  ;;  %v12390_v49 = vmov 0  ;;  %5276 = vmatprep.mubr.bf16.mxu1 %v9359_v30  ;;  %v9377_v40 = vor.u32 %v3784_v60, %v3781_v55 }
 0x198   : > { %vm9372_vm3 = vcmp.ne.s16.totalorder %v12389_v51, 0  ;;  %5438 = vmatmul.mubr.bf16.gmra.mxu0 %v3795_v39  ;;  %v12052_v62 = vrot.slane %v9354_v61, 5  ;;  %v2433_v34 = vsel %vm9290_vm10, %v9340_v43, 0  ;;  %v1909_v54 = vsel %vm9206_vm4, %v9165_v5, 0  ;;  %v7926_v5 = vld [vmem:[#allocation8 + $0x1e8] sm:$0xff]  }
 0x199   : > { %v12391_v49 = vsel %vm9372_vm3, 4294967295, %v12390_v49  ;;  %5445 = vmatprep.mubr.bf16.mxu0 %v3867_v56  ;;  %v9386_v42 = vor.u32 %v2763_v6, %v2760_v14  ;;  %v6716_v19 = vcombine.low %v2432_v23, %v2433_v34  ;;  %v1910_v33 = vsel %vm9222_vm13, %v9179_v32, 0  ;;  %7441 = vmatprep.subr.bf16.mxu0 %v7926_v5 }
 0x19a   : > { %12392 = vst [vmem:[#allocation29_spill] sm:$0xff] %v12391_v49  ;;  %v6683_v9 = vcombine.low %v9250_v15, %v9331_v18  ;;  %v12394_v13 = vsel %vm8463_vm15, %v12393_v44, %v8432_v20  ;;  %v12395_v58 = vmov 0  ;;  %v3786_v14 = vsel %vm12385_vm5, %v9277_v36, %v9377_v40 }
 0x19b   : > { %vm9398_vm2 = vcmp.ne.s16.totalorder %v12394_v13, 0  ;;  %v12398_v32 = vrot.slane %v9270_v3, 5  ;;  %vm12399_vm13 = vcmask 1042432   ;;  %v6665_v56 = vcombine.low %v1909_v54, %v1910_v33  ;;  %5277 = vmatmul.mubr.bf16.gmra.mxu1 %v3786_v14 }
 0x19c   : > { %v12396_v58 = vsel %vm9398_vm2, 4294967295, %v12395_v58  ;;  %vm12400_vm4 = vcmp.ne.s16.totalorder %v12376_v63, 0  ;;  %vm12401_vm12 = vsmask.f32 3328  ;;  %v3923_v6 = vshrl.u32 %v6716_v19, 16 }
 0x19d   : > { %12397 = vst [vmem:[#allocation34_spill] sm:$0xff] %v12396_v58  ;;  %v2957_v0 = vsel %vm12399_vm13, %v12398_v32, %v12052_v62  ;;  %v2396_v55 = vsel %vm12400_vm4, %v9250_v15, 0  ;;  %v2765_v25 = vsel %vm12401_vm12, %v9297_v22, %v9386_v42  ;;  %v3926_v1 = vshll.u32 %v6716_v19, 16  ;;  %v9416_v62 = vld [vmem:[#allocation2 + $0x3c] sm:$0xf]  ;;  %vm12408_vm12 = vmmov %vm12385_vm5 }
 0x19e   : > { %v3851_v60 = vshrl.u32 %v2957_v0, 16  ;;  %v3854_v39 = vshll.u32 %v2957_v0, 16  ;;  %v3761_v36 = vshrl.u32 %v2765_v25, 16  ;;  %v3764_v23 = vshll.u32 %v2765_v25, 16  ;;  %vm12410_vm13 = vmmov %vm12385_vm5  ;;  %v9505_v63 = vld [vmem:[#allocation2 + $0x44] sm:$0xf] }
 0x19f   : > { %v3842_v3 = vshrl.u32 %v6665_v56, 16  ;;  %v3925_v54 = vrot.slane %v3923_v6, 3  ;;  %v3845_v33 = vshll.u32 %v6665_v56, 16  ;;  %v3928_v14 = vrot.slane %v3926_v1, 4 }
 0x1a0   : > { %v3853_v51 = vrot.slane %v3851_v60, 3  ;;  %v3856_v34 = vrot.slane %v3854_v39, 4  ;;  %v3763_v44 = vrot.slane %v3761_v36, 3  ;;  %v3766_v13 = vrot.slane %v3764_v23, 4  ;;  %v12402_v60 = vld [vmem:[#allocation40_spill] sm:$0xff]  ;;  %v12403_v39 = vld [vmem:[#allocation35_spill] sm:$0xff] }
 0x1a1   : > { %v3844_v32 = vrot.slane %v3842_v3, 3  ;;  %v3847_v0 = vrot.slane %v3845_v33, 4  ;;  %v2767_v30 = vshrl.u32 %v6683_v9, 16  ;;  %v2770_v5 = vshll.u32 %v6683_v9, 16 }
 0x1a2   : > { %v9418_v22 = vor.u32 %v3856_v34, %v3853_v51  ;;  %v9422_v19 = vor.u32 %v3766_v13, %v3763_v44  ;;  %v3929_v35 = vor.u32 %v3928_v14, %v3925_v54  ;;  %v2397_v56 = vsel %vm9347_vm8, %v9331_v18, 0  ;;  %v7927_v51 = vld [vmem:[#allocation8 + $0x1a8] sm:$0xff]  }
 0x1a3   : > { %v2434_v25 = vsel %vm9372_vm3, %v9416_v62, 0  ;;  %v12404_v9 = vsel %vm8442_vm11, %v8439_v24, %v12403_v39  ;;  %v12405_v6 = vmov 0  ;;  %v9443_v23 = vor.u32 %v3847_v0, %v3844_v32  ;;  %v7928_v34 = vld [vmem:[#allocation8 + $0x148] sm:$0xff]   ;;  %v12416_v32 = vld [vmem:[#allocation36_spill] sm:$0xff]  ;;  %7442 = vmatpush3.bf16.msra.mxu0 %v7927_v51 }
 0x1a4   : > { %vm9436_vm4 = vcmp.ne.s16.totalorder %v12404_v9, 0  ;;  %v3858_v36 = vsel %vm12408_vm12, %v9335_v17, %v9418_v22  ;;  %v2769_v1 = vrot.slane %v2767_v30, 4  ;;  %v2772_v3 = vrot.slane %v2770_v5, 5  ;;  %v12411_v30 = vld [vmem:[#allocation30_spill] sm:$0xff]  ;;  %v7929_v0 = vld [vmem:[#allocation8 + $0x108] sm:$0xff]   ;;  %7337 = vmatprep.subr.bf16.mxu1 %v7928_v34 }
 0x1a5   : > { %v12406_v6 = vsel %vm9436_vm4, 4294967295, %v12405_v6  ;;  %v9448_v54 = vsel %vm12385_vm5, %v9333_v28, %v9422_v19  ;;  %5446 = vmatmul.mubr.bf16.gmra.mxu0 %v3858_v36  ;;  %v3930_v33 = vsel %vm12410_vm13, %v9329_v7, %v3929_v35  ;;  %v9452_v44 = vcombine.low %v2396_v55, %v2397_v56  ;;  %7338 = vmatpush3.bf16.msra.mxu1 %v7929_v0 }
 0x1a6   : > { %12407 = vst [vmem:[#allocation35_spill] sm:$0xff] %v12406_v6  ;;  %12409 = vst [vmem:[#allocation62_spill] sm:$0xff] %v9448_v54  ;;  %v2435_v17 = vsel %vm9398_vm2, %v9420_v12, 0  ;;  %v12412_v13 = vsel %vm8463_vm15, %v8459_v38, %v12411_v30  ;;  %v12413_v14 = vmov 0  ;;  %v12417_v7 = vsel %vm8463_vm15, %v12416_v32, %v8432_v20  ;;  %5284 = vmatprep.mubr.bf16.mxu1 %v9448_v54  ;;  %5453 = vmatprep.mubr.bf16.mxu0 %v3930_v33 }
 0x1a7   : > { %vm9462_vm12 = vcmp.ne.s16.totalorder %v12412_v13, 0  ;;  %vm9471_vm13 = vcmp.ne.s16.totalorder %v12417_v7, 0  ;;  %v12418_v55 = vmov 0  ;;  %v3849_v5 = vsel %vm12385_vm5, %v9377_v40, %v9443_v23 }
 0x1a8   : > { %v12414_v14 = vsel %vm9462_vm12, 4294967295, %v12413_v14  ;;  %v12419_v55 = vsel %vm9471_vm13, 4294967295, %v12418_v55  ;;  %v9479_v56 = vor.u32 %v2772_v3, %v2769_v1  ;;  %v6717_v39 = vcombine.low %v2434_v25, %v2435_v17  ;;  %5285 = vmatmul.mubr.bf16.gmra.mxu1 %v3849_v5 }
 0x1a9   : > { %12415 = vst [vmem:[#allocation30_spill] sm:$0xff] %v12414_v14  ;;  %12420 = vst [vmem:[#allocation36_spill] sm:$0xff] %v12419_v55  ;;  %v1911_v9 = vsel %vm9305_vm0, %v9261_v59, 0  ;;  %v12061_v36 = vrot.slane %v9452_v44, 5  ;;  %v1912_v30 = vsel %vm9290_vm10, %v9250_v15, 0  ;;  %v6684_v33 = vcombine.low %v9340_v43, %v9416_v62  ;;  %v7935_v55 = vld [vmem:[#allocation8 + $0x198] sm:$0xff]  }
 0x1aa   : > { %vm12421_vm5 = vsmask.f32 3328  ;;  %v3986_v25 = vshrl.u32 %v6717_v39, 16  ;;  %v3989_v1 = vshll.u32 %v6717_v39, 16  ;;  %v6666_v59 = vcombine.low %v1911_v9, %v1912_v30  ;;  %v7936_v14 = vld [vmem:[#allocation8 + $0x140] sm:$0xff]  }
 0x1ab   : > { %v2774_v40 = vsel %vm12421_vm5, %v9386_v42, %v9479_v56  ;;  %v12422_v15 = vrot.slane %v9354_v61, 5  ;;  %vm12423_vm10 = vcmask 1042432   ;;  %v2776_v7 = vshrl.u32 %v6684_v33, 16  ;;  %7339 = vmatprep.subr.bf16.mxu1 %v7936_v14 }
 0x1ac   : > { %v3824_v3 = vshrl.u32 %v2774_v40, 16  ;;  %v3827_v17 = vshll.u32 %v2774_v40, 16  ;;  %v3988_v13 = vrot.slane %v3986_v25, 3  ;;  %v3991_v45 = vrot.slane %v3989_v1, 4  ;;  %v673_v25 = vpop.f32.mrf.mxu1 }
 0x1ad   : > { %v2959_v32 = vsel %vm12423_vm10, %v12422_v15, %v12061_v36  ;;  %v3905_v4 = vshrl.u32 %v6666_v59, 16  ;;  %v3908_v39 = vshll.u32 %v6666_v59, 16  ;;  %v2778_v40 = vrot.slane %v2776_v7, 4  ;;  %v12430_v7 = vld [vmem:[#allocation37_spill] sm:$0xff] }
 0x1ae   : > { %v3914_v5 = vshrl.u32 %v2959_v32, 16  ;;  %v3917_v51 = vshll.u32 %v2959_v32, 16  ;;  %v3826_v48 = vrot.slane %v3824_v3, 3  ;;  %v3829_v42 = vrot.slane %v3827_v17, 4 }
 0x1af   : > { %v9499_v30 = vor.u32 %v3991_v45, %v3988_v13  ;;  %v3907_v15 = vrot.slane %v3905_v4, 3  ;;  %v3910_v36 = vrot.slane %v3908_v39, 4  ;;  %v2779_v0 = vshll.u32 %v6684_v33, 16  ;;  %v12426_v13 = vld [vmem:[#allocation42_spill] sm:$0xff] }
 0x1b0   : > { %v3916_v9 = vrot.slane %v3914_v5, 3  ;;  %v3919_v34 = vrot.slane %v3917_v51, 4  ;;  %v9503_v61 = vor.u32 %v3829_v42, %v3826_v48  ;;  %vm12424_vm10 = vsmask.f32 4352 }
 0x1b1   : > { %v3993_v59 = vsel %vm12424_vm10, %v3929_v35, %v9499_v30  ;;  %vm12425_vm5 = vcmp.ne.s16.totalorder %v12402_v60, 0  ;;  %v2399_v48 = vsel %vm9436_vm4, %v9416_v62, 0  ;;  %vm12427_vm8 = vmmov %vm12424_vm10  ;;  %v9523_v33 = vor.u32 %v3910_v36, %v3907_v15 }
 0x1b2   : > { %v9507_v1 = vor.u32 %v3919_v34, %v3916_v9  ;;  %v2398_v45 = vsel %vm12425_vm5, %v9340_v43, 0  ;;  %v9521_v4 = vsel %vm12427_vm8, %v9422_v19, %v9503_v61  ;;  %v2781_v3 = vrot.slane %v2779_v0, 5  ;;  %vm12429_vm10 = vmmov %vm12427_vm8  ;;  %v7640_v34 = vpop.f32.mrf.mxu1 }
 0x1b3   : > { %12428 = vst [vmem:[#allocation63_spill] sm:$0xff] %v9521_v4  ;;  %v9525_v17 = vcombine.low %v2398_v45, %v2399_v48  ;;  %5292 = vmatprep.mubr.bf16.mxu1 %v9521_v4  ;;  %v2436_v32 = vsel %vm9462_vm12, %v9505_v63, 0  ;;  %v2437_v19 = vsel %vm9471_vm13, %v9501_v27, 0  ;;  %v9538_v36 = vadd.f32 %v8860_v8, %v673_v25  ;;  %vm12435_vm5 = vmmov %vm12429_vm10 }
 0x1b4   : > { %v3921_v35 = vsel %vm12429_vm10, %v9418_v22, %v9507_v1  ;;  %v12431_v5 = vsel %vm8442_vm11, %v8439_v24, %v12430_v7  ;;  %v12432_v51 = vmov 0  ;;  %v3912_v22 = vsel %vm12435_vm5, %v9443_v23, %v9523_v33 }
 0x1b5   : > { %vm9545_vm8 = vcmp.ne.s16.totalorder %v12431_v5, 0  ;;  %5454 = vmatmul.mubr.bf16.gmra.mxu0 %v3921_v35  ;;  %v9552_v42 = vor.u32 %v2781_v3, %v2778_v40  ;;  %v12067_v39 = vrot.slane %v9525_v17, 5  ;;  %v6718_v9 = vcombine.low %v2436_v32, %v2437_v19  ;;  %5293 = vmatmul.mubr.bf16.gmra.mxu1 %v3912_v22  ;;  %v12436_v40 = vld [vmem:[#allocation31_spill] sm:$0xff]  ;;  %v12444_v35 = vld [vmem:[#allocation38_spill] sm:$0xff]  ;;  %v7931_v22 = vld [vmem:[#allocation8 + $0x1e0] sm:$0xff]  }
 0x1b6   : > { %v12433_v51 = vsel %vm9545_vm8, 4294967295, %v12432_v51  ;;  %5461 = vmatprep.mubr.bf16.mxu0 %v3993_v59  ;;  %v728_v15 = vmax.f32 %v9538_v36, 0.0  ;;  %v685_v0 = vadd.f32 %v7640_v34, %v8860_v8  ;;  %v1913_v25 = vsel %vm9372_vm3, %v9331_v18, 0  ;;  %v7933_v34 = vld [vmem:[#allocation8 + $0x1a0] sm:$0xff]   ;;  %7443 = vmatprep.subr.bf16.mxu0 %v7931_v22  ;;  %v12454_v22 = vld [vmem:[#allocation43_spill] sm:$0xff] }
 0x1b7   : > { %12434 = vst [vmem:[#allocation37_spill] sm:$0xff] %v12433_v51  ;;  %v1914_v23 = vsel %vm9398_vm2, %v9340_v43, 0  ;;  %v12437_v45 = vsel %vm8463_vm15, %v8459_v38, %v12436_v40  ;;  %v12438_v59 = vmov 0  ;;  %vm12441_vm5 = vsmask.f32 3328  ;;  %7444 = vmatpush3.bf16.msra.mxu0 %v7933_v34 }
 0x1b8   : > { %vm9568_vm10 = vcmp.ne.s16.totalorder %v12437_v45, 0  ;;  %v2783_v8 = vsel %vm12441_vm5, %v9479_v56, %v9552_v42  ;;  %v12442_v18 = vrot.slane %v9452_v44, 5  ;;  %vm12443_vm0 = vcmask 1042432  }
 0x1b9   : > { %v12439_v59 = vsel %vm9568_vm10, 4294967295, %v12438_v59  ;;  %v4049_v43 = vshrl.u32 %v6718_v9, 16  ;;  %v4052_v3 = vshll.u32 %v6718_v9, 16  ;;  %v12445_v32 = vsel %vm8463_vm15, %v12444_v35, %v8432_v20  ;;  %v676_v9 = vpop.f32.mrf.mxu1 }
 0x1ba   : > { %12440 = vst [vmem:[#allocation31_spill] sm:$0xff] %v12439_v59  ;;  %v2961_v48 = vsel %vm12443_vm0, %v12442_v18, %v12067_v39  ;;  %vm9585_vm2 = vcmp.ne.s16.totalorder %v12445_v32, 0  ;;  %v12446_v19 = vmov 0  ;;  %v3887_v36 = vshrl.u32 %v2783_v8, 16 }
 0x1bb   : > { %v12447_v19 = vsel %vm9585_vm2, 4294967295, %v12446_v19  ;;  %v3890_v7 = vshll.u32 %v2783_v8, 16  ;;  %v3977_v56 = vshrl.u32 %v2961_v48, 16  ;;  %v3980_v5 = vshll.u32 %v2961_v48, 16 }
 0x1bc   : > { %v4051_v44 = vrot.slane %v4049_v43, 3  ;;  %v4054_v40 = vrot.slane %v4052_v3, 4  ;;  %v731_v45 = vmax.f32 %v685_v0, 0.0  ;;  %v6667_v18 = vcombine.low %v1913_v25, %v1914_v23  ;;  %v9602_v25 = vld [vmem:[%s11967_s2] ss:$0 sm:$0xff] }
 0x1bd   : > { %v3889_v39 = vrot.slane %v3887_v36, 3  ;;  %v3892_v58 = vrot.slane %v3890_v7, 4  ;;  %v3979_v49 = vrot.slane %v3977_v56, 3  ;;  %v3982_v4 = vrot.slane %v3980_v5, 4 }
 0x1be   : > { %v9589_v35 = vor.u32 %v4054_v40, %v4051_v44  ;;  %v12448_v32 = vmax.f32 %v9182_v46, 0.0  ;;  %v3968_v8 = vshrl.u32 %v6667_v18, 16  ;;  %v3971_v60 = vshll.u32 %v6667_v18, 16 }
 0x1bf   : > { %v9593_v48 = vor.u32 %v3892_v58, %v3889_v39  ;;  %v9595_v43 = vor.u32 %v3982_v4, %v3979_v49  ;;  %v6685_v0 = vcombine.low %v9420_v12, %v9505_v63  ;;  %v677_v23 = vadd.f32 %v9602_v25, %v676_v9  ;;  %v9611_v4 = vld [vmem:[#allocation2 + $0x50] sm:$0xf] }
 0x1c0   : > { %v6970_v6 = vpack.c.bf16 %v731_v45, %v12448_v32  ;;  %vm12449_vm0 = vsmask.f32 4352  ;;  %v3970_v3 = vrot.slane %v3968_v8, 3  ;;  %v3973_v58 = vrot.slane %v3971_v60, 4 }
 0x1c1   : > { %v4056_v46 = vsel %vm12449_vm0, %v9499_v30, %v9589_v35  ;;  %vm12450_vm5 = vcmp.ne.s16.totalorder %v12426_v13, 0  ;;  %vm12451_vm3 = vmmov %vm12449_vm0  ;;  %v2785_v7 = vshrl.u32 %v6685_v0, 16  ;;  %v2788_v30 = vshll.u32 %v6685_v0, 16 }
 0x1c2   : > { %7059 = vst [vmem:[#allocation2 + $0x78] sm:$0xff] %v6970_v6   ;;  %v2400_v49 = vsel %vm12450_vm5, %v9420_v12, 0  ;;  %v9616_v39 = vsel %vm12451_vm3, %v9503_v61, %v9593_v48  ;;  %vm12453_vm4 = vmmov %vm12449_vm0  ;;  %v9621_v6 = vld [vmem:[#allocation2 + $0x4c] sm:$0xf]  ;;  %v9624_v60 = vor.u32 %v3973_v58, %v3970_v3  ;;  %v729_v56 = vmax.f32 %v677_v23, 0.0 }
 0x1c3   : > { %12452 = vst [vmem:[#allocation38_spill] sm:$0xff] %v9616_v39  ;;  %v3984_v36 = vsel %vm12453_vm4, %v9507_v1, %v9595_v43  ;;  %5300 = vmatprep.mubr.bf16.mxu1 %v9616_v39  ;;  %v2401_v5 = vsel %vm9545_vm8, %v9505_v63, 0  ;;  %v2438_v61 = vsel %vm9568_vm10, %v9621_v6, 0  ;;  %v12455_v1 = vld [vmem:[#allocation39_spill] sm:$0xff]  ;;  %v12457_v44 = vmov 0 }
 0x1c4   : > { %5462 = vmatmul.mubr.bf16.gmra.mxu0 %v3984_v36  ;;  %v12456_v34 = vsel %vm8442_vm11, %v8439_v24, %v12455_v1  ;;  %v2787_v40 = vrot.slane %v2785_v7, 4  ;;  %v2790_v45 = vrot.slane %v2788_v30, 5  ;;  %v9642_v18 = vcombine.low %v2400_v49, %v2401_v5  ;;  %v12464_v49 = vld [vmem:[#allocation41_spill] sm:$0xff] }
 0x1c5   : > { %vm9638_vm4 = vcmp.ne.s16.totalorder %v12456_v34, 0  ;;  %5469 = vmatprep.mubr.bf16.mxu0 %v4056_v46  ;;  %v2439_v9 = vsel %vm9585_vm2, %v9611_v4, 0  ;;  %v3975_v32 = vsel %vm12449_vm0, %v9523_v33, %v9624_v60  ;;  %v6965_v8 = vpack.c.bf16 %v729_v56, %v728_v15  ;;  %v12460_v46 = vld [vmem:[#allocation32_spill] sm:$0xff]  ;;  %v7643_v56 = vpop.f32.mrf.mxu1 }
 0x1c6   : > { %v12458_v44 = vsel %vm9638_vm4, 4294967295, %v12457_v44  ;;  %v6719_v0 = vcombine.low %v2438_v61, %v2439_v9  ;;  %v1915_v23 = vsel %vm9462_vm12, %v9416_v62, 0  ;;  %v12461_v3 = vsel %vm8463_vm15, %v8459_v38, %v12460_v46  ;;  %5301 = vmatmul.mubr.bf16.gmra.mxu1 %v3975_v32 }
 0x1c7   : > { %12459 = vst [vmem:[#allocation39_spill] sm:$0xff] %v12458_v44  ;;  %vm9658_vm5 = vcmp.ne.s16.totalorder %v12461_v3, 0  ;;  %v12462_v58 = vmov 0  ;;  %v12465_v33 = vsel %vm8463_vm15, %v12464_v49, %v8432_v20  ;;  %v9671_v62 = vor.u32 %v2790_v45, %v2787_v40  ;;  %7058 = vst [vmem:[#allocation2 + $0x70] sm:$0xff] %v6965_v8  }
 0x1c8   : > { %v12463_v58 = vsel %vm9658_vm5, 4294967295, %v12462_v58  ;;  %vm9667_vm0 = vcmp.ne.s16.totalorder %v12465_v33, 0  ;;  %v12086_v36 = vrot.slane %v9642_v18, 5  ;;  %v1916_v7 = vsel %vm9471_vm13, %v9420_v12, 0 }
 0x1c9   : > { %v6686_v30 = vcombine.low %v9501_v27, %v9621_v6  ;;  %v4112_v5 = vshrl.u32 %v6719_v0, 16  ;;  %v4115_v61 = vshll.u32 %v6719_v0, 16  ;;  %v6668_v1 = vcombine.low %v1915_v23, %v1916_v7  ;;  %v7934_v23 = vld [vmem:[#allocation8 + $0x1d8] sm:$0xff]  }
 0x1ca   : > { %v9680_v34 = vadd.f32 %v9602_v25, %v7643_v56  ;;  %vm12468_vm3 = vsmask.f32 3328  ;;  %v12469_v45 = vrot.slane %v9525_v17, 5  ;;  %vm12470_vm13 = vcmask 1042432   ;;  %7445 = vmatprep.subr.bf16.mxu0 %v7934_v23  ;;  %v7937_v17 = vld [vmem:[#allocation8 + $0x100] sm:$0xff]  }
 0x1cb   : > { %v2792_v40 = vsel %vm12468_vm3, %v9552_v42, %v9671_v62  ;;  %v2794_v9 = vshrl.u32 %v6686_v30, 16  ;;  %v2797_v32 = vshll.u32 %v6686_v30, 16  ;;  %v4114_v49 = vrot.slane %v4112_v5, 3  ;;  %7446 = vmatpush3.bf16.msra.mxu0 %v7935_v55  ;;  %7340 = vmatpush3.bf16.msra.mxu1 %v7937_v17 }
 0x1cc   : > { %v2963_v12 = vsel %vm12470_vm13, %v12469_v45, %v12086_v36  ;;  %v3950_v46 = vshrl.u32 %v2792_v40, 16  ;;  %v3953_v8 = vshll.u32 %v2792_v40, 16  ;;  %v4117_v33 = vrot.slane %v4115_v61, 4  ;;  %v7938_v45 = vld [vmem:[#allocation8 + $0x1d0] sm:$0xff]  }
 0x1cd   : > { %v4040_v3 = vshrl.u32 %v2963_v12, 16  ;;  %v4043_v0 = vshll.u32 %v2963_v12, 16  ;;  %v4031_v7 = vshrl.u32 %v6668_v1, 16  ;;  %v4034_v56 = vshll.u32 %v6668_v1, 16  ;;  %v689_v12 = vpop.f32.mrf.mxu1  ;;  %7447 = vmatprep.subr.bf16.mxu0 %v7938_v45  ;;  %v7940_v45 = vld [vmem:[#allocation8 + $0x1c8] sm:$0xff]  }
 0x1ce   : > { %v3952_v42 = vrot.slane %v3950_v46, 3  ;;  %v3955_v39 = vrot.slane %v3953_v8, 4  ;;  %v9690_v36 = vor.u32 %v4117_v33, %v4114_v49  ;;  %v2796_v54 = vrot.slane %v2794_v9, 4  ;;  %v9698_v8 = vld [vmem:[#allocation2 + $0x54] sm:$0xf] }
 0x1cf   : > { %v4042_v51 = vrot.slane %v4040_v3, 3  ;;  %v4045_v13 = vrot.slane %v4043_v0, 4  ;;  %v4033_v30 = vrot.slane %v4031_v7, 3  ;;  %v4036_v40 = vrot.slane %v4034_v56, 4  ;;  %v9700_v3 = vld [vmem:[#allocation2 + $0x58] sm:$0xf]  ;;  %v7644_v7 = vpop.f32.mrf.mxu1 }
 0x1d0   : > { %v9693_v5 = vor.u32 %v3955_v39, %v3952_v42  ;;  %v2799_v1 = vrot.slane %v2797_v32, 5  ;;  %v734_v46 = vmax.f32 %v9680_v34, 0.0  ;;  %vm12472_vm3 = vsmask.f32 4352  ;;  %v12476_v32 = vld [vmem:[#allocation44_spill] sm:$0xff] }
 0x1d1   : > { %v9695_v61 = vor.u32 %v4045_v13, %v4042_v51  ;;  %v4119_v9 = vsel %vm12472_vm3, %v9589_v35, %v9690_v36  ;;  %v9705_v0 = vor.u32 %v4036_v40, %v4033_v30  ;;  %vm12473_vm13 = vcmp.ne.s16.totalorder %v12454_v22, 0  ;;  %v7939_v13 = vld [vmem:[#allocation8 + $0x190] sm:$0xff]   ;;  %vm12474_vm12 = vmmov %vm12472_vm3 }
 0x1d2   : > { %v2402_v14 = vsel %vm12473_vm13, %v9501_v27, 0  ;;  %v2403_v55 = vsel %vm9638_vm4, %v9621_v6, 0  ;;  %v9716_v51 = vsel %vm12474_vm12, %v9593_v48, %v9693_v5  ;;  %vm12475_vm8 = vmmov %vm12472_vm3  ;;  %v9721_v39 = vor.u32 %v2799_v1, %v2796_v54  ;;  %7448 = vmatpush3.bf16.msra.mxu0 %v7939_v13  ;;  %v7942_v13 = vld [vmem:[#allocation8 + $0x1c0] sm:$0xff]  }
 0x1d3   : > { %v4047_v35 = vsel %vm12475_vm8, %v9595_v43, %v9695_v61  ;;  %v9723_v34 = vcombine.low %v2402_v14, %v2403_v55  ;;  %v12477_v23 = vsel %vm8442_vm11, %v8439_v24, %v12476_v32  ;;  %v12478_v49 = vmov 0  ;;  %5308 = vmatprep.mubr.bf16.mxu1 %v9716_v51  ;;  %vm12481_vm12 = vmmov %vm12472_vm3  ;;  %7449 = vmatprep.subr.bf16.mxu0 %v7940_v45  ;;  %v7943_v45 = vld [vmem:[#allocation8 + $0x180] sm:$0xff]  }
 0x1d4   : > { %vm9730_vm13 = vcmp.ne.s16.totalorder %v12477_v23, 0  ;;  %5470 = vmatmul.mubr.bf16.gmra.mxu0 %v4047_v35  ;;  %v4038_v48 = vsel %vm12481_vm12, %v9624_v60, %v9705_v0  ;;  %v2440_v54 = vsel %vm9658_vm5, %v9698_v8, 0  ;;  %v2441_v43 = vsel %vm9667_vm0, %v9700_v3, 0 }
 0x1d5   : > { %v12479_v49 = vsel %vm9730_vm13, 4294967295, %v12478_v49  ;;  %v9745_v33 = vadd.f32 %v9602_v25, %v689_v12  ;;  %5477 = vmatprep.mubr.bf16.mxu0 %v4119_v9  ;;  %5309 = vmatmul.mubr.bf16.gmra.mxu1 %v4038_v48  ;;  %vm12482_vm8 = vsmask.f32 3328  ;;  %v12094_v60 = vrot.slane %v9723_v34, 5  ;;  %v7941_v9 = vld [vmem:[#allocation8 + $0x188] sm:$0xff]  }
 0x1d6   : > { %12480 = vst [vmem:[#allocation32_spill] sm:$0xff] %v12479_v49  ;;  %v2801_v56 = vsel %vm12482_vm8, %v9671_v62, %v9721_v39  ;;  %v6720_v42 = vcombine.low %v2440_v54, %v2441_v43  ;;  %v701_v17 = vadd.f32 %v9602_v25, %v7644_v7  ;;  %v1917_v12 = vsel %vm9568_vm10, %v9505_v63, 0  ;;  %v692_v7 = vpop.f32.mrf.mxu1  ;;  %7450 = vmatpush3.bf16.msra.mxu0 %v7941_v9 }
 0x1d7   : > { %v4013_v30 = vshrl.u32 %v2801_v56, 16  ;;  %v4016_v40 = vshll.u32 %v2801_v56, 16  ;;  %v732_v1 = vmax.f32 %v9745_v33, 0.0  ;;  %v12483_v62 = vrot.slane %v9642_v18, 5  ;;  %7451 = vmatprep.subr.bf16.mxu0 %v7942_v13 }
 0x1d8   : > { %vm12484_vm3 = vcmask 1042432   ;;  %v4175_v55 = vshrl.u32 %v6720_v42, 16  ;;  %v4178_v35 = vshll.u32 %v6720_v42, 16  ;;  %v735_v32 = vmax.f32 %v701_v17, 0.0 }
 0x1d9   : > { %v2965_v14 = vsel %vm12484_vm3, %v12483_v62, %v12094_v60  ;;  %v12485_v23 = vsel %vm8463_vm15, %v8459_v38, %v8823_v10  ;;  %v12486_v48 = vmov 0  ;;  %v12488_v63 = vsel %vm8463_vm15, %v8908_v29, %v8432_v20 }
 0x1da   : > { %vm9766_vm12 = vcmp.ne.s16.totalorder %v12485_v23, 0  ;;  %vm9775_vm8 = vcmp.ne.s16.totalorder %v12488_v63, 0  ;;  %v12489_v18 = vmov 0  ;;  %v4015_v54 = vrot.slane %v4013_v30, 3  ;;  %7452 = vmatpush3.bf16.msra.mxu0 %v7943_v45 }
 0x1db   : > { %v12487_v48 = vsel %vm9766_vm12, 4294967295, %v12486_v48  ;;  %v12490_v18 = vsel %vm9775_vm8, 4294967295, %v12489_v18  ;;  %v4018_v43 = vrot.slane %v4016_v40, 4  ;;  %v4103_v10 = vshrl.u32 %v2965_v14, 16 }
 0x1dc   : > { %12491 = vst [vmem:[#allocation41_spill] sm:$0xff] %v12490_v18  ;;  %v4106_v33 = vshll.u32 %v2965_v14, 16  ;;  %v4177_v56 = vrot.slane %v4175_v55, 3  ;;  %v4180_v42 = vrot.slane %v4178_v35, 4  ;;  %v6980_v17 = vpack.c.bf16 %v735_v32, %v734_v46 }
 0x1dd   : > { %v1918_v29 = vsel %vm9585_vm2, %v9501_v27, 0  ;;  %v9783_v62 = vor.u32 %v4018_v43, %v4015_v54  ;;  %v4105_v23 = vrot.slane %v4103_v10, 3  ;;  %v6687_v30 = vcombine.low %v9611_v4, %v9698_v8  ;;  %v9804_v54 = vld [vmem:[#allocation2 + $0x60] sm:$0xf] }
 0x1de   : > { %v4108_v63 = vrot.slane %v4106_v33, 4  ;;  %v6669_v60 = vcombine.low %v1917_v12, %v1918_v29  ;;  %v9785_v59 = vor.u32 %v4180_v42, %v4177_v56  ;;  %7061 = vst [vmem:[#allocation2 + $0x88] sm:$0xff] %v6980_v17   ;;  %v693_v40 = vadd.f32 %v9602_v25, %v692_v7  ;;  %v7944_v33 = vld [vmem:[#allocation8 + $0x238] sm:$0xff]  }
 0x1df   : > { %vm12492_vm3 = vcmp.ne.s16.totalorder %v12471_v16, 0  ;;  %vm12493_vm2 = vsmask.f32 4352  ;;  %v2803_v55 = vshrl.u32 %v6687_v30, 16  ;;  %v2806_v35 = vshll.u32 %v6687_v30, 16  ;;  %7645 = vmatprep.subr.bf16.mxu1 %v7944_v33 }
 0x1e0   : > { %v2404_v46 = vsel %vm12492_vm3, %v9611_v4, 0  ;;  %v9796_v27 = vsel %vm12493_vm2, %v9693_v5, %v9783_v62  ;;  %v9798_v12 = vor.u32 %v4108_v63, %v4105_v23  ;;  %v4094_v9 = vshrl.u32 %v6669_v60, 16  ;;  %vm12494_vm10 = vmmov %vm12493_vm2  ;;  %v9823_v17 = vld [vmem:[#allocation2 + $0x5c] sm:$0xf] }
 0x1e1   : > { %v4097_v14 = vshll.u32 %v6669_v60, 16  ;;  %5316 = vmatprep.mubr.bf16.mxu1 %v9796_v27  ;;  %v4182_v25 = vsel %vm12494_vm10, %v9690_v36, %v9785_v59  ;;  %v733_v32 = vmax.f32 %v693_v40, 0.0  ;;  %v12495_v5 = vsel %vm8442_vm11, %v8439_v24, %v8964_v57  ;;  %vm12499_vm3 = vmmov %vm12494_vm10 }
 0x1e2   : > { %vm9811_vm2 = vcmp.ne.s16.totalorder %v12495_v5, 0  ;;  %v12496_v13 = vmov 0  ;;  %v4110_v60 = vsel %vm12499_vm3, %v9695_v61, %v9798_v12  ;;  %v4096_v43 = vrot.slane %v4094_v9, 3 }
 0x1e3   : > { %v12497_v13 = vsel %vm9811_vm2, 4294967295, %v12496_v13  ;;  %v4099_v36 = vrot.slane %v4097_v14, 4  ;;  %v2405_v10 = vsel %vm9730_vm13, %v9698_v8, 0  ;;  %5478 = vmatmul.mubr.bf16.gmra.mxu0 %v4110_v60  ;;  %v2805_v7 = vrot.slane %v2803_v55, 4 }
 0x1e4   : > { %12498 = vst [vmem:[#allocation44_spill] sm:$0xff] %v12497_v13  ;;  %v2808_v56 = vrot.slane %v2806_v35, 5  ;;  %v6975_v57 = vpack.c.bf16 %v733_v32, %v732_v1  ;;  %v9821_v42 = vcombine.low %v2404_v46, %v2405_v10  ;;  %v12500_v61 = vsel %vm8463_vm15, %v8459_v38, %v8956_v50  ;;  %5485 = vmatprep.mubr.bf16.mxu0 %v4182_v25 }
 0x1e5   : > { %vm9830_vm10 = vcmp.ne.s16.totalorder %v12500_v61, 0  ;;  %v12501_v29 = vmov 0  ;;  %v4100_v23 = vor.u32 %v4099_v36, %v4096_v43  ;;  %v2442_v63 = vsel %vm9766_vm12, %v9823_v17, 0 }
 0x1e6   : > { %v12502_v29 = vsel %vm9830_vm10, 4294967295, %v12501_v29  ;;  %v2443_v1 = vsel %vm9775_vm8, %v9804_v54, 0  ;;  %v1919_v45 = vsel %vm9658_vm5, %v9621_v6, 0  ;;  %v12504_v50 = vsel %vm8463_vm15, %v9001_v21, %v8432_v20  ;;  %7060 = vst [vmem:[#allocation2 + $0x80] sm:$0xff] %v6975_v57  }
 0x1e7   : > { %12503 = vst [vmem:[#allocation64_spill] sm:$0xff] %v12502_v29  ;;  %vm9848_vm3 = vcmp.ne.s16.totalorder %v12504_v50, 0  ;;  %v12505_v30 = vmov 0  ;;  %v2809_v40 = vor.u32 %v2808_v56, %v2805_v7  ;;  %v2966_v46 = vrot.slane %v9821_v42, 5 }
 0x1e8   : > { %v12506_v30 = vsel %vm9848_vm3, 4294967295, %v12505_v30  ;;  %v6721_v9 = vcombine.low %v2442_v63, %v2443_v1  ;;  %v1920_v14 = vsel %vm9667_vm0, %v9611_v4, 0  ;;  %vm12508_vm5 = vsmask.f32 4352 }
 0x1e9   : > { %12507 = vst [vmem:[#allocation65_spill] sm:$0xff] %v12506_v30  ;;  %v4101_v6 = vsel %vm12508_vm5, %v9705_v0, %v4100_v23  ;;  %v6670_v25 = vcombine.low %v1919_v45, %v1920_v14  ;;  %v6688_v21 = vcombine.low %v9700_v3, %v9823_v17  ;;  %vm12509_vm13 = vcmp.ne.s16.totalorder %v8999_v37, 0  ;;  %v9870_v14 = vld [vmem:[#allocation2 + $0x64] sm:$0xf] }
 0x1ea   : > { %v2406_v55 = vsel %vm12509_vm13, %v9700_v3, 0  ;;  %5317 = vmatmul.mubr.bf16.gmra.mxu1 %v4101_v6  ;;  %vm12510_vm4 = vsmask.f32 3328  ;;  %v12511_v32 = vrot.slane %v9723_v34, 5  ;;  %vm12512_vm14 = vcmask 1042432  }
 0x1eb   : > { %v2810_v35 = vsel %vm12510_vm4, %v9721_v39, %v2809_v40  ;;  %v4238_v4 = vshrl.u32 %v6721_v9, 16  ;;  %v4241_v60 = vshll.u32 %v6721_v9, 16  ;;  %v4157_v56 = vshrl.u32 %v6670_v25, 16  ;;  %vm12514_vm4 = vmmov %vm12508_vm5 }
 0x1ec   : > { %v2967_v5 = vsel %vm12512_vm14, %v12511_v32, %v2966_v46  ;;  %v4076_v43 = vshrl.u32 %v2810_v35, 16  ;;  %v4079_v0 = vshll.u32 %v2810_v35, 16  ;;  %v4160_v57 = vshll.u32 %v6670_v25, 16  ;;  %vm12513_vm14 = vmmov %vm12508_vm5 }
 0x1ed   : > { %v4166_v36 = vshrl.u32 %v2967_v5, 16  ;;  %v4169_v10 = vshll.u32 %v2967_v5, 16  ;;  %v4240_v33 = vrot.slane %v4238_v4, 3  ;;  %v4243_v7 = vrot.slane %v4241_v60, 4  ;;  %v9875_v5 = vld [vmem:[#allocation2 + $0x68] sm:$0xf]  ;;  %vm12515_vm5 = vmmov %vm12514_vm4 }
 0x1ee   : > { %v4078_v42 = vrot.slane %v4076_v43, 3  ;;  %v4081_v61 = vrot.slane %v4079_v0, 4  ;;  %v4159_v39 = vrot.slane %v4157_v56, 3  ;;  %v4162_v34 = vrot.slane %v4160_v57, 4  ;;  %vm12516_vm13 = vmmov %vm12514_vm4 }
 0x1ef   : > { %v4168_v63 = vrot.slane %v4166_v36, 3  ;;  %v4171_v1 = vrot.slane %v4169_v10, 4  ;;  %v9868_v45 = vor.u32 %v4243_v7, %v4240_v33  ;;  %v2812_v50 = vshrl.u32 %v6688_v21, 16 }
 0x1f0   : > { %v4082_v9 = vor.u32 %v4081_v61, %v4078_v42  ;;  %v2815_v35 = vshll.u32 %v6688_v21, 16  ;;  %v2407_v32 = vsel %vm9811_vm2, %v9823_v17, 0  ;;  %v4163_v4 = vor.u32 %v4162_v34, %v4159_v39  ;;  %v12518_v61 = vld [vmem:[#allocation49_spill] sm:$0xff] }
 0x1f1   : > { %v4172_v6 = vor.u32 %v4171_v1, %v4168_v63  ;;  %v4245_v25 = vsel %vm12513_vm14, %v9785_v59, %v9868_v45  ;;  %v2814_v60 = vrot.slane %v2812_v50, 4  ;;  %v9880_v43 = vcombine.low %v2406_v55, %v2407_v32 }
 0x1f2   : > { %v9884_v0 = vsel %vm12514_vm4, %v9783_v62, %v4082_v9  ;;  %v2817_v36 = vrot.slane %v2815_v35, 5  ;;  %v2444_v10 = vsel %vm9830_vm10, %v9870_v14, 0  ;;  %v4164_v59 = vsel %vm12516_vm13, %v4100_v23, %v4163_v4 }
 0x1f3   : > { %v4173_v21 = vsel %vm12515_vm5, %v9798_v12, %v4172_v6  ;;  %5324 = vmatprep.mubr.bf16.mxu1 %v9884_v0  ;;  %v12104_v55 = vrot.slane %v9880_v43, 5  ;;  %v2445_v62 = vsel %vm9848_vm3, %v9875_v5, 0  ;;  %v1921_v12 = vsel %vm9766_vm12, %v9698_v8, 0 }
 0x1f4   : > { %5486 = vmatmul.mubr.bf16.gmra.mxu0 %v4173_v21  ;;  %5325 = vmatmul.mubr.bf16.gmra.mxu1 %v4164_v59  ;;  %v2818_v33 = vor.u32 %v2817_v36, %v2814_v60  ;;  %v6722_v7 = vcombine.low %v2444_v10, %v2445_v62  ;;  %v1922_v56 = vsel %vm9775_vm8, %v9700_v3, 0  ;;  %v6689_v23 = vcombine.low %v9804_v54, %v9870_v14 }
 0x1f5   : > { %5493 = vmatprep.mubr.bf16.mxu0 %v4245_v25  ;;  %vm12517_vm14 = vcmask 1042432   ;;  %v6671_v42 = vcombine.low %v1921_v12, %v1922_v56  ;;  %v12519_v63 = vshrl.u32 %v12518_v61, 16  ;;  %v2276_v8 = vshll.u32 %v12518_v61, 16 }
 0x1f6   : > { %v2969_v57 = vsel %vm12517_vm14, %v2966_v46, %v12104_v55  ;;  %vm12520_vm4 = vsmask.f32 3328  ;;  %v4301_v35 = vshrl.u32 %v6722_v7, 16  ;;  %v4304_v25 = vshll.u32 %v6722_v7, 16  ;;  %vm12521_vm14 = vmmov %vm12516_vm13 }
 0x1f7   : > { %v9910_v1 = vrot.slane %v12519_v63, 7  ;;  %v2819_v39 = vsel %vm12520_vm4, %v2809_v40, %v2818_v33  ;;  %v4229_v34 = vshrl.u32 %v2969_v57, 16  ;;  %v4232_v50 = vshll.u32 %v2969_v57, 16  ;;  %vm12522_vm4 = vmmov %vm12516_vm13 }
 0x1f8   : > { %v4139_v3 = vshrl.u32 %v2819_v39, 16  ;;  %v4142_v32 = vshll.u32 %v2819_v39, 16  ;;  %v4220_v60 = vshrl.u32 %v6671_v42, 16  ;;  %v4303_v10 = vrot.slane %v4301_v35, 3 }
 0x1f9   : > { %v4231_v21 = vrot.slane %v4229_v34, 3  ;;  %v4234_v36 = vrot.slane %v4232_v50, 4  ;;  %v4223_v46 = vshll.u32 %v6671_v42, 16  ;;  %v4306_v12 = vrot.slane %v4304_v25, 4 }
 0x1fa   : > { %v4141_v59 = vrot.slane %v4139_v3, 3  ;;  %v4144_v62 = vrot.slane %v4142_v32, 4  ;;  %v4222_v56 = vrot.slane %v4220_v60, 3  ;;  %v2821_v55 = vshrl.u32 %v6689_v23, 16  ;;  %v12527_v32 = vld [vmem:[#allocation50_spill] sm:$0xff] }
 0x1fb   : > { %v9914_v63 = vor.u32 %v4234_v36, %v4231_v21  ;;  %v4225_v61 = vrot.slane %v4223_v46, 4  ;;  %v2824_v40 = vshll.u32 %v6689_v23, 16  ;;  %v9916_v57 = vor.u32 %v4306_v12, %v4303_v10 }
 0x1fc   : > { %v4145_v18 = vor.u32 %v4144_v62, %v4141_v59  ;;  %v2278_v39 = vor.u32 %v2276_v8, %v9910_v1  ;;  %vm12106_vm5 = vcmp.ne.s16.totalorder %v9189_v47, 0  ;;  %v2823_v34 = vrot.slane %v2821_v55, 4 }
 0x1fd   : > { %v4236_v7 = vsel %vm12516_vm13, %v4172_v6, %v9914_v63  ;;  %v4226_v42 = vor.u32 %v4225_v61, %v4222_v56  ;;  %v2826_v50 = vrot.slane %v2824_v40, 5  ;;  %v4308_v23 = vsel %vm12522_vm4, %v9868_v45, %v9916_v57  ;;  %vm12523_vm13 = vmmov %vm12522_vm4  ;;  %v9942_v45 = vld [vmem:[#allocation2 + $0x6c] sm:$0xf] }
 0x1fe   : > { %v9923_v35 = vsel %vm12521_vm14, %v4082_v9, %v4145_v18  ;;  %5494 = vmatmul.mubr.bf16.gmra.mxu0 %v4236_v7  ;;  %v2279_v8 = vsel %vm8442_vm11, %v8439_v24, %v2278_v39  ;;  %v2408_v3 = vsel %vm12106_vm5, %v9804_v54, 0  ;;  %v12524_v55 = vmov 0 }
 0x1ff   : > { %5332 = vmatprep.mubr.bf16.mxu1 %v9923_v35  ;;  %5501 = vmatprep.mubr.bf16.mxu0 %v4308_v23  ;;  %v4227_v6 = vsel %vm12523_vm13, %v4163_v4, %v4226_v42  ;;  %v9936_v9 = vor.u32 %v2826_v50, %v2823_v34  ;;  %vm9938_vm14 = vcmp.ne.s16.totalorder %v2279_v8, 0  ;;  %v1789_v25 = vshll.u32 %v12527_v32, 16 }
 0x200   : > { %v12525_v55 = vsel %vm9938_vm14, 4294967295, %v12524_v55  ;;  %5333 = vmatmul.mubr.bf16.gmra.mxu1 %v4227_v6  ;;  %v2409_v60 = vsel %vm9938_vm14, %v9870_v14, 0  ;;  %v1793_v21 = vshrl.u32 %v12527_v32, 16  ;;  %v1923_v4 = vsel %vm9830_vm10, %v9823_v17, 0 }
 0x201   : > { %12526 = vst [vmem:[#allocation49_spill] sm:$0xff] %v12525_v55  ;;  %v1924_v36 = vsel %vm9848_vm3, %v9804_v54, 0  ;;  %vm12528_vm4 = vsmask.f32 3328  ;;  %v9957_v46 = vcombine.low %v2408_v3, %v2409_v60  ;;  %v1791_v59 = vrot.slane %v1789_v25, 5 }
 0x202   : > { %v2828_v10 = vsel %vm12528_vm4, %v2818_v33, %v9936_v9  ;;  %v6672_v62 = vcombine.low %v1923_v4, %v1924_v36  ;;  %v1795_v61 = vrot.slane %v1793_v21, 4  ;;  %v6690_v40 = vcombine.low %v9875_v5, %v9942_v45 }
 0x203   : > { %v4202_v12 = vshrl.u32 %v2828_v10, 16  ;;  %v4205_v56 = vshll.u32 %v2828_v10, 16  ;;  %v12110_v39 = vrot.slane %v9957_v46, 5  ;;  %v1792_v17 = vsel %vm8463_vm15, %v8459_v38, %v1791_v59  ;;  %v9979_v10 = vld [vmem:[#allocation2 + $0x70] sm:$0xf] }
 0x204   : > { %v4283_v54 = vshrl.u32 %v6672_v62, 16  ;;  %v4286_v7 = vshll.u32 %v6672_v62, 16  ;;  %v1796_v50 = vor.u32 %v1795_v61, %v1791_v59  ;;  %vm9965_vm13 = vcmp.ne.s16.totalorder %v1792_v17, 0 }
 0x205   : > { %v4204_v34 = vrot.slane %v4202_v12, 3  ;;  %v4207_v33 = vrot.slane %v4205_v56, 4  ;;  %v12529_v23 = vmov 0  ;;  %v12532_v8 = vrot.slane %v9880_v43, 5  ;;  %v12534_v43 = vld [vmem:[#allocation16_spill] sm:$0xff] }
 0x206   : > { %v12530_v23 = vsel %vm9965_vm13, 4294967295, %v12529_v23  ;;  %vm12533_vm4 = vcmask 1042432   ;;  %v2446_v6 = vsel %vm9965_vm13, %v9942_v45, 0  ;;  %v4285_v32 = vrot.slane %v4283_v54, 3 }
 0x207   : > { %12531 = vst [vmem:[#allocation50_spill] sm:$0xff] %v12530_v23  ;;  %v2971_v3 = vsel %vm12533_vm4, %v12532_v8, %v12110_v39  ;;  %v4288_v25 = vrot.slane %v4286_v7, 4  ;;  %v9977_v60 = vor.u32 %v4207_v33, %v4204_v34  ;;  %v1797_v36 = vrot.slane %v1796_v50, 4 }
 0x208   : > { %v4292_v21 = vshrl.u32 %v2971_v3, 16  ;;  %v4295_v4 = vshll.u32 %v2971_v3, 16  ;;  %v2830_v62 = vshrl.u32 %v6690_v40, 16  ;;  %v2833_v12 = vshll.u32 %v6690_v40, 16 }
 0x209   : > { %v9981_v59 = vor.u32 %v4288_v25, %v4285_v32  ;;  %v930_v56 = vadd.s32 200, %v12534_v43  ;;  %vm12535_vm4 = vsmask.f32 4352  ;;  %v1802_v7 = vsel %vm8463_vm15, %v1797_v36, %v8432_v20 }
 0x20a   : > { %v9986_v61 = vsel %vm12535_vm4, %v4145_v18, %v9977_v60  ;;  %v4294_v17 = vrot.slane %v4292_v21, 3  ;;  %v4297_v54 = vrot.slane %v4295_v4, 4  ;;  %vm9992_vm5 = vcmp.ne.s16.totalorder %v1802_v7, 0  ;;  %vm12540_vm3 = vmmov %vm12535_vm4 }
 0x20b   : > { %12536 = vst [vmem:[#allocation16_spill] sm:$0xff] %v9986_v61  ;;  %5340 = vmatprep.mubr.bf16.mxu1 %v9986_v61  ;;  %v12537_v34 = vmov 0  ;;  %v4290_v40 = vsel %vm12540_vm3, %v4226_v42, %v9981_v59  ;;  %v2832_v33 = vrot.slane %v2830_v62, 4  ;;  %v2835_v50 = vrot.slane %v2833_v12, 5 }
 0x20c   : > { %v12538_v34 = vsel %vm9992_vm5, 4294967295, %v12537_v34  ;;  %v9998_v8 = vor.u32 %v4297_v54, %v4294_v17  ;;  %v2447_v18 = vsel %vm9992_vm5, %v9979_v10, 0  ;;  %5341 = vmatmul.mubr.bf16.gmra.mxu1 %v4290_v40  ;;  %v1116_v3 = vand.u32 15, %v930_v56  ;;  %v10029_v40 = vld [vmem:[#allocation2 + $0x74] sm:$0xf] }
 0x20d   : > { %12539 = vst [vmem:[#allocation66_spill] sm:$0xff] %v12538_v34  ;;  %v2280_v32 = vrot.slane %v9910_v1, 4  ;;  %v6723_v25 = vcombine.low %v2446_v6, %v2447_v18  ;;  %v10004_v21 = vor.u32 %v2835_v50, %v2832_v33  ;;  %v931_v4 = vadd.s32 208, %v12534_v43 }
 0x20e   : > { %v1925_v42 = vsel %vm9965_vm13, %v9870_v14, 0  ;;  %v4299_v36 = vsel %vm12540_vm3, %v9914_v63, %v9998_v8  ;;  %vm1378_vm4 = vcmp.lt.s32.totalorder %v1116_v3, 15  ;;  %v1926_v1 = vsel %vm9992_vm5, %v9875_v5, 0 }
 0x20f   : > { %v10016_v62 = vsel %vm8442_vm11, %v2280_v32, %v8451_v31  ;;  %5502 = vmatmul.mubr.bf16.gmra.mxu0 %v4299_v36  ;;  %v4364_v6 = vshrl.u32 %v6723_v25, 16  ;;  %v4367_v12 = vshll.u32 %v6723_v25, 16  ;;  %vm12542_vm13 = vsmask.f32 3328  ;;  %vm2024_vm10 = vmpackc.low %vm1378_vm4, %vm1378_vm4 }
 0x210   : > { %12541 = vst [vmem:[#allocation67_spill] sm:$0xff] %v10016_v62  ;;  %v2837_v14 = vsel %vm12542_vm13, %v9936_v9, %v10004_v21  ;;  %vm12115_vm3 = vcmp.ne.s16.totalorder %v10016_v62, 0  ;;  %v12543_v17 = vmov 0   ;;  %v1123_v9 = vand.u32 15, %v931_v4 }
 0x211   : > { %v4265_v63 = vshrl.u32 %v2837_v14, 16  ;;  %v4268_v56 = vshll.u32 %v2837_v14, 16  ;;  %v2056_v54 = vsel %vm2024_vm10, 65537, %v12543_v17  ;;  %v2410_v7 = vsel %vm12115_vm3, %v9875_v5, 0 }
 0x212   : > { %v4366_v33 = vrot.slane %v4364_v6, 3  ;;  %v4369_v50 = vrot.slane %v4367_v12, 4  ;;  %v2291_v18 = vshrl.u32 %v2056_v54, 16  ;;  %v2294_v3 = vshll.u32 %v2056_v54, 16 }
 0x213   : > { %v4267_v32 = vrot.slane %v4265_v63, 3  ;;  %v4270_v25 = vrot.slane %v4268_v56, 4  ;;  %v6673_v36 = vcombine.low %v1925_v42, %v1926_v1  ;;  %v6691_v14 = vcombine.low %v9979_v10, %v10029_v40 }
 0x214   : > { %v10031_v39 = vor.u32 %v4369_v50, %v4366_v33  ;;  %v2293_v34 = vrot.slane %v2291_v18, 7  ;;  %v932_v23 = vadd.s32 216, %v12534_v43  ;;  %vm1347_vm10 = vcmp.gt.s32.totalorder %v1123_v9, 0 }
 0x215   : > { %v10036_v61 = vor.u32 %v4270_v25, %v4267_v32  ;;  %v4346_v5 = vshrl.u32 %v6673_v36, 16  ;;  %v4349_v6 = vshll.u32 %v6673_v36, 16  ;;  %vm12544_vm13 = vsmask.f32 4352  ;;  %vm1508_vm4 = vmpackc.low %vm1347_vm10, %vm1347_vm10 }
 0x216   : > { %v4371_v12 = vsel %vm12544_vm13, %v9916_v57, %v10031_v39  ;;  %v2296_v63 = vor.u32 %v2294_v3, %v2293_v34  ;;  %v2839_v4 = vshrl.u32 %v6691_v14, 16  ;;  %v2842_v42 = vshll.u32 %v6691_v14, 16  ;;  %vm12545_vm3 = vmmov %vm12544_vm13 }
 0x217   : > { %5509 = vmatprep.mubr.bf16.mxu0 %v4371_v12  ;;  %v10044_v1 = vsel %vm12545_vm3, %v9977_v60, %v10036_v61  ;;  %v1540_v56 = vsel %vm1508_vm4, 65537, %v12543_v17  ;;  %v4348_v54 = vrot.slane %v4346_v5, 3  ;;  %v4351_v33 = vrot.slane %v4349_v6, 4 }
 0x218   : > { %12546 = vst [vmem:[#allocation68_spill] sm:$0xff] %v10044_v1  ;;  %5348 = vmatprep.mubr.bf16.mxu1 %v10044_v1  ;;  %v2297_v57 = vsel %vm8442_vm11, %v8439_v24, %v2296_v63  ;;  %v1809_v50 = vshll.u32 %v1540_v56, 16  ;;  %v1813_v18 = vshrl.u32 %v1540_v56, 16  ;;  %v2841_v3 = vrot.slane %v2839_v4, 4 }
 0x219   : > { %vm10051_vm10 = vcmp.ne.s16.totalorder %v2297_v57, 0  ;;  %v12547_v32 = vmov 0  ;;  %v10055_v25 = vor.u32 %v4351_v33, %v4348_v54  ;;  %v2844_v60 = vrot.slane %v2842_v42, 5 }
 0x21a   : > { %v12548_v32 = vsel %vm10051_vm10, 4294967295, %v12547_v32  ;;  %v1130_v9 = vand.u32 15, %v932_v23  ;;  %v2411_v36 = vsel %vm10051_vm10, %v9942_v45, 0  ;;  %v1811_v14 = vrot.slane %v1809_v50, 5 }
 0x21b   : > { %12549 = vst [vmem:[#allocation69_spill] sm:$0xff] %v12548_v32  ;;  %v1815_v5 = vrot.slane %v1813_v18, 4  ;;  %v2298_v6 = vrot.slane %v2293_v34, 4  ;;  %v10060_v12 = vcombine.low %v2410_v7, %v2411_v36  ;;  %v4353_v63 = vsel %vm12545_vm3, %v9981_v59, %v10055_v25  ;;  %v10093_v36 = vld [vmem:[#allocation2 + $0x78] sm:$0xf] }
 0x21c   : > { %v10065_v4 = vor.u32 %v2844_v60, %v2841_v3  ;;  %vm1380_vm13 = vcmp.lt.s32.totalorder %v1130_v9, 15  ;;  %v1812_v23 = vsel %vm8463_vm15, %v8459_v38, %v1811_v14  ;;  %5349 = vmatmul.mubr.bf16.gmra.mxu1 %v4353_v63  ;;  %v933_v7 = vadd.s32 224, %v12534_v43 }
 0x21d   : > { %v1816_v42 = vor.u32 %v1815_v5, %v1811_v14  ;;  %vm2026_vm4 = vmpackc.low %vm1380_vm13, %vm1380_vm13  ;;  %v10073_v34 = vsel %vm8442_vm11, %v2298_v6, %v8451_v31  ;;  %v12117_v56 = vrot.slane %v10060_v12, 5  ;;  %vm10077_vm3 = vcmp.ne.s16.totalorder %v1812_v23, 0 }
 0x21e   : > { %12550 = vst [vmem:[#allocation70_spill] sm:$0xff] %v10073_v34  ;;  %v12551_v59 = vmov 0  ;;  %vm12554_vm5 = vsmask.f32 3328  ;;  %v2058_v33 = vsel %vm2026_vm4, 65537, %v12543_v17  ;;  %v2448_v50 = vsel %vm10077_vm3, %v10029_v40, 0 }
 0x21f   : > { %v12552_v59 = vsel %vm10077_vm3, 4294967295, %v12551_v59  ;;  %v2846_v54 = vsel %vm12554_vm5, %v10004_v21, %v10065_v4  ;;  %v1817_v57 = vrot.slane %v1816_v42, 4  ;;  %v12555_v60 = vrot.slane %v9957_v46, 5 }
 0x220   : > { %12553 = vst [vmem:[#allocation71_spill] sm:$0xff] %v12552_v59  ;;  %v4328_v18 = vshrl.u32 %v2846_v54, 16  ;;  %v4331_v3 = vshll.u32 %v2846_v54, 16  ;;  %vm12556_vm13 = vcmask 1042432   ;;  %v2309_v14 = vshrl.u32 %v2058_v33, 16 }
 0x221   : > { %v2973_v9 = vsel %vm12556_vm13, %v12555_v60, %v12117_v56  ;;  %v2312_v5 = vshll.u32 %v2058_v33, 16  ;;  %vm12122_vm5 = vcmp.ne.s16.totalorder %v10073_v34, 0  ;;  %v1822_v63 = vsel %vm8463_vm15, %v1817_v57, %v8432_v20  ;;  %v10108_v60 = vld [vmem:[#allocation2 + $0x7c] sm:$0xf] }
 0x222   : > { %v4355_v21 = vshrl.u32 %v2973_v9, 16  ;;  %v4358_v6 = vshll.u32 %v2973_v9, 16  ;;  %v4330_v23 = vrot.slane %v4328_v18, 3  ;;  %vm10099_vm4 = vcmp.ne.s16.totalorder %v1822_v63, 0 }
 0x223   : > { %v12557_v42 = vmov 0  ;;  %v4333_v46 = vrot.slane %v4331_v3, 4  ;;  %v10103_v54 = vrot.slane %v2309_v14, 7  ;;  %v2412_v33 = vsel %vm12122_vm5, %v9979_v10, 0 }
 0x224   : > { %v12558_v42 = vsel %vm10099_vm4, 4294967295, %v12557_v42  ;;  %v4357_v56 = vrot.slane %v4355_v21, 3  ;;  %v4360_v9 = vrot.slane %v4358_v6, 4  ;;  %v2449_v57 = vsel %vm10099_vm4, %v10093_v36, 0 }
 0x225   : > { %12559 = vst [vmem:[#allocation72_spill] sm:$0xff] %v12558_v42  ;;  %v1137_v18 = vand.u32 15, %v933_v7  ;;  %v6724_v63 = vcombine.low %v2448_v50, %v2449_v57  ;;  %v10113_v1 = vor.u32 %v4333_v46, %v4330_v23  ;;  %v2314_v3 = vor.u32 %v2312_v5, %v10103_v54 }
 0x226   : > { %v1927_v14 = vsel %vm10077_vm3, %v9942_v45, 0  ;;  %v10119_v34 = vor.u32 %v4360_v9, %v4357_v56  ;;  %v1928_v21 = vsel %vm10099_vm4, %v9979_v10, 0  ;;  %v6692_v6 = vcombine.low %v10093_v36, %v10108_v60 }
 0x227   : > { %vm1349_vm13 = vcmp.gt.s32.totalorder %v1137_v18, 0  ;;  %v4427_v7 = vshrl.u32 %v6724_v63, 16  ;;  %v4430_v50 = vshll.u32 %v6724_v63, 16  ;;  %vm12560_vm5 = vsmask.f32 4352 }
 0x228   : > { %v10129_v5 = vsel %vm12560_vm5, %v10036_v61, %v10113_v1  ;;  %v2315_v45 = vsel %vm8442_vm11, %v8439_v24, %v2314_v3  ;;  %vm1510_vm3 = vmpackc.low %vm1349_vm13, %vm1349_vm13  ;;  %v12563_v10 = vmov 0  ;;  %v6674_v46 = vcombine.low %v1927_v14, %v1928_v21 }
 0x229   : > { %12561 = vst [vmem:[#allocation73_spill] sm:$0xff] %v10129_v5  ;;  %vm12562_vm10 = vmmov %vm12560_vm5  ;;  %5356 = vmatprep.mubr.bf16.mxu1 %v10129_v5  ;;  %vm10138_vm4 = vcmp.ne.s16.totalorder %v2315_v45, 0  ;;  %v1542_v23 = vsel %vm1510_vm3, 65537, %v12543_v17  ;;  %v4429_v61 = vrot.slane %v4427_v7, 3  ;;  %v4432_v9 = vrot.slane %v4430_v50, 4 }
 0x22a   : > { %v4362_v56 = vsel %vm12562_vm10, %v9998_v8, %v10119_v34  ;;  %v12564_v10 = vsel %vm10138_vm4, 4294967295, %v12563_v10  ;;  %v2413_v57 = vsel %vm10138_vm4, %v10029_v40, 0  ;;  %v1829_v18 = vshll.u32 %v1542_v23, 16  ;;  %vm12566_vm10 = vmmov %vm12560_vm5 }
 0x22b   : > { %12565 = vst [vmem:[#allocation74_spill] sm:$0xff] %v12564_v10  ;;  %5510 = vmatmul.mubr.bf16.gmra.mxu0 %v4362_v56  ;;  %v10146_v63 = vcombine.low %v2412_v33, %v2413_v57  ;;  %v1833_v8 = vshrl.u32 %v1542_v23, 16  ;;  %v4409_v3 = vshrl.u32 %v6674_v46, 16  ;;  %v4412_v5 = vshll.u32 %v6674_v46, 16  ;;  %vm12572_vm13 = vmmov %vm12566_vm10 }
 0x22c   : > { %v10148_v45 = vor.u32 %v4432_v9, %v4429_v61  ;;  %v1831_v42 = vrot.slane %v1829_v18, 5  ;;  %v2848_v59 = vshrl.u32 %v6692_v6, 16  ;;  %v2851_v30 = vshll.u32 %v6692_v6, 16 }
 0x22d   : > { %v12138_v14 = vrot.slane %v10146_v63, 5  ;;  %v1835_v21 = vrot.slane %v1833_v8, 4  ;;  %v4411_v7 = vrot.slane %v4409_v3, 3  ;;  %v4414_v50 = vrot.slane %v4412_v5, 4 }
 0x22e   : > { %v4434_v56 = vsel %vm12566_vm10, %v10031_v39, %v10148_v45  ;;  %v1832_v33 = vsel %vm8463_vm15, %v8459_v38, %v1831_v42  ;;  %v2850_v23 = vrot.slane %v2848_v59, 4  ;;  %v2853_v46 = vrot.slane %v2851_v30, 5 }
 0x22f   : > { %5517 = vmatprep.mubr.bf16.mxu0 %v4434_v56  ;;  %v12567_v6 = vrot.slane %v10060_v12, 5  ;;  %vm12568_vm3 = vcmask 1042432   ;;  %v1836_v9 = vor.u32 %v1835_v21, %v1831_v42  ;;  %vm10162_vm5 = vcmp.ne.s16.totalorder %v1832_v33, 0 }
 0x230   : > { %v12569_v5 = vmov 0  ;;  %v10166_v57 = vor.u32 %v4414_v50, %v4411_v7  ;;  %v2450_v30 = vsel %vm10162_vm5, %v10108_v60, 0  ;;  %v10171_v59 = vor.u32 %v2853_v46, %v2850_v23  ;;  %v10178_v50 = vld [vmem:[#allocation2 + $0x80] sm:$0xf] }
 0x231   : > { %v2975_v61 = vsel %vm12568_vm3, %v12567_v6, %v12138_v14  ;;  %v12570_v5 = vsel %vm10162_vm5, 4294967295, %v12569_v5  ;;  %v1837_v8 = vrot.slane %v1836_v9, 4  ;;  %v934_v42 = vadd.s32 232, %v12534_v43 }
 0x232   : > { %12571 = vst [vmem:[#allocation75_spill] sm:$0xff] %v12570_v5  ;;  %v4418_v39 = vshrl.u32 %v2975_v61, 16  ;;  %v4421_v18 = vshll.u32 %v2975_v61, 16  ;;  %v4416_v12 = vsel %vm12572_vm13, %v10055_v25, %v10166_v57  ;;  %v2316_v3 = vrot.slane %v10103_v54, 4 }
 0x233   : > { %5357 = vmatmul.mubr.bf16.gmra.mxu1 %v4416_v12  ;;  %vm12573_vm10 = vsmask.f32 3328  ;;  %v935_v33 = vadd.s32 240, %v12534_v43  ;;  %v1842_v23 = vsel %vm8463_vm15, %v1837_v8, %v8432_v20  ;;  %v1144_v6 = vand.u32 15, %v934_v42 }
 0x234   : > { %v4420_v21 = vrot.slane %v4418_v39, 3  ;;  %v4423_v7 = vrot.slane %v4421_v18, 4  ;;  %v2855_v56 = vsel %vm12573_vm10, %v10065_v4, %v10171_v59  ;;  %vm10189_vm3 = vcmp.ne.s16.totalorder %v1842_v23, 0 }
 0x235   : > { %v4391_v25 = vshrl.u32 %v2855_v56, 16  ;;  %v4394_v46 = vshll.u32 %v2855_v56, 16  ;;  %v12574_v54 = vmov 0  ;;  %v10196_v9 = vsel %vm8442_vm11, %v2316_v3, %v8451_v31 }
 0x236   : > { %v10187_v61 = vor.u32 %v4423_v7, %v4420_v21  ;;  %v12575_v54 = vsel %vm10189_vm3, 4294967295, %v12574_v54  ;;  %12577 = vst [vmem:[#allocation77_spill] sm:$0xff] %v10196_v9  ;;  %v1151_v4 = vand.u32 15, %v935_v33  ;;  %v2451_v39 = vsel %vm10189_vm3, %v10178_v50, 0  ;;  %v10205_v21 = vld [vmem:[#allocation2 + $0x84] sm:$0xf] }
 0x237   : > { %12576 = vst [vmem:[#allocation76_spill] sm:$0xff] %v12575_v54  ;;  %v4393_v18 = vrot.slane %v4391_v25, 3  ;;  %v4396_v8 = vrot.slane %v4394_v46, 4  ;;  %vm1382_vm13 = vcmp.lt.s32.totalorder %v1144_v6, 15  ;;  %vm12578_vm10 = vsmask.f32 4352 }
 0x238   : > { %v4425_v12 = vsel %vm12578_vm10, %v10119_v34, %v10187_v61  ;;  %v6725_v42 = vcombine.low %v2450_v30, %v2451_v39  ;;  %vm2028_vm4 = vmpackc.low %vm1382_vm13, %vm1382_vm13  ;;  %vm12150_vm14 = vcmp.ne.s16.totalorder %v10196_v9, 0  ;;  %vm1351_vm8 = vcmp.gt.s32.totalorder %v1151_v4, 0 }
 0x239   : > { %5518 = vmatmul.mubr.bf16.gmra.mxu0 %v4425_v12  ;;  %v10207_v3 = vor.u32 %v4396_v8, %v4393_v18  ;;  %v2060_v7 = vsel %vm2028_vm4, 65537, %v12543_v17  ;;  %v2414_v56 = vsel %vm12150_vm14, %v10093_v36, 0  ;;  %vm1512_vm12 = vmpackc.low %vm1351_vm8, %vm1351_vm8  ;;  %v1929_v34 = vsel %vm10162_vm5, %v10029_v40, 0 }
 0x23a   : > { %v4490_v30 = vshrl.u32 %v6725_v42, 16  ;;  %v4493_v33 = vshll.u32 %v6725_v42, 16  ;;  %v2327_v23 = vshrl.u32 %v2060_v7, 16  ;;  %v2330_v25 = vshll.u32 %v2060_v7, 16  ;;  %vm12579_vm13 = vmmov %vm12578_vm10 }
 0x23b   : > { %v10219_v46 = vsel %vm12579_vm13, %v10113_v1, %v10207_v3  ;;  %v1544_v6 = vsel %vm1512_vm12, 65537, %v12543_v17  ;;  %v1930_v4 = vsel %vm10189_vm3, %v10093_v36, 0  ;;  %v6693_v39 = vcombine.low %v10178_v50, %v10205_v21  ;;  %vm12581_vm12 = vmmov %vm12578_vm10 }
 0x23c   : > { %12580 = vst [vmem:[#allocation78_spill] sm:$0xff] %v10219_v46  ;;  %v4492_v18 = vrot.slane %v4490_v30, 3  ;;  %v4495_v40 = vrot.slane %v4493_v33, 4  ;;  %5364 = vmatprep.mubr.bf16.mxu1 %v10219_v46  ;;  %v2329_v8 = vrot.slane %v2327_v23, 7  ;;  %v1849_v12 = vshll.u32 %v1544_v6, 16 }
 0x23d   : > { %v1853_v42 = vshrl.u32 %v1544_v6, 16  ;;  %v6675_v7 = vcombine.low %v1929_v34, %v1930_v4  ;;  %v2857_v14 = vshrl.u32 %v6693_v39, 16  ;;  %v2860_v1 = vshll.u32 %v6693_v39, 16 }
 0x23e   : > { %v10228_v5 = vor.u32 %v4495_v40, %v4492_v18  ;;  %v2332_v9 = vor.u32 %v2330_v25, %v2329_v8  ;;  %v1851_v10 = vrot.slane %v1849_v12, 5  ;;  %v936_v54 = vadd.s32 248, %v12534_v43 }
 0x23f   : > { %v1855_v36 = vrot.slane %v1853_v42, 4  ;;  %v4472_v29 = vshrl.u32 %v6675_v7, 16  ;;  %v4475_v32 = vshll.u32 %v6675_v7, 16  ;;  %v2859_v62 = vrot.slane %v2857_v14, 4  ;;  %v10258_v42 = vld [vmem:[#allocation2 + $0x88] sm:$0xf] }
 0x240   : > { %v4497_v30 = vsel %vm12581_vm12, %v10148_v45, %v10228_v5  ;;  %v2333_v34 = vsel %vm8442_vm11, %v8439_v24, %v2332_v9  ;;  %v1852_v33 = vsel %vm8463_vm15, %v8459_v38, %v1851_v10  ;;  %v2862_v23 = vrot.slane %v2860_v1, 5  ;;  %12589 = vst [vmem:[#allocation82_spill] sm:$0xff] %v10258_v42 }
 0x241   : > { %5525 = vmatprep.mubr.bf16.mxu0 %v4497_v30  ;;  %vm10240_vm8 = vcmp.ne.s16.totalorder %v2333_v34, 0  ;;  %v12582_v43 = vmov 0  ;;  %v1856_v25 = vor.u32 %v1855_v36, %v1851_v10  ;;  %vm10244_vm4 = vcmp.ne.s16.totalorder %v1852_v33, 0 }
 0x242   : > { %v12583_v43 = vsel %vm10240_vm8, 4294967295, %v12582_v43  ;;  %v12585_v14 = vmov 0  ;;  %v4474_v45 = vrot.slane %v4472_v29, 3  ;;  %v2415_v9 = vsel %vm10240_vm8, %v10108_v60, 0 }
 0x243   : > { %12584 = vst [vmem:[#allocation79_spill] sm:$0xff] %v12583_v43  ;;  %v12586_v14 = vsel %vm10244_vm4, 4294967295, %v12585_v14  ;;  %v2452_v6 = vsel %vm10244_vm4, %v10205_v21, 0  ;;  %v4477_v4 = vrot.slane %v4475_v32, 4  ;;  %v10254_v39 = vor.u32 %v2862_v23, %v2859_v62 }
 0x244   : > { %12587 = vst [vmem:[#allocation80_spill] sm:$0xff] %v12586_v14  ;;  %v10256_v18 = vcombine.low %v2414_v56, %v2415_v9  ;;  %v1857_v40 = vrot.slane %v1856_v25, 4  ;;  %v1158_v10 = vand.u32 15, %v936_v54  ;;  %v2334_v12 = vrot.slane %v2329_v8, 4 }
 0x245   : > { %12588 = vst [vmem:[#allocation81_spill] sm:$0xff] %v10254_v39  ;;  %v10260_v7 = vor.u32 %v4477_v4, %v4474_v45  ;;  %vm12590_vm10 = vsmask.f32 3328  ;;  %v1931_v62 = vsel %vm10244_vm4, %v10108_v60, 0  ;;  %v12591_v1 = vmov 0 }
 0x246   : > { %v2864_v29 = vsel %vm12590_vm10, %v10171_v59, %v10254_v39  ;;  %v2976_v32 = vrot.slane %v10256_v18, 5  ;;  %v1862_v54 = vsel %vm8463_vm15, %v1857_v40, %v8432_v20  ;;  %vm12594_vm10 = vmmov %vm12579_vm13  ;;  %vm1384_vm14 = vcmp.lt.s32.totalorder %v1158_v10, 15  ;;  %v7964_v18 = vld [vmem:[#allocation2 + $0x14] sm:$0xf] }
 0x247   : > { %v4454_v56 = vshrl.u32 %v2864_v29, 16  ;;  %v4457_v8 = vshll.u32 %v2864_v29, 16  ;;  %vm10273_vm12 = vcmp.ne.s16.totalorder %v1862_v54, 0  ;;  %v4479_v59 = vsel %vm12594_vm10, %v10166_v57, %v10260_v7  ;;  %vm2030_vm10 = vmpackc.low %vm1384_vm14, %vm1384_vm14  ;;  %v10297_v29 = vld [vmem:[#allocation2 + $0x8c] sm:$0xf] }
 0x248   : > { %v12592_v1 = vsel %vm10273_vm12, 4294967295, %v12591_v1  ;;  %v10283_v60 = vsel %vm8442_vm11, %v2334_v12, %v8451_v31  ;;  %v12596_v20 = vrot.slane %v10146_v63, 5  ;;  %vm12597_vm15 = vcmask 1042432   ;;  %5365 = vmatmul.mubr.bf16.gmra.mxu1 %v4479_v59  ;;  %12599 = vst [vmem:[#allocation86_spill] sm:$0xff] %v10297_v29 }
 0x249   : > { %12593 = vst [vmem:[#allocation83_spill] sm:$0xff] %v12592_v1  ;;  %12595 = vst [vmem:[#allocation84_spill] sm:$0xff] %v10283_v60  ;;  %v2453_v36 = vsel %vm10273_vm12, %v10258_v42, 0  ;;  %v4456_v30 = vrot.slane %v4454_v56, 3  ;;  %v4459_v34 = vrot.slane %v4457_v8, 4  ;;  %v2062_v25 = vsel %vm2030_vm10, 65537, %v12543_v17 }
 0x24a   : > { %v2977_v41 = vsel %vm12597_vm15, %v12596_v20, %v2976_v32  ;;  %v6726_v23 = vcombine.low %v2452_v6, %v2453_v36  ;;  %v2345_v9 = vshrl.u32 %v2062_v25, 16  ;;  %v2348_v4 = vshll.u32 %v2062_v25, 16 }
 0x24b   : > { %v4481_v57 = vshrl.u32 %v2977_v41, 16  ;;  %v4484_v33 = vshll.u32 %v2977_v41, 16  ;;  %v10294_v45 = vor.u32 %v4459_v34, %v4456_v30  ;;  %vm12151_vm13 = vcmp.ne.s16.totalorder %v10283_v60, 0 }
 0x24c   : > { %v4553_v10 = vshrl.u32 %v6726_v23, 16  ;;  %v4556_v12 = vshll.u32 %v6726_v23, 16  ;;  %vm12600_vm14 = vsmask.f32 4352  ;;  %v2347_v6 = vrot.slane %v2345_v9, 7 }
 0x24d   : > { %12598 = vst [vmem:[#allocation85_spill] sm:$0xff] %v10294_v45  ;;  %v4483_v63 = vrot.slane %v4481_v57, 3  ;;  %v4486_v40 = vrot.slane %v4484_v33, 4  ;;  %v10302_v54 = vsel %vm12600_vm14, %v10207_v3, %v10294_v45  ;;  %v2416_v17 = vsel %vm12151_vm13, %v10178_v50, 0  ;;  %vm12603_vm10 = vmmov %vm12600_vm14 }
 0x24e   : > { %12601 = vst [vmem:[#allocation87_spill] sm:$0xff] %v10302_v54  ;;  %vm12602_vm15 = vcmp.ne.s16.totalorder %v8459_v38, 0  ;;  %v4555_v59 = vrot.slane %v4553_v10, 3  ;;  %v4558_v20 = vrot.slane %v4556_v12, 4  ;;  %5372 = vmatprep.mubr.bf16.mxu1 %v10302_v54  ;;  %v2350_v36 = vor.u32 %v2348_v4, %v2347_v6  ;;  %vm12604_vm14 = vmmov %vm12603_vm10 }
 0x24f   : > { %v2454_v56 = vsel %vm12602_vm15, %v10297_v29, 0  ;;  %v10310_v8 = vor.u32 %v4486_v40, %v4483_v63  ;;  %v1932_v3 = vsel %vm10273_vm12, %v10178_v50, 0  ;;  %v4607_v30 = vshrl.u32 %v10254_v39, 16  ;;  %v12689_v29 = vld [vmem:[#allocation28_spill] sm:$0xff] }
 0x250   : > { %v6727_v41 = vcombine.low %v2454_v56, %v2454_v56  ;;  %v4610_v34 = vshll.u32 %v10254_v39, 16  ;;  %v4559_v33 = vor.u32 %v4558_v20, %v4555_v59  ;;  %v2351_v9 = vsel %vm8442_vm11, %v8439_v24, %v2350_v36  ;;  %vm12608_vm11 = vmmov %vm12603_vm10 }
 0x251   : > { %v4488_v57 = vsel %vm12603_vm10, %v10187_v61, %v10310_v8  ;;  %v6676_v4 = vcombine.low %v1931_v62, %v1932_v3  ;;  %v4609_v63 = vrot.slane %v4607_v30, 3  ;;  %vm10326_vm15 = vcmp.ne.s16.totalorder %v2351_v9, 0  ;;  %vm12614_vm12 = vmmov %vm12608_vm11 }
 0x252   : > { %v4625_v23 = vshrl.u32 %v6727_v41, 16  ;;  %v4628_v25 = vshll.u32 %v6727_v41, 16  ;;  %5526 = vmatmul.mubr.bf16.gmra.mxu0 %v4488_v57  ;;  %v4612_v40 = vrot.slane %v4610_v34, 4  ;;  %v4560_v50 = vsel %vm12604_vm14, %v10228_v5, %v4559_v33  ;;  %v1934_v41 = vld [vmem:[#allocation2 + $0x88] sm:$0x1] }
 0x253   : > { %v12605_v10 = vmov 0  ;;  %5533 = vmatprep.mubr.bf16.mxu0 %v4560_v50  ;;  %v2417_v56 = vsel %vm10326_vm15, %v10205_v21, 0  ;;  %v4535_v59 = vshrl.u32 %v6676_v4, 16  ;;  %v4538_v26 = vshll.u32 %v6676_v4, 16 }
 0x254   : > { %v12606_v10 = vsel %vm10326_vm15, 4294967295, %v12605_v10  ;;  %v4627_v12 = vrot.slane %v4625_v23, 3  ;;  %v4630_v61 = vrot.slane %v4628_v25, 4  ;;  %v4613_v24 = vor.u32 %v4612_v40, %v4609_v63 }
 0x255   : > { %12607 = vst [vmem:[#allocation88_spill] sm:$0xff] %v12606_v10  ;;  %v6709_v62 = vcombine.low %v2416_v17, %v2417_v56  ;;  %v2352_v36 = vrot.slane %v2347_v6, 4  ;;  %v3680_v5 = vshrl.u32 %v9155_v53, 16  ;;  %v4537_v3 = vrot.slane %v4535_v59, 3  ;;  %v10504_v10 = vld [vmem:[#allocation2 + $0x44] sm:$0xf] }
 0x256   : > { %v4631_v20 = vor.u32 %v4630_v61, %v4627_v12  ;;  %v4540_v30 = vrot.slane %v4538_v26, 4  ;;  %v3683_v34 = vshll.u32 %v9155_v53, 16  ;;  %v4614_v23 = vsel %vm12608_vm11, %v10294_v45, %v4613_v24  ;;  %v7963_v26 = vld [vmem:[#allocation2 + $0x10] sm:$0xf] }
 0x257   : > { %v2978_v57 = vrot.slane %v6709_v62, 5  ;;  %vm10337_vm10 = vcmp.ne.s16.totalorder %v2352_v36, 0  ;;  %v12609_v25 = vmov 0  ;;  %v10341_v9 = vrot.slane %v3680_v5, 3 }
 0x258   : > { %v12610_v25 = vsel %vm10337_vm10, 4294967295, %v12609_v25  ;;  %v4541_v17 = vor.u32 %v4540_v30, %v4537_v3  ;;  %v2418_v6 = vsel %vm10337_vm10, %v1934_v41, 0  ;;  %v10345_v4 = vrot.slane %v3683_v34, 4  ;;  %v7965_v3 = vld [vmem:[#allocation2 + $0x18] sm:$0xf] }
 0x259   : > { %12611 = vst [vmem:[#allocation89_spill] sm:$0xff] %v12610_v25  ;;  %vm12612_vm14 = vcmp.ne.s16.totalorder %v8459_v38, 0  ;;  %vm12613_vm13 = vcmask 1042432   ;;  %v4632_v40 = vsel %vm12608_vm11, %v4559_v33, %v4631_v20  ;;  %v6710_v50 = vcombine.low %v2418_v6, %v2418_v6  ;;  %v2489_v34 = vld [vmem:[#allocation2 + $0x14] sm:$0x8] }
 0x25a   : > { %v1933_v53 = vsel %vm12612_vm14, %v10205_v21, 0  ;;  %v2979_v63 = vsel %vm12613_vm13, %v2976_v32, %v2978_v57  ;;  %v4542_v59 = vsel %vm12614_vm12, %v10260_v7, %v4541_v17  ;;  %vm12615_vm4 = vcmp.ne.s16.totalorder %v8451_v31, 0  ;;  %v12617_v7 = vld [vmem:[#allocation22_spill] sm:$0xff]  ;;  %vm12624_vm14 = vmmov %vm12608_vm11  ;;  %v12656_v31 = vld [vmem:[#allocation25_spill] sm:$0xff] }
 0x25b   : > { %v6677_v12 = vcombine.low %v1933_v53, %v1933_v53  ;;  %v4544_v61 = vshrl.u32 %v2979_v63, 16  ;;  %v4547_v56 = vshll.u32 %v2979_v63, 16  ;;  %v2456_v24 = vsel %vm12615_vm4, %v7963_v26, 0  ;;  %5373 = vmatmul.mubr.bf16.gmra.mxu1 %v4542_v59 }
 0x25c   : > { %v2980_v62 = vrot.slane %v6710_v50, 5  ;;  %v2457_v32 = vsel %vm8468_vm1, %v7964_v18, 0  ;;  %5380 = vmatprep.mubr.bf16.mxu1 %v4614_v23  ;;  %v3686_v5 = vor.u32 %v10345_v4, %v10341_v9  ;;  %vm12618_vm13 = vcmp.ne.s16.totalorder %v12617_v7, 0  ;;  %v7966_v50 = vld [vmem:[#allocation2 + $0x1c] sm:$0xf]  ;;  %v12621_v9 = vld [vmem:[#allocation17_spill] sm:$0xff] }
 0x25d   : > { %v4598_v21 = vshrl.u32 %v6677_v12, 16  ;;  %v4601_v41 = vshll.u32 %v6677_v12, 16  ;;  %v4546_v33 = vrot.slane %v4544_v61, 3  ;;  %v4549_v20 = vrot.slane %v4547_v56, 4  ;;  %v12659_v7 = vld [vmem:[#allocation62_spill] sm:$0xff] }
 0x25e   : > { %v2458_v30 = vsel %vm12618_vm13, %v7965_v3, 0  ;;  %vm12619_vm4 = vcmask 1042432   ;;  %v2459_v59 = vsel %vm8982_vm9, %v7966_v50, 0  ;;  %v6729_v23 = vcombine.low %v2456_v24, %v2457_v32 }
 0x25f   : > { %v2981_v6 = vsel %vm12619_vm4, %v2978_v57, %v2980_v62  ;;  %v4600_v53 = vrot.slane %v4598_v21, 3  ;;  %v4603_v63 = vrot.slane %v4601_v41, 4  ;;  %v4550_v26 = vor.u32 %v4549_v20, %v4546_v33  ;;  %v7967_v20 = vld [vmem:[#allocation2 + $0x20] sm:$0xf] }
 0x260   : > { %v4616_v61 = vshrl.u32 %v2981_v6, 16  ;;  %v4619_v56 = vshll.u32 %v2981_v6, 16  ;;  %v10367_v45 = vcombine.low %v2458_v30, %v2459_v59  ;;  %vm12622_vm12 = vcmp.ne.s16.totalorder %v12621_v9, 0  ;;  %v10381_v6 = vpop.f32.mrf.mxu0 }
 0x261   : > { %v4604_v18 = vor.u32 %v4603_v63, %v4600_v53  ;;  %v2492_v4 = vsel %vm12622_vm12, %v2489_v34, 0  ;;  %v2493_v36 = vsel %vm8500_vm6, %v7965_v3, 0  ;;  %v4551_v57 = vsel %vm12624_vm14, %v10310_v8, %v4550_v26  ;;  %vm12626_vm6 = vmmov %vm12619_vm4  ;;  %v12627_v63 = vld [vmem:[#allocation55_spill] sm:$0xff] }
 0x262   : > { %v4618_v62 = vrot.slane %v4616_v61, 3  ;;  %v4621_v21 = vrot.slane %v4619_v56, 4  ;;  %v3162_v41 = vrot.slane %v6729_v23, 5  ;;  %5534 = vmatmul.mubr.bf16.gmra.mxu0 %v4551_v57  ;;  %v12156_v24 = vrot.slane %v10367_v45, 5 }
 0x263   : > { %v4605_v33 = vsel %vm12608_vm11, %v4541_v17, %v4604_v18  ;;  %v2494_v32 = vsel %vm8511_vm7, %v7966_v50, 0  ;;  %vm12625_vm13 = vnez %v12304_v11  ;;  %5541 = vmatprep.mubr.bf16.mxu0 %v4632_v40  ;;  %v6746_v8 = vcombine.low %v2492_v4, %v2493_v36  ;;  %vm12628_vm7 = vmmov %vm12608_vm11 }
 0x264   : > { %v2495_v30 = vsel %vm12625_vm13, %v7967_v20, 0  ;;  %v4622_v38 = vor.u32 %v4621_v21, %v4618_v62  ;;  %v3646_v3 = vshrl.u32 %v3162_v41, 16  ;;  %v3649_v34 = vshll.u32 %v3162_v41, 16  ;;  %5381 = vmatmul.mubr.bf16.gmra.mxu1 %v4605_v33  ;;  %v10389_v21 = vpop.f32.mrf.mxu0  ;;  %vm12634_vm14 = vmmov %vm12628_vm7 }
 0x265   : > { %v3164_v17 = vsel %vm12626_vm6, %v3162_v41, %v12156_v24  ;;  %v6747_v53 = vcombine.low %v2494_v32, %v2495_v30  ;;  %v3629_v2 = vshrl.u32 %v12627_v63, 16  ;;  %v3632_v50 = vshll.u32 %v12627_v63, 16 }
 0x266   : > { %v4623_v11 = vsel %vm12628_vm7, %v4550_v26, %v4622_v38  ;;  %v3648_v59 = vrot.slane %v3646_v3, 3  ;;  %v3651_v40 = vrot.slane %v3649_v34, 4  ;;  %v3654_v61 = vshrl.u32 %v3164_v17, 16  ;;  %v12629_v26 = vld [vmem:[#allocation23_spill] sm:$0xff]  ;;  %v10393_v3 = vld [vmem:[#allocation2 + $0x24] sm:$0xf] }
 0x267   : > { %v3657_v56 = vshll.u32 %v3164_v17, 16  ;;  %v3663_v23 = vshrl.u32 %v6746_v8, 16  ;;  %v3666_v36 = vshll.u32 %v6746_v8, 16  ;;  %v3671_v18 = vshrl.u32 %v6747_v53, 16  ;;  %12631 = vst [vmem:[#allocation17_spill] sm:$0xff] %v10393_v3  ;;  %v12632_v34 = vld [vmem:[#allocation52_spill] sm:$0xff] }
 0x268   : > { %v3652_v9 = vor.u32 %v3651_v40, %v3648_v59  ;;  %v3656_v4 = vrot.slane %v3654_v61, 3  ;;  %v3674_v57 = vshll.u32 %v6747_v53, 16  ;;  %v3631_v62 = vrot.slane %v3629_v2, 3  ;;  %v12635_v59 = vld [vmem:[#allocation46_spill] sm:$0xff]  ;;  %v10405_v40 = vpop.f32.mrf.mxu1 }
 0x269   : > { %v3659_v41 = vrot.slane %v3657_v56, 4  ;;  %v3665_v33 = vrot.slane %v3663_v23, 3  ;;  %v3668_v32 = vrot.slane %v3666_v36, 4  ;;  %v3673_v30 = vrot.slane %v3671_v18, 3  ;;  %v10409_v56 = vld [vmem:[#allocation2 + $0x28] sm:$0xf]  ;;  %v10417_v36 = vpop.f32.mrf.mxu0 }
 0x26a   : > { %v3676_v63 = vrot.slane %v3674_v57, 4  ;;  %v3634_v24 = vrot.slane %v3632_v50, 4  ;;  %vm12630_vm4 = vcmp.ne.s16.totalorder %v12629_v26, 0  ;;  %vm12633_vm12 = vnez %v12632_v34  ;;  %5542 = vmatmul.mubr.bf16.gmra.mxu0 %v4623_v11  ;;  %v12637_v11 = vld [vmem:[#allocation51_spill] sm:$0xff]  ;;  %12641 = vst [vmem:[#allocation21_spill] sm:$0xff] %v10417_v36 }
 0x26b   : > { %v2460_v38 = vsel %vm12630_vm4, %v7967_v20, 0  ;;  %v2461_v8 = vsel %vm12633_vm12, %v10393_v3, 0  ;;  %v3695_v17 = vsel %vm12634_vm14, %v3686_v5, %v9333_v28  ;;  %v10400_v53 = vor.u32 %v3659_v41, %v3656_v4  ;;  %v12639_v28 = vld [vmem:[#allocation26_spill] sm:$0xff]  ;;  %v10421_v41 = vld [vmem:[#allocation2 + $0x2c] sm:$0xf]  ;;  %vm12644_vm14 = vmmov %vm12628_vm7 }
 0x26c   : > { %v6731_v2 = vcombine.low %v2460_v38, %v2461_v8  ;;  %vm12636_vm11 = vnez %v12635_v59  ;;  %5743 = vmatprep.mubr.bf16.mxu0 %v3695_v17  ;;  %v10407_v20 = vor.u32 %v3676_v63, %v3673_v30  ;;  %v3635_v61 = vor.u32 %v3634_v24, %v3631_v62  ;;  %v12642_v24 = vld [vmem:[#allocation56_spill] sm:$0xff]  ;;  %v7945_v30 = vld [vmem:[#allocation8 + $0x230] sm:$0xff]   ;;  %v10426_v63 = vpop.f32.mrf.mxu1 }
 0x26d   : > { %v2496_v50 = vsel %vm12636_vm11, %v10393_v3, 0  ;;  %vm12638_vm13 = vnez %v12637_v11  ;;  %vm12640_vm6 = vcmp.ne.s16.totalorder %v12639_v28, 0  ;;  %v3661_v18 = vsel %vm12628_vm7, %v3652_v9, %v10400_v53  ;;  %v12645_v59 = vld [vmem:[#allocation54_spill] sm:$0xff] }
 0x26e   : > { %v2497_v23 = vsel %vm12638_vm13, %v10409_v56, 0  ;;  %v2462_v5 = vsel %vm12640_vm6, %v10409_v56, 0  ;;  %v3165_v4 = vrot.slane %v6731_v2, 5  ;;  %vm12643_vm4 = vnez %v12642_v24  ;;  %5582 = vmatprep.mubr.bf16.mxu1 %v3661_v18  ;;  %v10436_v24 = vld [vmem:[#allocation2 + $0x30] sm:$0xf]  ;;  %v12650_v18 = vld [vmem:[#allocation53_spill] sm:$0xff] }
 0x26f   : > { %v6748_v57 = vcombine.low %v2496_v50, %v2497_v23  ;;  %v2463_v62 = vsel %vm12643_vm4, %v10421_v41, 0  ;;  %v3669_v38 = vor.u32 %v3668_v32, %v3665_v33  ;;  %v3644_v8 = vsel %vm12644_vm14, %v3635_v61, %v9233_v52  ;;  %12649 = vst [vmem:[#allocation55_spill] sm:$0xff] %v10436_v24  ;;  %v10441_v32 = vpop.f32.mrf.mxu1  ;;  %v7972_v52 = vld [vmem:[#allocation8 + $0x238] sm:$0xff]   ;;  %v10450_v28 = vld [vmem:[#allocation2 + $0x34] sm:$0xf] }
 0x270   : > { %v6732_v17 = vcombine.low %v2462_v5, %v2463_v62  ;;  %vm12646_vm11 = vnez %v12645_v59  ;;  %5583 = vmatmul.mubr.bf16.vlgmr.msra.gmra.mxu1 %v3644_v8  ;;  %v12647_v2 = vrot.slane %v10367_v45, 5  ;;  %vm12648_vm13 = vcmask 1042432   ;;  %v10443_v59 = vpop.f32.mrf.mxu0  ;;  %12655 = vst [vmem:[#allocation52_spill] sm:$0xff] %v10450_v28 }
 0x271   : > { %v2498_v9 = vsel %vm12646_vm11, %v10421_v41, 0  ;;  %v3752_v11 = vshrl.u32 %v6748_v57, 16  ;;  %v3755_v23 = vshll.u32 %v6748_v57, 16  ;;  %vm12651_vm6 = vnez %v12650_v18  ;;  %7646 = vmatpush3.bf16.msra.mxu1 %v7972_v52  ;;  %12652 = vst [vmem:[#allocation23_spill] sm:$0xff] %v10443_v59 }
 0x272   : > { %v3166_v50 = vsel %vm12648_vm13, %v12647_v2, %v3165_v4  ;;  %v2499_v33 = vsel %vm12651_vm6, %v10436_v24, 0  ;;  %v3167_v62 = vrot.slane %v6732_v17, 5  ;;  %v3678_v45 = vsel %vm12628_vm7, %v3669_v38, %v10407_v20  ;;  %7647 = vmatprep.subr.bf16.mxu1 %v7945_v30  ;;  %v12653_v2 = vld [vmem:[#allocation27_spill] sm:$0xff]  ;;  %v10455_v17 = vpop.f32.mrf.mxu1  ;;  %vm12660_vm6 = vmmov %vm12628_vm7 }
 0x273   : > { %v3743_v61 = vshrl.u32 %v3166_v50, 16  ;;  %v3746_v5 = vshll.u32 %v3166_v50, 16  ;;  %v6749_v8 = vcombine.low %v2498_v9, %v2499_v33  ;;  %v3754_v57 = vrot.slane %v3752_v11, 3  ;;  %v7946_v50 = vld [vmem:[#allocation8 + $0x228] sm:$0xff]   ;;  %12658 = vst [vmem:[#allocation46_spill] sm:$0xff] %v10455_v17  ;;  %5744 = vmatmul.mubr.bf16.vlgmr.msra.gmra.mxu0 %v3678_v45 }
 0x274   : > { %vm12654_vm14 = vcmp.ne.s16.totalorder %v12653_v2, 0  ;;  %vm12657_vm11 = vnez %v12656_v31  ;;  %v3757_v12 = vrot.slane %v3755_v23, 4  ;;  %v3168_v38 = vsel %vm12648_vm13, %v3165_v4, %v3167_v62  ;;  %5751 = vmatprep.mubr.bf16.mxu0 %v12659_v7  ;;  %v10459_v31 = vpop.f32.mrf.mxu0  ;;  %v10467_v45 = vld [vmem:[#allocation2 + $0x38] sm:$0xf] }
 0x275   : > { %v2464_v18 = vsel %vm12654_vm14, %v10436_v24, 0  ;;  %v2465_v52 = vsel %vm12657_vm11, %v10450_v28, 0  ;;  %v3745_v9 = vrot.slane %v3743_v61, 3  ;;  %v3748_v33 = vrot.slane %v3746_v5, 4  ;;  %7648 = vmatpush3.bf16.msra.mxu1 %v7945_v30  ;;  %v10461_v61 = vpop.f32.mrf.mxu1  ;;  %12661 = vst [vmem:[#allocation51_spill] sm:$0xff] %v10467_v45 }
 0x276   : > { %v3806_v11 = vshrl.u32 %v3168_v38, 16  ;;  %v3809_v3 = vshll.u32 %v3168_v38, 16  ;;  %v3815_v24 = vshrl.u32 %v6749_v8, 16  ;;  %v3818_v54 = vshll.u32 %v6749_v8, 16  ;;  %7649 = vmatprep.subr.bf16.mxu1 %v7946_v50  ;;  %v7947_v8 = vld [vmem:[#allocation8 + $0x220] sm:$0xff]  }
 0x277   : > { %v3749_v2 = vor.u32 %v3748_v33, %v3745_v9  ;;  %v6733_v1 = vcombine.low %v2464_v18, %v2465_v52  ;;  %v10465_v23 = vor.u32 %v3757_v12, %v3754_v57  ;;  %v12662_v9 = vld [vmem:[#allocation33_spill] sm:$0xff]  ;;  %v10472_v18 = vpop.f32.mrf.mxu0  ;;  %v12664_v52 = vld [vmem:[#allocation58_spill] sm:$0xff]  ;;  %v12669_v57 = vld [vmem:[#allocation60_spill] sm:$0xff] }
 0x278   : > { %v3808_v14 = vrot.slane %v3806_v11, 3  ;;  %v3811_v25 = vrot.slane %v3809_v3, 4  ;;  %vm12663_vm7 = vcmp.ne.s16.totalorder %v12662_v9, 0  ;;  %vm12665_vm14 = vnez %v12664_v52  ;;  %v10485_v11 = vpop.f32.mrf.mxu1  ;;  %v12671_v9 = vld [vmem:[#allocation61_spill] sm:$0xff] }
 0x279   : > { %v3750_v4 = vsel %vm12660_vm6, %v10400_v53, %v3749_v2  ;;  %v3169_v5 = vrot.slane %v6733_v1, 5  ;;  %v2466_v30 = vsel %vm12663_vm7, %v10467_v45, 0  ;;  %v2500_v33 = vsel %vm12665_vm14, %v10450_v28, 0  ;;  %v12666_v53 = vld [vmem:[#allocation59_spill] sm:$0xff]  ;;  %v10489_v28 = vpop.f32.mrf.mxu0  ;;  %7650 = vmatpush3.bf16.msra.mxu1 %v7946_v50  ;;  %v12679_v50 = vld [vmem:[#allocation40_spill] sm:$0xff]  ;;  %12681 = vst [vmem:[#allocation61_spill] sm:$0xff] %v10504_v10 }
 0x27a   : > { %5590 = vmatprep.mubr.bf16.mxu1 %v3750_v4  ;;  %v3812_v3 = vor.u32 %v3811_v25, %v3808_v14  ;;  %vm12667_vm13 = vnez %v12666_v53  ;;  %v10480_v1 = vld [vmem:[#allocation2 + $0x3c] sm:$0xf]  ;;  %vm12670_vm6 = vnez %v12669_v57  ;;  %v3817_v4 = vrot.slane %v3815_v24, 3  ;;  %12673 = vst [vmem:[#allocation53_spill] sm:$0xff] %v10489_v28  ;;  %v10492_v39 = vpop.f32.mrf.mxu1  ;;  %7651 = vmatprep.subr.bf16.mxu1 %v7947_v8 }
 0x27b   : > { %v2501_v12 = vsel %vm12667_vm13, %v10467_v45, 0  ;;  %12668 = vst [vmem:[#allocation54_spill] sm:$0xff] %v10480_v1  ;;  %v2467_v38 = vsel %vm12670_vm6, %v10480_v1, 0  ;;  %5591 = vmatmul.mubr.bf16.gmra.mxu1 %v12671_v9  ;;  %v3820_v14 = vrot.slane %v3818_v54, 4  ;;  %vm12672_vm7 = vcmask 1042432   ;;  %12675 = vst [vmem:[#allocation62_spill] sm:$0xff] %v10492_v39 }
 0x27c   : > { %v3170_v25 = vsel %vm12672_vm7, %v3167_v62, %v3169_v5  ;;  %v6734_v52 = vcombine.low %v2466_v30, %v2467_v38  ;;  %vm12674_vm14 = vsmask.f32 4352  ;;  %v6750_v9 = vcombine.low %v2500_v33, %v2501_v12  ;;  %v7948_v54 = vld [vmem:[#allocation8 + $0x218] sm:$0xff]   ;;  %v10497_v62 = vpop.f32.mrf.mxu0 }
 0x27d   : > { %v3813_v53 = vsel %vm12674_vm14, %v3749_v2, %v3812_v3  ;;  %v3869_v45 = vshrl.u32 %v3170_v25, 16  ;;  %v3872_v46 = vshll.u32 %v3170_v25, 16  ;;  %vm12676_vm13 = vmmov %vm12674_vm14  ;;  %12677 = vst [vmem:[#allocation58_spill] sm:$0xff] %v10497_v62  ;;  %v10499_v2 = vld [vmem:[#allocation2 + $0x40] sm:$0xf]  ;;  %vm12680_vm7 = vcmp.ne.s16.totalorder %v12679_v50, 0  ;;  %7652 = vmatpush3.bf16.msra.mxu1 %v7947_v8 }
 0x27e   : > { %v3759_v57 = vsel %vm12676_vm13, %v10407_v20, %v10465_v23  ;;  %5598 = vmatprep.mubr.bf16.mxu1 %v3813_v53  ;;  %v3171_v24 = vrot.slane %v6734_v52, 5  ;;  %12678 = vst [vmem:[#allocation59_spill] sm:$0xff] %v10499_v2  ;;  %v2468_v25 = vsel %vm12680_vm7, %v10499_v2, 0  ;;  %v12682_v20 = vld [vmem:[#allocation35_spill] sm:$0xff]  ;;  %v10510_v52 = vor.u32 %v3820_v14, %v3817_v4  ;;  %v12687_v50 = vld [vmem:[#allocation24_spill] sm:$0xff]  ;;  %v10518_v39 = vpop.f32.mrf.mxu0  ;;  %7653 = vmatprep.subr.bf16.mxu1 %v7948_v54 }
 0x27f   : > { %5752 = vmatmul.mubr.bf16.gmra.mxu0 %v3759_v57  ;;  %v3871_v30 = vrot.slane %v3869_v45, 3  ;;  %v3874_v38 = vrot.slane %v3872_v46, 4  ;;  %vm12683_vm14 = vnez %v12682_v20  ;;  %v12684_v12 = vld [vmem:[#allocation63_spill] sm:$0xff]  ;;  %vm12685_vm13 = vcmask 1042432   ;;  %v10513_v45 = vpop.f32.mrf.mxu1 }
 0x280   : > { %v2469_v33 = vsel %vm12683_vm14, %v10504_v10, 0  ;;  %5759 = vmatprep.mubr.bf16.mxu0 %v12684_v12  ;;  %v3172_v57 = vsel %vm12685_vm13, %v3169_v5, %v3171_v24  ;;  %12686 = vst [vmem:[#allocation63_spill] sm:$0xff] %v10513_v45  ;;  %vm12688_vm7 = vnez %v12687_v50  ;;  %v3878_v20 = vshrl.u32 %v6750_v9, 16  ;;  %v7949_v5 = vld [vmem:[#allocation8 + $0x210] sm:$0xff]  }
 0x281   : > { %v3875_v46 = vor.u32 %v3874_v38, %v3871_v30  ;;  %v3932_v53 = vshrl.u32 %v3172_v57, 16  ;;  %v3935_v60 = vshll.u32 %v3172_v57, 16  ;;  %v2502_v43 = vsel %vm12688_vm7, %v10480_v1, 0  ;;  %v10524_v38 = vpop.f32.mrf.mxu0  ;;  %v10527_v1 = vld [vmem:[#allocation2 + $0x48] sm:$0xf]  ;;  %7654 = vmatpush3.bf16.msra.mxu1 %v7948_v54 }
 0x282   : > { %v3881_v42 = vshll.u32 %v6750_v9, 16  ;;  %vm12690_vm14 = vnez %v12689_v29  ;;  %v6735_v14 = vcombine.low %v2468_v25, %v2469_v33  ;;  %vm12691_vm13 = vsmask.f32 4352  ;;  %v12692_v9 = vld [vmem:[#allocation42_spill] sm:$0xff]  ;;  %v10532_v29 = vpop.f32.mrf.mxu1  ;;  %v10537_v33 = vld [vmem:[#allocation2 + $0x4c] sm:$0xf]  ;;  %7655 = vmatprep.subr.bf16.mxu1 %v7949_v5 }
 0x283   : > { %v2503_v4 = vsel %vm12690_vm14, %v10499_v2, 0  ;;  %v3876_v30 = vsel %vm12691_vm13, %v3812_v3, %v3875_v46  ;;  %5599 = vmatmul.mubr.bf16.gmra.mxu1 %v12659_v7  ;;  %v3934_v50 = vrot.slane %v3932_v53, 3  ;;  %v3937_v57 = vrot.slane %v3935_v60, 4  ;;  %vm12694_vm14 = vmmov %vm12691_vm13  ;;  %12695 = vst [vmem:[#allocation24_spill] sm:$0xff] %v10537_v33  ;;  %v12696_v7 = vld [vmem:[#allocation37_spill] sm:$0xff]  ;;  %v10542_v53 = vpop.f32.mrf.mxu0 }
 0x284   : > { %v3173_v8 = vrot.slane %v6735_v14, 5  ;;  %vm12693_vm7 = vcmp.ne.s16.totalorder %v12692_v9, 0  ;;  %v3822_v25 = vsel %vm12694_vm14, %v10465_v23, %v10510_v52  ;;  %5606 = vmatprep.mubr.bf16.mxu1 %v3876_v30  ;;  %v6751_v3 = vcombine.low %v2502_v43, %v2503_v4  ;;  %12698 = vst [vmem:[#allocation28_spill] sm:$0xff] %v10542_v53  ;;  %v10547_v28 = vpop.f32.mrf.mxu1  ;;  %v7951_v23 = vld [vmem:[#allocation8 + $0x208] sm:$0xff]   ;;  %v12701_v4 = vld [vmem:[#allocation38_spill] sm:$0xff] }
 0x285   : > { %v2470_v45 = vsel %vm12693_vm7, %v10527_v1, 0  ;;  %vm12697_vm13 = vnez %v12696_v7  ;;  %v3880_v14 = vrot.slane %v3878_v20, 3  ;;  %v3883_v9 = vrot.slane %v3881_v42, 4  ;;  %v10549_v43 = vpop.f32.mrf.mxu0  ;;  %7656 = vmatpush3.bf16.msra.mxu1 %v7949_v5 }
 0x286   : > { %v2471_v60 = vsel %vm12697_vm13, %v10537_v33, 0  ;;  %vm12699_vm7 = vcmask 1042432   ;;  %12700 = vst [vmem:[#allocation90_spill] sm:$0xff] %v10549_v43  ;;  %v3938_v30 = vor.u32 %v3937_v57, %v3934_v50  ;;  %v10553_v20 = vpop.f32.mrf.mxu1  ;;  %v3941_v42 = vshrl.u32 %v6751_v3, 16  ;;  %v10560_v43 = vld [vmem:[#allocation2 + $0x54] sm:$0xf]  ;;  %7657 = vmatprep.subr.bf16.mxu1 %v7951_v23 }
 0x287   : > { %v3174_v2 = vsel %vm12699_vm7, %v3171_v24, %v3173_v8  ;;  %v10545_v62 = vcombine.low %v2470_v45, %v2471_v60  ;;  %5760 = vmatmul.mubr.bf16.gmra.mxu0 %v3822_v25  ;;  %12702 = vst [vmem:[#allocation38_spill] sm:$0xff] %v10553_v20  ;;  %v3944_v24 = vshll.u32 %v6751_v3, 16  ;;  %v3884_v45 = vor.u32 %v3883_v9, %v3880_v14  ;;  %v10555_v60 = vld [vmem:[#allocation2 + $0x50] sm:$0xf]  ;;  %v12707_v57 = vld [vmem:[#allocation29_spill] sm:$0xff]  ;;  %v10573_v14 = vpop.f32.mrf.mxu0 }
 0x288   : > { %5767 = vmatprep.mubr.bf16.mxu0 %v12701_v4  ;;  %v3995_v7 = vshrl.u32 %v3174_v2, 16  ;;  %v3998_v54 = vshll.u32 %v3174_v2, 16  ;;  %12703 = vst [vmem:[#allocation91_spill] sm:$0xff] %v10555_v60  ;;  %vm12704_vm14 = vcmp.ne.s16.totalorder %v12454_v22, 0  ;;  %vm12705_vm7 = vnez %v12458_v44  ;;  %v10565_v50 = vpop.f32.mrf.mxu1  ;;  %v12709_v9 = vld [vmem:[#allocation34_spill] sm:$0xff] }
 0x289   : > { %v3175_v53 = vrot.slane %v10545_v62, 5  ;;  %v2472_v25 = vsel %vm12704_vm14, %v10555_v60, 0  ;;  %v2473_v2 = vsel %vm12705_vm7, %v10560_v43, 0  ;;  %12706 = vst [vmem:[#allocation92_spill] sm:$0xff] %v10565_v50  ;;  %v7953_v62 = vld [vmem:[#allocation8 + $0x200] sm:$0xff]   ;;  %vm12708_vm13 = vnez %v12707_v57  ;;  %v10580_v57 = vpop.f32.mrf.mxu0  ;;  %7658 = vmatpush3.bf16.msra.mxu1 %v7951_v23 }
 0x28a   : > { %v2504_v5 = vsel %vm12708_vm13, %v10504_v10, 0  ;;  %vm12710_vm6 = vnez %v12709_v9  ;;  %vm12711_vm14 = vsmask.f32 4352  ;;  %v3997_v44 = vrot.slane %v3995_v7, 3  ;;  %v10582_v10 = vpop.f32.mrf.mxu1  ;;  %7659 = vmatprep.subr.bf16.mxu1 %v7953_v62 }
 0x28b   : > { %v2505_v3 = vsel %vm12710_vm6, %v10527_v1, 0  ;;  %5607 = vmatmul.mubr.bf16.gmra.mxu1 %v12684_v12  ;;  %v3939_v22 = vsel %vm12711_vm14, %v3875_v46, %v3938_v30  ;;  %v4000_v20 = vrot.slane %v3998_v54, 4  ;;  %vm12712_vm7 = vcmask 1042432   ;;  %vm12713_vm6 = vmmov %vm12711_vm14  ;;  %v10586_v54 = vpop.f32.mrf.mxu0 }
 0x28c   : > { %v3176_v50 = vsel %vm12712_vm7, %v3173_v8, %v3175_v53  ;;  %5614 = vmatprep.mubr.bf16.mxu1 %v3939_v22  ;;  %v3943_v59 = vrot.slane %v3941_v42, 3  ;;  %v3946_v36 = vrot.slane %v3944_v24, 4  ;;  %v10578_v17 = vcombine.low %v2472_v25, %v2473_v2  ;;  %v10588_v22 = vpop.f32.mrf.mxu1  ;;  %v12714_v24 = vld [vmem:[#allocation30_spill] sm:$0xff]  ;;  %v12716_v25 = vld [vmem:[#allocation36_spill] sm:$0xff] }
 0x28d   : > { %v3885_v9 = vsel %vm12713_vm6, %v10510_v52, %v3884_v45  ;;  %v6752_v12 = vcombine.low %v2504_v5, %v2505_v3  ;;  %v4058_v46 = vshrl.u32 %v3176_v50, 16  ;;  %v4061_v7 = vshll.u32 %v3176_v50, 16  ;;  %7660 = vmatpush3.bf16.msra.mxu1 %v7953_v62  ;;  %v10614_v62 = vpop.f32.mrf.mxu0 }
 0x28e   : > { %v4001_v8 = vor.u32 %v4000_v20, %v3997_v44  ;;  %v3947_v42 = vor.u32 %v3946_v36, %v3943_v59  ;;  %vm12715_vm13 = vnez %v12714_v24  ;;  %vm12717_vm7 = vnez %v12716_v25  ;;  %v10598_v5 = vpop.f32.mrf.mxu1  ;;  %v10605_v36 = vld [vmem:[#allocation2 + $0x5c] sm:$0xf] }
 0x28f   : > { %5768 = vmatmul.mubr.bf16.gmra.mxu0 %v3885_v9  ;;  %v2506_v23 = vsel %vm12715_vm13, %v10537_v33, 0  ;;  %v2507_v52 = vsel %vm12717_vm7, %v10555_v60, 0  ;;  %v3177_v2 = vrot.slane %v10578_v17, 5  ;;  %v4004_v50 = vshrl.u32 %v6752_v12, 16  ;;  %v10600_v9 = vld [vmem:[#allocation2 + $0x58] sm:$0xf] }
 0x290   : > { %5775 = vmatprep.mubr.bf16.mxu0 %v9716_v51  ;;  %v4007_v3 = vshll.u32 %v6752_v12, 16  ;;  %12718 = vst [vmem:[#allocation29_spill] sm:$0xff] %v10600_v9  ;;  %vm12719_vm14 = vcmp.ne.s16.totalorder %v12471_v16, 0  ;;  %12720 = vst [vmem:[#allocation34_spill] sm:$0xff] %v10605_v36  ;;  %vm12721_vm6 = vnez %v12479_v49  ;;  %v4060_v20 = vrot.slane %v4058_v46, 3  ;;  %v10618_v25 = vpop.f32.mrf.mxu1 }
 0x291   : > { %v2474_v44 = vsel %vm12719_vm14, %v10600_v9, 0  ;;  %v2475_v59 = vsel %vm12721_vm6, %v10605_v36, 0  ;;  %v4063_v24 = vrot.slane %v4061_v7, 4  ;;  %v10612_v17 = vadd.f32 %v10389_v21, %v10381_v6 }
 0x292   : > { %vm12723_vm13 = vsmask.f32 4352  ;;  %v6753_v16 = vcombine.low %v2506_v23, %v2507_v52  ;;  %vm12724_vm7 = vcmask 1042432   ;;  %v10621_v49 = vcombine.low %v2474_v44, %v2475_v59  ;;  %v10634_v23 = vpop.f32.mrf.mxu0 }
 0x293   : > { %12722 = vst [vmem:[#allocation30_spill] sm:$0xff] %v10612_v17  ;;  %5615 = vmatmul.mubr.bf16.gmra.mxu1 %v12701_v4  ;;  %v4002_v12 = vsel %vm12723_vm13, %v3938_v30, %v4001_v8  ;;  %v3178_v60 = vsel %vm12724_vm7, %v3175_v53, %v3177_v2  ;;  %vm12725_vm14 = vmmov %vm12723_vm13  ;;  %v4006_v7 = vrot.slane %v4004_v50, 3  ;;  %v4009_v33 = vrot.slane %v4007_v3, 4  ;;  %v12726_v4 = vld [vmem:[#allocation31_spill] sm:$0xff]  ;;  %v10637_v50 = vld [vmem:[#allocation2 + $0x60] sm:$0xf] }
 0x294   : > { %5622 = vmatprep.mubr.bf16.mxu1 %v4002_v12  ;;  %v3948_v46 = vsel %vm12725_vm14, %v3884_v45, %v3947_v42  ;;  %v10626_v6 = vadd.f32 %v10426_v63, %v10405_v40  ;;  %v4064_v21 = vor.u32 %v4063_v24, %v4060_v20  ;;  %vm12727_vm13 = vnez %v12726_v4  ;;  %v10642_v63 = vld [vmem:[#allocation2 + $0x64] sm:$0xf]  ;;  %v10650_v24 = vpop.f32.mrf.mxu0 }
 0x295   : > { %v2508_v30 = vsel %vm12727_vm13, %v10560_v43, 0  ;;  %vm12728_vm6 = vnez %v12447_v19  ;;  %v4121_v45 = vshrl.u32 %v3178_v60, 16  ;;  %v4124_v52 = vshll.u32 %v3178_v60, 16  ;;  %12729 = vst [vmem:[#allocation36_spill] sm:$0xff] %v10637_v50  ;;  %12731 = vst [vmem:[#allocation31_spill] sm:$0xff] %v10642_v63  ;;  %v10647_v19 = vpop.f32.mrf.mxu1 }
 0x296   : > { %v2509_v53 = vsel %vm12728_vm6, %v10600_v9, 0  ;;  %vm12730_vm7 = vcmp.ne.s16.totalorder %v8999_v37, 0  ;;  %v2477_v3 = vsel %vm9811_vm2, %v10642_v63, 0  ;;  %v4067_v44 = vshrl.u32 %v6753_v16, 16  ;;  %v10660_v13 = vpop.f32.mrf.mxu0  ;;  %vm12733_vm6 = vmmov %vm12725_vm14 }
 0x297   : > { %5776 = vmatmul.mubr.bf16.gmra.mxu0 %v3948_v46  ;;  %v2476_v40 = vsel %vm12730_vm7, %v10637_v50, 0  ;;  %v4070_v59 = vshll.u32 %v6753_v16, 16  ;;  %v3179_v20 = vrot.slane %v10621_v49, 5  ;;  %v4010_v60 = vor.u32 %v4009_v33, %v4006_v7  ;;  %v10656_v46 = vpop.f32.mrf.mxu1  ;;  %vm12735_vm13 = vmmov %vm12733_vm6 }
 0x298   : > { %5783 = vmatprep.mubr.bf16.mxu0 %v9796_v27  ;;  %v10654_v12 = vadd.f32 %v10472_v18, %v10459_v31  ;;  %v6754_v4 = vcombine.low %v2508_v30, %v2509_v53  ;;  %v10658_v17 = vcombine.low %v2476_v40, %v2477_v3  ;;  %v4065_v16 = vsel %vm12733_vm6, %v4001_v8, %v4064_v21  ;;  %v10671_v30 = vpop.f32.mrf.mxu0 }
 0x299   : > { %v4123_v37 = vrot.slane %v4121_v45, 3  ;;  %v4126_v49 = vrot.slane %v4124_v52, 4  ;;  %v10664_v9 = vpop.f32.mrf.mxu1  ;;  %v4069_v33 = vrot.slane %v4067_v44, 3  ;;  %v4072_v7 = vrot.slane %v4070_v59, 4  ;;  %v10693_v59 = vld [vmem:[#allocation2 + $0x68] sm:$0xf] }
 0x29a   : > { %12732 = vst [vmem:[#allocation93_spill] sm:$0xff] %v10654_v12  ;;  %vm12734_vm14 = vcmask 1042432   ;;  %v10669_v18 = vadd.f32 %v10485_v11, %v10461_v61  ;;  %v4011_v53 = vsel %vm12735_vm13, %v3947_v42, %v4010_v60  ;;  %vm12736_vm7 = vnez %v12463_v58  ;;  %v10688_v44 = vpop.f32.mrf.mxu0  ;;  %12739 = vst [vmem:[#allocation95_spill] sm:$0xff] %v10693_v59 }
 0x29b   : > { %5623 = vmatmul.mubr.bf16.gmra.mxu1 %v9716_v51  ;;  %v3180_v31 = vsel %vm12734_vm14, %v3177_v2, %v3179_v20  ;;  %v2510_v51 = vsel %vm12736_vm7, %v10605_v36, 0  ;;  %v4130_v8 = vshrl.u32 %v6754_v4, 16  ;;  %v4133_v45 = vshll.u32 %v6754_v4, 16  ;;  %v10686_v58 = vpop.f32.mrf.mxu1  ;;  %v12740_v4 = vld [vmem:[#allocation41_spill] sm:$0xff]  ;;  %v10896_v36 = vld [vmem:[#allocation2 + $0x94] sm:$0xf] }
 0x29c   : > { %5630 = vmatprep.mubr.bf16.mxu1 %v4065_v16  ;;  %v2511_v52 = vsel %vm9667_vm0, %v10637_v50, 0  ;;  %v12192_v2 = vrot.slane %v10658_v17, 5  ;;  %v4127_v61 = vor.u32 %v4126_v49, %v4123_v37  ;;  %v4184_v11 = vshrl.u32 %v3180_v31, 16 }
 0x29d   : > { %v4187_v40 = vshll.u32 %v3180_v31, 16  ;;  %v10684_v42 = vadd.f32 %v10524_v38, %v10518_v39  ;;  %v4073_v3 = vor.u32 %v4072_v7, %v4069_v33  ;;  %vm12738_vm6 = vnez %v12487_v48  ;;  %v10701_v38 = vld [vmem:[#allocation2 + $0x6c] sm:$0xf]  ;;  %v10709_v31 = vpop.f32.mrf.mxu0 }
 0x29e   : > { %v2512_v15 = vsel %vm12738_vm6, %v10642_v63, 0  ;;  %vm12741_vm0 = vnez %v12740_v4  ;;  %vm12742_vm14 = vcmp.ne.s16.totalorder %v9189_v47, 0  ;;  %12743 = vst [vmem:[#allocation41_spill] sm:$0xff] %v10701_v38  ;;  %vm12744_vm13 = vnez %v12525_v55  ;;  %v10717_v55 = vpop.f32.mrf.mxu1  ;;  %v12778_v47 = vld [vmem:[#allocation50_spill] sm:$0xff] }
 0x29f   : > { %5784 = vmatmul.mubr.bf16.gmra.mxu0 %v4011_v53  ;;  %12737 = vst [vmem:[#allocation94_spill] sm:$0xff] %v10684_v42  ;;  %v2513_v37 = vsel %vm12741_vm0, %v10693_v59, 0  ;;  %v2478_v39 = vsel %vm12742_vm14, %v10693_v59, 0  ;;  %v2479_v16 = vsel %vm12744_vm13, %v10701_v38, 0  ;;  %v4132_v49 = vrot.slane %v4130_v8, 3 }
 0x2a0   : > { %5791 = vmatprep.mubr.bf16.mxu0 %v9884_v0  ;;  %v4135_v33 = vrot.slane %v4133_v45, 4  ;;  %v6755_v48 = vcombine.low %v2510_v51, %v2511_v52  ;;  %vm12745_vm7 = vcmask 1042432   ;;  %vm12746_vm6 = vsmask.f32 4352  ;;  %v10872_v59 = vld [vmem:[#allocation2 + $0x84] sm:$0xf] }
 0x2a1   : > { %v3182_v7 = vsel %vm12745_vm7, %v3179_v20, %v12192_v2  ;;  %v4128_v53 = vsel %vm12746_vm6, %v4064_v21, %v4127_v61  ;;  %v4186_v4 = vrot.slane %v4184_v11, 3  ;;  %v4189_v42 = vrot.slane %v4187_v40, 4  ;;  %vm12747_vm0 = vmmov %vm12746_vm6  ;;  %v10722_v2 = vpop.f32.mrf.mxu0 }
 0x2a2   : > { %v10715_v12 = vadd.f32 %v10547_v28, %v10532_v29  ;;  %v6756_v51 = vcombine.low %v2512_v15, %v2513_v37  ;;  %v10719_v8 = vcombine.low %v2478_v39, %v2479_v16  ;;  %v4074_v20 = vsel %vm12747_vm0, %v4010_v60, %v4073_v3  ;;  %v10736_v39 = vld [vmem:[#allocation2 + $0x70] sm:$0xf]  ;;  %v12750_v16 = vld [vmem:[#allocation67_spill] sm:$0xff] }
 0x2a3   : > { %5631 = vmatmul.mubr.bf16.gmra.mxu1 %v9796_v27  ;;  %v4247_v45 = vshrl.u32 %v3182_v7, 16  ;;  %v4250_v52 = vshll.u32 %v3182_v7, 16  ;;  %v10724_v27 = vpop.f32.mrf.mxu1  ;;  %v10728_v21 = vadd.f32 %v10580_v57, %v10573_v14  ;;  %v10731_v28 = vor.u32 %v4135_v33, %v4132_v49  ;;  %12749 = vst [vmem:[#allocation97_spill] sm:$0xff] %v10736_v39  ;;  %v10741_v14 = vld [vmem:[#allocation2 + $0x74] sm:$0xf]  ;;  %v12753_v57 = vld [vmem:[#allocation69_spill] sm:$0xff] }
 0x2a4   : > { %5638 = vmatprep.mubr.bf16.mxu1 %v4128_v53  ;;  %v4190_v29 = vor.u32 %v4189_v42, %v4186_v4  ;;  %v4193_v11 = vshrl.u32 %v6755_v48, 16  ;;  %v4196_v40 = vshll.u32 %v6755_v48, 16  ;;  %v4256_v60 = vshrl.u32 %v6756_v51, 16  ;;  %12752 = vst [vmem:[#allocation98_spill] sm:$0xff] %v10741_v14  ;;  %v10750_v4 = vpop.f32.mrf.mxu0 }
 0x2a5   : > { %12748 = vst [vmem:[#allocation96_spill] sm:$0xff] %v10728_v21  ;;  %v10733_v15 = vpop.f32.mrf.mxu1  ;;  %v3183_v37 = vrot.slane %v10719_v8, 5  ;;  %vm12751_vm14 = vcmp.ne.s16.totalorder %v12750_v16, 0  ;;  %vm12754_vm7 = vnez %v12753_v57  ;;  %v4249_v42 = vrot.slane %v4247_v45, 3  ;;  %v12758_v57 = vld [vmem:[#allocation65_spill] sm:$0xff] }
 0x2a6   : > { %v2480_v7 = vsel %vm12751_vm14, %v10736_v39, 0  ;;  %v2481_v49 = vsel %vm12754_vm7, %v10741_v14, 0  ;;  %v4252_v33 = vrot.slane %v4250_v52, 4  ;;  %v4259_v48 = vshll.u32 %v6756_v51, 16 }
 0x2a7   : > { %5792 = vmatmul.mubr.bf16.gmra.mxu0 %v4074_v20  ;;  %v10748_v53 = vadd.f32 %v10588_v22, %v10582_v10  ;;  %vm12755_vm6 = vcmp.ne.s16.totalorder %v12629_v26, 0  ;;  %v12756_v20 = vld [vmem:[#allocation64_spill] sm:$0xff]  ;;  %vm12759_vm14 = vnez %v12758_v57  ;;  %v10761_v52 = vpop.f32.mrf.mxu1  ;;  %v2531_v10 = vsel %vm12633_vm12, %v10421_v41, 0 }
 0x2a8   : > { %5799 = vmatprep.mubr.bf16.mxu0 %v9923_v35  ;;  %v2530_v8 = vsel %vm12755_vm6, %v10409_v56, 0  ;;  %vm12757_vm0 = vnez %v12756_v20  ;;  %v2515_v45 = vsel %vm12759_vm14, %v10736_v39, 0  ;;  %vm12760_vm7 = vsmask.f32 4352  ;;  %v10775_v57 = vld [vmem:[%s11969_s4] ss:$0 sm:$0xff] }
 0x2a9   : > { %v2514_v21 = vsel %vm12757_vm0, %v10701_v38, 0  ;;  %v4191_v22 = vsel %vm12760_vm7, %v4127_v61, %v4190_v29  ;;  %v4195_v26 = vrot.slane %v4193_v11, 3  ;;  %v10768_v56 = vcombine.low %v2480_v7, %v2481_v49  ;;  %vm12761_vm6 = vmmov %vm12760_vm7  ;;  %v10790_v49 = vpop.f32.mrf.mxu1  ;;  %v12780_v39 = vld [vmem:[#allocation66_spill] sm:$0xff] }
 0x2aa   : > { %v4137_v51 = vsel %vm12761_vm6, %v4073_v3, %v10731_v28  ;;  %v4198_v20 = vrot.slane %v4196_v40, 4  ;;  %v4258_v16 = vrot.slane %v4256_v60, 3  ;;  %v12762_v34 = vrot.slane %v10658_v17, 5  ;;  %v10786_v3 = vpop.f32.mrf.mxu0  ;;  %v12765_v60 = vld [vmem:[#allocation16_spill] sm:$0xff]  ;;  %vm12774_vm14 = vmmov %vm12761_vm6 }
 0x2ab   : > { %5639 = vmatmul.mubr.bf16.gmra.mxu1 %v9884_v0  ;;  %vm12763_vm12 = vcmask 1042432   ;;  %v10780_v41 = vor.u32 %v4252_v33, %v4249_v42  ;;  %v4261_v61 = vrot.slane %v4259_v48, 4  ;;  %v6757_v11 = vcombine.low %v2514_v21, %v2515_v45  ;;  %v10802_v45 = vld [vmem:[#allocation2 + $0x78] sm:$0xf] }
 0x2ac   : > { %5646 = vmatprep.mubr.bf16.mxu1 %v4191_v22  ;;  %v3184_v0 = vsel %vm12763_vm12, %v12762_v34, %v3183_v37  ;;  %v10784_v7 = vadd.f32 %v10650_v24, %v10634_v23  ;;  %v10788_v40 = vcombine.low %v2530_v8, %v2531_v10  ;;  %v10795_v17 = vadd.f32 %v10626_v6, %v10775_v57  ;;  %v10798_v48 = vpop.f32.mrf.mxu0  ;;  %v12767_v24 = vld [vmem:[#allocation46_spill] sm:$0xff]  ;;  %v12776_v21 = vld [vmem:[#allocation23_spill] sm:$0xff] }
 0x2ad   : > { %v4310_v42 = vshrl.u32 %v3184_v0, 16  ;;  %v4313_v33 = vshll.u32 %v3184_v0, 16  ;;  %v4199_v23 = vor.u32 %v4198_v20, %v4195_v26  ;;  %v7122_v8 = vadd.f32 %v12767_v24, %v10441_v32  ;;  %12768 = vst [vmem:[#allocation16_spill] sm:$0xff] %v10802_v45  ;;  %v12769_v10 = vld [vmem:[#allocation70_spill] sm:$0xff]  ;;  %v10812_v0 = vpop.f32.mrf.mxu1  ;;  %v12775_v20 = vld [vmem:[#allocation21_spill] sm:$0xff] }
 0x2ae   : > { %12764 = vst [vmem:[#allocation64_spill] sm:$0xff] %v10784_v7  ;;  %12766 = vst [vmem:[#allocation65_spill] sm:$0xff] %v10795_v17  ;;  %vm12770_vm7 = vcmp.ne.s16.totalorder %v12769_v10, 0  ;;  %v12772_v6 = vld [vmem:[#allocation74_spill] sm:$0xff]  ;;  %v4254_v26 = vsel %vm12774_vm14, %v4190_v29, %v10780_v41  ;;  %v10818_v32 = vadd.f32 %v12776_v21, %v12775_v20  ;;  %v10820_v24 = vor.u32 %v4261_v61, %v4258_v16  ;;  %v10822_v10 = vpop.f32.mrf.mxu0 }
 0x2af   : > { %5800 = vmatmul.mubr.bf16.gmra.mxu0 %v4137_v51  ;;  %v2482_v22 = vsel %vm12770_vm7, %v10802_v45, 0  ;;  %v10807_v51 = vld [vmem:[#allocation2 + $0x7c] sm:$0xf]  ;;  %vm12773_vm0 = vnez %v12772_v6  ;;  %v4319_v7 = vshrl.u32 %v6757_v11, 16  ;;  %v4322_v17 = vshll.u32 %v6757_v11, 16 }
 0x2b0   : > { %5807 = vmatprep.mubr.bf16.mxu0 %v12765_v60  ;;  %12771 = vst [vmem:[#allocation46_spill] sm:$0xff] %v10807_v51  ;;  %v2483_v34 = vsel %vm12773_vm0, %v10807_v51, 0  ;;  %12777 = vst [vmem:[#allocation21_spill] sm:$0xff] %v10818_v32  ;;  %vm12779_vm6 = vnez %v12778_v47  ;;  %vm12781_vm12 = vnez %v12780_v39  ;;  %v10832_v29 = vadd.f32 %v10656_v46, %v10647_v19  ;;  %v12785_v32 = vld [vmem:[#allocation53_spill] sm:$0xff]  ;;  %v12786_v19 = vld [vmem:[#allocation58_spill] sm:$0xff] }
 0x2b1   : > { %v2516_v6 = vsel %vm12779_vm6, %v10741_v14, 0  ;;  %v2517_v38 = vsel %vm12781_vm12, %v10802_v45, 0  ;;  %v4312_v16 = vrot.slane %v4310_v42, 3  ;;  %v4315_v61 = vrot.slane %v4313_v33, 4  ;;  %v12789_v42 = vld [vmem:[#allocation82_spill] sm:$0xff]  ;;  %v10851_v45 = vpop.f32.mrf.mxu0  ;;  %v10853_v14 = vpop.f32.mrf.mxu1  ;;  %vm12792_vm6 = vmmov %vm12774_vm14 }
 0x2b2   : > { %v12782_v21 = vrot.slane %v10768_v56, 5  ;;  %vm12783_vm7 = vcmask 1042432   ;;  %v10838_v20 = vcombine.low %v2482_v22, %v2483_v34  ;;  %v4200_v47 = vsel %vm12774_vm14, %v10731_v28, %v4199_v23  ;;  %12790 = vst [vmem:[#allocation66_spill] sm:$0xff] %v10851_v45  ;;  %12791 = vst [vmem:[#allocation53_spill] sm:$0xff] %v10853_v14  ;;  %v12795_v22 = vld [vmem:[#allocation63_spill] sm:$0xff] }
 0x2b3   : > { %5647 = vmatmul.mubr.bf16.gmra.mxu1 %v9923_v35  ;;  %v10843_v39 = vadd.f32 %v7122_v8, %v10775_v57  ;;  %v10847_v46 = vadd.f32 %v12786_v19, %v12785_v32  ;;  %v12788_v35 = vld [vmem:[#allocation86_spill] sm:$0xff]  ;;  %v10859_v28 = vadd.f32 %v10669_v18, %v10775_v57  ;;  %v4321_v32 = vrot.slane %v4319_v7, 3  ;;  %v12798_v18 = vld [vmem:[#allocation77_spill] sm:$0xff]  ;;  %12800 = vst [vmem:[#allocation82_spill] sm:$0xff] %v10872_v59 }
 0x2b4   : > { %v3186_v11 = vsel %vm12783_vm7, %v3183_v37, %v12782_v21  ;;  %5654 = vmatprep.mubr.bf16.mxu1 %v4254_v26  ;;  %v6728_v33 = vcombine.low %v12789_v42, %v12788_v35  ;;  %v4263_v37 = vsel %vm12792_vm6, %v4199_v23, %v10820_v24  ;;  %v12794_v8 = vld [vmem:[#allocation62_spill] sm:$0xff]  ;;  %v6758_v26 = vcombine.low %v2516_v6, %v2517_v38  ;;  %v12796_v42 = vld [vmem:[#allocation68_spill] sm:$0xff] }
 0x2b5   : > { %12784 = vst [vmem:[#allocation23_spill] sm:$0xff] %v10843_v39  ;;  %12787 = vst [vmem:[#allocation50_spill] sm:$0xff] %v10847_v46  ;;  %v7128_v34 = vadd.f32 %v12795_v22, %v12794_v8  ;;  %v4324_v21 = vrot.slane %v4322_v17, 4  ;;  %v4373_v19 = vshrl.u32 %v3186_v11, 16  ;;  %v4376_v35 = vshll.u32 %v3186_v11, 16  ;;  %v12802_v17 = vld [vmem:[#allocation71_spill] sm:$0xff]  ;;  %v10883_v8 = vpop.f32.mrf.mxu0  ;;  %v10885_v22 = vpop.f32.mrf.mxu1 }
 0x2b6   : > { %12793 = vst [vmem:[#allocation58_spill] sm:$0xff] %v10859_v28  ;;  %v10864_v46 = vor.u32 %v4315_v61, %v4312_v16  ;;  %v10867_v23 = vld [vmem:[#allocation2 + $0x80] sm:$0xf]  ;;  %vm12799_vm12 = vcmp.ne.s16.totalorder %v12798_v18, 0  ;;  %v2485_v7 = vsel %vm10240_vm8, %v10872_v59, 0  ;;  %vm12803_vm7 = vnez %v12802_v17  ;;  %12806 = vst [vmem:[#allocation62_spill] sm:$0xff] %v10885_v22 }
 0x2b7   : > { %5808 = vmatmul.mubr.bf16.gmra.mxu0 %v4200_v47  ;;  %12797 = vst [vmem:[#allocation86_spill] sm:$0xff] %v10867_v23  ;;  %v2484_v28 = vsel %vm12799_vm12, %v10867_v23, 0  ;;  %v2518_v6 = vsel %vm12803_vm7, %v10807_v51, 0  ;;  %v12804_v16 = vld [vmem:[#allocation72_spill] sm:$0xff]  ;;  %v3071_v11 = vshrl.u32 %v6728_v33, 16  ;;  %v3074_v47 = vshll.u32 %v6728_v33, 16  ;;  %v10902_v22 = vpop.f32.mrf.mxu0 }
 0x2b8   : > { %5815 = vmatprep.mubr.bf16.mxu0 %v12796_v42  ;;  %vm12805_vm14 = vnez %v12804_v16  ;;  %v10888_v39 = vadd.f32 %v7128_v34, %v10775_v57  ;;  %v12808_v18 = vld [vmem:[#allocation28_spill] sm:$0xff]  ;;  %v12809_v38 = vld [vmem:[#allocation90_spill] sm:$0xff]  ;;  %v4382_v50 = vshrl.u32 %v6758_v26, 16  ;;  %v4385_v17 = vshll.u32 %v6758_v26, 16  ;;  %12812 = vst [vmem:[#allocation72_spill] sm:$0xff] %v10896_v36 }
 0x2b9   : > { %v2519_v61 = vsel %vm12805_vm14, %v10867_v23, 0  ;;  %v10892_v63 = vadd.f32 %v12809_v38, %v12808_v18  ;;  %v10894_v51 = vld [vmem:[#allocation2 + $0x90] sm:$0xf]  ;;  %v10898_v16 = vor.u32 %v4324_v21, %v4321_v32  ;;  %v4375_v33 = vrot.slane %v4373_v19, 3  ;;  %vm12827_vm14 = vmmov %vm12792_vm6 }
 0x2ba   : > { %12807 = vst [vmem:[#allocation63_spill] sm:$0xff] %v10888_v39  ;;  %12811 = vst [vmem:[#allocation71_spill] sm:$0xff] %v10894_v51  ;;  %v4378_v23 = vrot.slane %v4376_v35, 4  ;;  %v10900_v14 = vcombine.low %v2484_v28, %v2485_v7  ;;  %v4317_v34 = vsel %vm12792_vm6, %v10780_v41, %v10864_v46  ;;  %v12813_v26 = vrot.slane %v10838_v20, 5  ;;  %v10923_v35 = vpop.f32.mrf.mxu1 }
 0x2bb   : > { %12810 = vst [vmem:[#allocation68_spill] sm:$0xff] %v10892_v63  ;;  %5655 = vmatmul.mubr.bf16.gmra.mxu1 %v12765_v60  ;;  %v12814_v18 = vrot.slane %v10768_v56, 5  ;;  %vm12815_vm12 = vcmask 1042432   ;;  %v6759_v32 = vcombine.low %v2518_v6, %v2519_v61  ;;  %v10915_v21 = vadd.f32 %v10709_v31, %v10688_v44  ;;  %v10925_v56 = vpop.f32.mrf.mxu0  ;;  %v12819_v6 = vld [vmem:[#allocation38_spill] sm:$0xff]  ;;  %v12820_v61 = vld [vmem:[#allocation92_spill] sm:$0xff] }
 0x2bc   : > { %5662 = vmatprep.mubr.bf16.mxu1 %v4317_v34  ;;  %v3073_v28 = vrot.slane %v3071_v11, 4  ;;  %v3076_v19 = vrot.slane %v3074_v47, 5  ;;  %v6763_v60 = vcombine.low %v10894_v51, %v10896_v36  ;;  %v10921_v41 = vadd.f32 %v10724_v27, %v10717_v55  ;;  %12817 = vst [vmem:[#allocation90_spill] sm:$0xff] %v10925_v56  ;;  %v10936_v27 = vpop.f32.mrf.mxu1 }
 0x2bd   : > { %v3188_v38 = vsel %vm12815_vm12, %v12814_v18, %v12813_v26  ;;  %12816 = vst [vmem:[#allocation28_spill] sm:$0xff] %v10915_v21  ;;  %v10929_v7 = vadd.f32 %v10715_v12, %v10775_v57  ;;  %v4384_v44 = vrot.slane %v4382_v50, 3  ;;  %v4387_v31 = vrot.slane %v4385_v17, 4  ;;  %v12821_v18 = vld [vmem:[#allocation73_spill] sm:$0xff]  ;;  %v12823_v50 = vld [vmem:[#allocation84_spill] sm:$0xff]  ;;  %v10954_v55 = vpop.f32.mrf.mxu0 }
 0x2be   : > { %v7134_v11 = vadd.f32 %v12820_v61, %v12819_v6  ;;  %v10933_v47 = vor.u32 %v4378_v23, %v4375_v33  ;;  %v4436_v34 = vshrl.u32 %v3188_v38, 16  ;;  %v4439_v26 = vshll.u32 %v3188_v38, 16  ;;  %v10939_v12 = vld [vmem:[#allocation2 + $0x88] sm:$0xf]  ;;  %v10944_v6 = vld [vmem:[#allocation2 + $0x8c] sm:$0xf] }
 0x2bf   : > { %12818 = vst [vmem:[#allocation99_spill] sm:$0xff] %v10929_v7  ;;  %5816 = vmatmul.mubr.bf16.gmra.mxu0 %v4263_v37  ;;  %v4445_v21 = vshrl.u32 %v6759_v32, 16  ;;  %v4448_v63 = vshll.u32 %v6759_v32, 16  ;;  %12822 = vst [vmem:[#allocation38_spill] sm:$0xff] %v10939_v12  ;;  %vm12824_vm7 = vcmp.ne.s16.totalorder %v12823_v50, 0  ;;  %v2487_v23 = vsel %vm10326_vm15, %v10944_v6, 0  ;;  %v10956_v7 = vpop.f32.mrf.mxu1 }
 0x2c0   : > { %5823 = vmatprep.mubr.bf16.mxu0 %v12821_v18  ;;  %v2486_v17 = vsel %vm12824_vm7, %v10939_v12, 0  ;;  %12825 = vst [vmem:[#allocation92_spill] sm:$0xff] %v10944_v6  ;;  %v4326_v33 = vsel %vm12827_vm14, %v10820_v24, %v10898_v16  ;;  %v10952_v38 = vor.u32 %v3076_v19, %v3073_v28  ;;  %v3284_v61 = vshrl.u32 %v6763_v60, 16  ;;  %12828 = vst [vmem:[#allocation73_spill] sm:$0xff] %v10956_v7  ;;  %v2455_v7 = vld [vmem:[#allocation2 + $0x90] sm:$0x1] }
 0x2c1   : > { %v3287_v32 = vshll.u32 %v6763_v60, 16  ;;  %v10959_v50 = vadd.f32 %v7134_v11, %v10775_v57  ;;  %v2520_v37 = vsel %vm10162_vm5, %v10872_v59, 0  ;;  %v2521_v45 = vsel %vm10189_vm3, %v10939_v12, 0  ;;  %v10981_v59 = vpop.f32.mrf.mxu1  ;;  %vm12838_vm3 = vmmov %vm12792_vm6 }
 0x2c2   : > { %v10969_v24 = vadd.f32 %v10798_v48, %v10786_v3  ;;  %v4380_v28 = vsel %vm12792_vm6, %v10864_v46, %v10933_v47  ;;  %v4388_v19 = vor.u32 %v4387_v31, %v4384_v44  ;;  %v12833_v60 = vrot.slane %v10900_v14, 5  ;;  %v12835_v46 = vld [vmem:[#allocation81_spill] sm:$0xff]  ;;  %vm12847_vm6 = vmmov %vm12815_vm12 }
 0x2c3   : > { %12829 = vst [vmem:[#allocation100_spill] sm:$0xff] %v10959_v50  ;;  %v12834_v11 = vrot.slane %v10838_v20, 5  ;;  %v10979_v50 = vcombine.low %v2486_v17, %v2487_v23  ;;  %5663 = vmatmul.mubr.bf16.gmra.mxu1 %v12796_v42  ;;  %v4438_v56 = vrot.slane %v4436_v34, 3  ;;  %v4441_v3 = vrot.slane %v4439_v26, 4  ;;  %v7954_v23 = vld [vmem:[#allocation9 + $0x38] sm:$0xff]  }
 0x2c4   : > { %12832 = vst [vmem:[#allocation75_spill] sm:$0xff] %v10969_v24  ;;  %v4447_v48 = vrot.slane %v4445_v21, 3  ;;  %v4450_v24 = vrot.slane %v4448_v63, 4  ;;  %5670 = vmatprep.mubr.bf16.mxu1 %v4380_v28  ;;  %vm12836_vm5 = vsmask.f32 3328  ;;  %v6760_v31 = vcombine.low %v2520_v37, %v2521_v45  ;;  %v10997_v21 = vpop.f32.mrf.mxu1  ;;  %7693 = vmatprep.subr.bf16.mxu0 %v7954_v23 }
 0x2c5   : > { %v3190_v39 = vsel %vm12815_vm12, %v12834_v11, %v12833_v60  ;;  %v3078_v44 = vsel %vm12836_vm5, %v12835_v46, %v10952_v38  ;;  %v3286_v12 = vrot.slane %v3284_v61, 4  ;;  %v3289_v20 = vrot.slane %v3287_v32, 5  ;;  %v10987_v60 = vpop.f32.mrf.mxu0  ;;  %v12839_v61 = vld [vmem:[#allocation78_spill] sm:$0xff]  ;;  %7694 = vmatpush3.bf16.msra.mxu0 %v7954_v23  ;;  %vm12848_vm12 = vmmov %vm12838_vm3 }
 0x2c6   : > { %v10991_v17 = vadd.f32 %v10614_v62, %v10586_v54  ;;  %v4499_v42 = vshrl.u32 %v3190_v39, 16  ;;  %v4502_v34 = vshll.u32 %v3190_v39, 16  ;;  %v10995_v63 = vadd.f32 %v10812_v0, %v10790_v49  ;;  %v11013_v28 = vpop.f32.mrf.mxu1  ;;  %vm12849_vm5 = vmmov %vm12838_vm3 }
 0x2c7   : > { %5824 = vmatmul.mubr.bf16.gmra.mxu0 %v4326_v33  ;;  %v4389_v45 = vsel %vm12838_vm3, %v10898_v16, %v4388_v19  ;;  %v11003_v26 = vadd.f32 %v10748_v53, %v10775_v57  ;;  %v7140_v54 = vadd.f32 %v10618_v25, %v10598_v5  ;;  %v12206_v62 = vrot.slane %v10979_v50, 5  ;;  %v7278_v37 = vpop.f32.mrf.mxu0 }
 0x2c8   : > { %12837 = vst [vmem:[#allocation76_spill] sm:$0xff] %v10991_v17  ;;  %5831 = vmatprep.mubr.bf16.mxu0 %v12839_v61  ;;  %v4442_v49 = vor.u32 %v4441_v3, %v4438_v56  ;;  %v11009_v0 = vor.u32 %v4450_v24, %v4447_v48  ;;  %v4517_v33 = vshrl.u32 %v3078_v44, 16  ;;  %v2488_v16 = vsel %vm10337_vm10, %v2455_v7, 0  ;;  %v12842_v3 = vld [vmem:[#allocation80_spill] sm:$0xff]  ;;  %v12844_v7 = vld [vmem:[#allocation83_spill] sm:$0xff] }
 0x2c9   : > { %v4520_v53 = vshll.u32 %v3078_v44, 16  ;;  %v4508_v11 = vshrl.u32 %v6760_v31, 16  ;;  %v11015_v39 = vor.u32 %v3289_v20, %v3286_v12  ;;  %v11019_v5 = vadd.f32 %v10902_v22, %v10883_v8  ;;  %v11021_v25 = vpop.f32.mrf.mxu0  ;;  %v11029_v44 = vpop.f32.mrf.mxu1 }
 0x2ca   : > { %v4501_v56 = vrot.slane %v4499_v42, 3  ;;  %v4504_v24 = vrot.slane %v4502_v34, 4  ;;  %vm12843_vm7 = vnez %v12842_v3  ;;  %vm12845_vm14 = vnez %v12844_v7 }
 0x2cb   : > { %12841 = vst [vmem:[#allocation81_spill] sm:$0xff] %v11019_v5  ;;  %v2522_v48 = vsel %vm12843_vm7, %v10944_v6, 0  ;;  %v2523_v46 = vsel %vm12845_vm14, %v10894_v51, 0  ;;  %v11032_v12 = vadd.f32 %v7140_v54, %v10775_v57  ;;  %v4511_v8 = vshll.u32 %v6760_v31, 16  ;;  %v11039_v34 = vpop.f32.mrf.mxu0  ;;  %5671 = vmatmul.mubr.bf16.gmra.mxu1 %v12821_v18  ;;  %v11059_v7 = vpop.f32.mrf.mxu1  ;;  %v12853_v51 = vld [vmem:[#allocation87_spill] sm:$0xff]  ;;  %vm12858_vm14 = vmmov %vm12849_vm5  ;;  %v12861_v6 = vld [vmem:[#allocation18_spill] sm:$0xff] }
 0x2cc   : > { %v12846_v22 = vrot.slane %v10900_v14, 5  ;;  %v6745_v42 = vcombine.low %v2488_v16, %v2488_v16  ;;  %v4443_v3 = vsel %vm12848_vm12, %v10933_v47, %v4442_v49  ;;  %v4452_v23 = vsel %vm12849_vm5, %v4388_v19, %v11009_v0 }
 0x2cd   : > { %v11048_v31 = vadd.f32 %v10832_v29, %v10775_v57  ;;  %v11052_v14 = vadd.f32 %v10671_v30, %v10660_v13  ;;  %5678 = vmatprep.mubr.bf16.mxu1 %v4443_v3  ;;  %v4519_v54 = vrot.slane %v4517_v33, 3  ;;  %vm12852_vm3 = vsmask.f32 3328  ;;  %v7283_v32 = vpop.f32.mrf.mxu0 }
 0x2ce   : > { %v3192_v20 = vsel %vm12847_vm6, %v12846_v22, %v12206_v62  ;;  %v3291_v18 = vsel %vm12852_vm3, %v10952_v38, %v11015_v39  ;;  %v7146_v47 = vadd.f32 %v10686_v58, %v10664_v9  ;;  %v6761_v16 = vcombine.low %v2522_v48, %v2523_v46 }
 0x2cf   : > { %12850 = vst [vmem:[#allocation78_spill] sm:$0xff] %v11048_v31  ;;  %12851 = vst [vmem:[#allocation80_spill] sm:$0xff] %v11052_v14  ;;  %v4522_v19 = vrot.slane %v4520_v53, 4  ;;  %v11061_v22 = vor.u32 %v4504_v24, %v4501_v56  ;;  %v4510_v29 = vrot.slane %v4508_v11, 3  ;;  %v4562_v62 = vshrl.u32 %v3192_v20, 16  ;;  %5832 = vmatmul.mubr.bf16.gmra.mxu0 %v4389_v45  ;;  %v12854_v45 = vld [vmem:[#allocation22_spill] sm:$0xff] }
 0x2d0   : > { %v4513_v13 = vrot.slane %v4511_v8, 4  ;;  %v4565_v30 = vshll.u32 %v3192_v20, 16  ;;  %v3193_v3 = vrot.slane %v6745_v42, 5  ;;  %v11065_v33 = vadd.f32 %v10936_v27, %v10923_v35  ;;  %5839 = vmatprep.mubr.bf16.mxu0 %v12853_v51  ;;  %v7996_v24 = vld [vmem:[#allocation2 + $0x20] sm:$0xf]  ;;  %v12856_v8 = vld [vmem:[#allocation17_spill] sm:$0xff]  ;;  %v7171_v27 = vpop.f32.mrf.mxu1 }
 0x2d1   : > { %v4580_v9 = vshrl.u32 %v3291_v18, 16  ;;  %v4583_v58 = vshll.u32 %v3291_v18, 16  ;;  %v4661_v48 = vshrl.u32 %v11015_v39, 16  ;;  %v4664_v53 = vshll.u32 %v11015_v39, 16  ;;  %v7284_v39 = vpop.f32.mrf.mxu0  ;;  %v7998_v20 = vld [vmem:[#allocation2 + $0x1c] sm:$0xf] }
 0x2d2   : > { %v4571_v56 = vshrl.u32 %v6761_v16, 16  ;;  %v4574_v11 = vshll.u32 %v6761_v16, 16  ;;  %vm12855_vm7 = vcmp.ne.s16.totalorder %v12854_v45, 0  ;;  %v2529_v35 = vsel %vm8982_vm9, %v12856_v8, 0  ;;  %v7997_v45 = vld [vmem:[#allocation2 + $0x18] sm:$0xf]  ;;  %v7172_v17 = vpop.f32.mrf.mxu1  ;;  %vm12867_vm9 = vmmov %vm12849_vm5 }
 0x2d3   : > { %v2528_v46 = vsel %vm12855_vm7, %v7996_v24, 0  ;;  %v11075_v42 = vor.u32 %v4522_v19, %v4519_v54  ;;  %v4506_v18 = vsel %vm12858_vm14, %v4442_v49, %v11061_v22  ;;  %v4564_v5 = vrot.slane %v4562_v62, 3  ;;  %5679 = vmatmul.mubr.bf16.gmra.mxu1 %v12839_v61  ;;  %v12864_v54 = vld [vmem:[#allocation19_spill] sm:$0xff]  ;;  %vm12874_vm3 = vmmov %vm12867_vm9 }
 0x2d4   : > { %v11080_v14 = vadd.f32 %v7278_v37, %v10987_v60  ;;  %v4567_v16 = vrot.slane %v4565_v30, 4  ;;  %v12860_v31 = vrot.slane %v10979_v50, 5  ;;  %vm12862_vm12 = vcmp.ne.s16.totalorder %v12861_v6, 0  ;;  %5686 = vmatprep.mubr.bf16.mxu1 %v4506_v18  ;;  %v12869_v18 = vld [vmem:[#allocation55_spill] sm:$0xff]  ;;  %vm12876_vm7 = vmmov %vm12847_vm6 }
 0x2d5   : > { %v2526_v8 = vsel %vm12862_vm12, %v7997_v45, 0  ;;  %v2527_v19 = vsel %vm8468_vm1, %v7998_v20, 0  ;;  %v4582_v62 = vrot.slane %v4580_v9, 3  ;;  %v4585_v60 = vrot.slane %v4583_v58, 4  ;;  %v11101_v58 = vpop.f32.mrf.mxu0  ;;  %vm12877_vm14 = vmmov %vm12874_vm3 }
 0x2d6   : > { %12859 = vst [vmem:[#allocation83_spill] sm:$0xff] %v11080_v14  ;;  %v3194_v24 = vsel %vm12847_vm6, %v12860_v31, %v3193_v3  ;;  %v4663_v37 = vrot.slane %v4661_v48, 3  ;;  %v11090_v49 = vcombine.low %v2528_v46, %v2529_v35  ;;  %v4573_v50 = vrot.slane %v4571_v56, 3  ;;  %v11096_v3 = vpop.f32.mrf.mxu1  ;;  %v12866_v48 = vld [vmem:[#allocation85_spill] sm:$0xff]  ;;  %v7955_v46 = vld [vmem:[#allocation9 + $0x30] sm:$0xff]   ;;  %vm12878_vm6 = vmmov %vm12874_vm3 }
 0x2d7   : > { %v4576_v30 = vrot.slane %v4574_v11, 4  ;;  %v4666_v31 = vrot.slane %v4664_v53, 4  ;;  %v11094_v6 = vadd.f32 %v11013_v28, %v10997_v21  ;;  %v4643_v45 = vshrl.u32 %v3194_v24, 16  ;;  %5840 = vmatmul.mubr.bf16.gmra.mxu0 %v4452_v23  ;;  %7695 = vmatprep.subr.bf16.mxu0 %v7955_v46  ;;  %vm12879_vm12 = vmmov %vm12874_vm3 }
 0x2d8   : > { %v4646_v20 = vshll.u32 %v3194_v24, 16  ;;  %vm12865_vm1 = vcmp.ne.s16.totalorder %v12864_v54, 0  ;;  %v6764_v9 = vcombine.low %v2526_v8, %v2527_v19  ;;  %v11106_v53 = vsel %vm12867_vm9, %v12866_v48, %v11075_v42  ;;  %v11111_v11 = vpop.f32.mrf.mxu1  ;;  %v12870_v24 = vld [vmem:[#allocation26_spill] sm:$0xff]  ;;  %v12872_v8 = vld [vmem:[#allocation52_spill] sm:$0xff]  ;;  %7696 = vmatpush3.bf16.msra.mxu0 %v7955_v46  ;;  %v12881_v19 = vld [vmem:[#allocation27_spill] sm:$0xff] }
 0x2d9   : > { %v2524_v61 = vsel %vm12865_vm1, %v10896_v36, 0  ;;  %v4514_v56 = vor.u32 %v4513_v13, %v4510_v29  ;;  %v11109_v21 = vadd.f32 %v7146_v47, %v10775_v57  ;;  %v4568_v28 = vor.u32 %v4567_v16, %v4564_v5  ;;  %5847 = vmatprep.mubr.bf16.mxu0 %v11106_v53 }
 0x2da   : > { %v3376_v35 = vrot.slane %v11090_v49, 5  ;;  %vm12871_vm5 = vcmp.ne.s16.totalorder %v12870_v24, 0  ;;  %v2533_v54 = vsel %vm12643_vm4, %v12872_v8, 0  ;;  %v11121_v29 = vadd.f32 %v7284_v39, %v7283_v32  ;;  %vm12875_vm4 = vmmov %vm12874_vm3  ;;  %v12880_v8 = vld [vmem:[#allocation51_spill] sm:$0xff] }
 0x2db   : > { %12868 = vst [vmem:[#allocation87_spill] sm:$0xff] %v11109_v21  ;;  %v2532_v23 = vsel %vm12871_vm5, %v12869_v18, 0  ;;  %v4586_v47 = vor.u32 %v4585_v60, %v4582_v62  ;;  %v11123_v13 = vor.u32 %v4576_v30, %v4573_v50  ;;  %v4667_v5 = vor.u32 %v4666_v31, %v4663_v37  ;;  %v11126_v21 = vpop.f32.mrf.mxu0  ;;  %v7177_v60 = vpop.f32.mrf.mxu1  ;;  %5687 = vmatmul.mubr.bf16.gmra.mxu1 %v12853_v51 }
 0x2dc   : > { %v6762_v16 = vcombine.low %v2524_v61, %v2524_v61  ;;  %v4645_v48 = vrot.slane %v4643_v45, 3  ;;  %v4648_v36 = vrot.slane %v4646_v20, 4  ;;  %v4634_v49 = vshrl.u32 %v10952_v38, 16 }
 0x2dd   : > { %v3375_v14 = vrot.slane %v6764_v9, 5  ;;  %v4515_v18 = vsel %vm12874_vm3, %v11009_v0, %v4514_v56  ;;  %v4637_v32 = vshll.u32 %v10952_v38, 16  ;;  %v11131_v39 = vcombine.low %v2532_v23, %v2533_v54  ;;  %v7178_v31 = vpop.f32.mrf.mxu1 }
 0x2de   : > { %v11133_v62 = vadd.f32 %v7172_v17, %v7171_v27  ;;  %v4569_v37 = vsel %vm12875_vm4, %v11061_v22, %v4568_v28  ;;  %v11140_v50 = vadd.f32 %v10750_v4, %v10722_v2  ;;  %v7152_v30 = vadd.f32 %v10761_v52, %v10733_v15  ;;  %v7289_v15 = vpop.f32.mrf.mxu0  ;;  %vm12891_vm4 = vmmov %vm12876_vm7 }
 0x2df   : > { %v3377_v0 = vsel %vm12876_vm7, %v3375_v14, %v3376_v35  ;;  %v4587_v38 = vsel %vm12877_vm14, %v11075_v42, %v4586_v47  ;;  %5694 = vmatprep.mubr.bf16.mxu1 %v4569_v37  ;;  %v4668_v17 = vsel %vm12878_vm6, %v4586_v47, %v4667_v5  ;;  %v4652_v27 = vshrl.u32 %v6762_v16, 16  ;;  %5848 = vmatmul.mubr.bf16.gmra.mxu0 %v4515_v18  ;;  %v7180_v46 = vpop.f32.mrf.mxu1 }
 0x2e0   : > { %v4655_v51 = vshll.u32 %v6762_v16, 16  ;;  %v4578_v22 = vsel %vm12879_vm12, %v4514_v56, %v11123_v13  ;;  %v4649_v45 = vor.u32 %v4648_v36, %v4645_v48  ;;  %v11150_v2 = vrot.slane %v4634_v49, 3  ;;  %5855 = vmatprep.mubr.bf16.mxu0 %v4587_v38  ;;  %v12883_v56 = vld [vmem:[#allocation54_spill] sm:$0xff]  ;;  %v7290_v47 = vpop.f32.mrf.mxu0  ;;  %v12885_v48 = vld [vmem:[#allocation59_spill] sm:$0xff]  ;;  %v12886_v49 = vld [vmem:[#allocation33_spill] sm:$0xff] }
 0x2e1   : > { %v3378_v4 = vrot.slane %v10788_v40, 5  ;;  %v11153_v52 = vrot.slane %v4637_v32, 4  ;;  %v3705_v20 = vshrl.u32 %v3377_v0, 16  ;;  %v3708_v61 = vshll.u32 %v3377_v0, 16  ;;  %v12888_v32 = vld [vmem:[#allocation61_spill] sm:$0xff] }
 0x2e2   : > { %v3380_v9 = vrot.slane %v11131_v39, 5  ;;  %v3697_v24 = vshrl.u32 %v3375_v14, 16  ;;  %v3700_v23 = vshll.u32 %v3375_v14, 16  ;;  %vm12882_vm1 = vcmp.ne.s16.totalorder %v12881_v19, 0  ;;  %v12889_v39 = vld [vmem:[#allocation60_spill] sm:$0xff]  ;;  %v7181_v14 = vpop.f32.mrf.mxu1 }
 0x2e3   : > { %v2534_v36 = vsel %vm12882_vm1, %v12880_v8, 0  ;;  %v2535_v40 = vsel %vm12657_vm11, %v12883_v56, 0  ;;  %v4654_v5 = vrot.slane %v4652_v27, 3  ;;  %v4657_v16 = vrot.slane %v4655_v51, 4  ;;  %vm12892_vm11 = vmmov %vm12891_vm4  ;;  %5695 = vmatmul.mubr.bf16.gmra.mxu1 %v11106_v53 }
 0x2e4   : > { %vm12887_vm9 = vcmp.ne.s16.totalorder %v12886_v49, 0  ;;  %vm12890_vm5 = vnez %v12889_v39  ;;  %v4650_v0 = vsel %vm12874_vm3, %v4568_v28, %v4649_v45  ;;  %v3379_v38 = vsel %vm12891_vm4, %v3376_v35, %v3378_v4  ;;  %v12893_v45 = vld [vmem:[#allocation40_spill] sm:$0xff]  ;;  %vm12906_vm1 = vmmov %vm12874_vm3 }
 0x2e5   : > { %v2536_v18 = vsel %vm12887_vm9, %v12885_v48, 0  ;;  %v2537_v37 = vsel %vm12890_vm5, %v12888_v32, 0  ;;  %v11170_v8 = vadd.f32 %v7290_v47, %v7289_v15  ;;  %v11172_v19 = vadd.f32 %v7178_v31, %v7177_v60  ;;  %5702 = vmatprep.mubr.bf16.mxu1 %v4650_v0  ;;  %v12895_v31 = vld [vmem:[#allocation24_spill] sm:$0xff]  ;;  %v12896_v15 = vld [vmem:[#allocation35_spill] sm:$0xff]  ;;  %vm12907_vm9 = vmmov %vm12906_vm1 }
 0x2e6   : > { %v3707_v56 = vrot.slane %v3705_v20, 3  ;;  %v3710_v27 = vrot.slane %v3708_v61, 4  ;;  %v3381_v51 = vsel %vm12892_vm11, %v3378_v4, %v3380_v9  ;;  %v6768_v54 = vcombine.low %v2534_v36, %v2535_v40  ;;  %v12898_v36 = vld [vmem:[#allocation91_spill] sm:$0xff]  ;;  %v12899_v40 = vld [vmem:[#allocation42_spill] sm:$0xff]  ;;  %vm12908_vm5 = vmmov %vm12906_vm1 }
 0x2e7   : > { %v3699_v48 = vrot.slane %v3697_v24, 3  ;;  %v3702_v49 = vrot.slane %v3700_v23, 4  ;;  %v11176_v39 = vcombine.low %v2536_v18, %v2537_v37  ;;  %v11178_v32 = vadd.f32 %v7181_v14, %v7180_v46  ;;  %5856 = vmatmul.mubr.bf16.gmra.mxu0 %v4578_v22  ;;  %v12901_v18 = vld [vmem:[#allocation37_spill] sm:$0xff]  ;;  %vm12909_vm3 = vmmov %vm12891_vm4 }
 0x2e8   : > { %v3770_v28 = vshrl.u32 %v3379_v38, 16  ;;  %v3773_v35 = vshll.u32 %v3379_v38, 16  ;;  %vm12894_vm7 = vcmp.ne.s16.totalorder %v12893_v45, 0  ;;  %vm12897_vm14 = vnez %v12896_v15  ;;  %v7956_v37 = vld [vmem:[#allocation9 + $0x28] sm:$0xff]   ;;  %5863 = vmatprep.mubr.bf16.mxu0 %v4668_v17  ;;  %vm12910_vm4 = vmmov %vm12909_vm3  ;;  %v12914_v15 = vld [vmem:[#allocation34_spill] sm:$0xff] }
 0x2e9   : > { %v2538_v60 = vsel %vm12894_vm7, %v10527_v1, 0  ;;  %v2539_v4 = vsel %vm12897_vm14, %v12895_v31, 0  ;;  %v4658_v20 = vor.u32 %v4657_v16, %v4654_v5  ;;  %v4640_v53 = vor.u32 %v11153_v52, %v11150_v2  ;;  %v12903_v16 = vld [vmem:[#allocation66_spill] sm:$0xff]  ;;  %7697 = vmatprep.subr.bf16.mxu0 %v7956_v37  ;;  %v12911_v45 = vld [vmem:[#allocation29_spill] sm:$0xff] }
 0x2ea   : > { %v3833_v61 = vshrl.u32 %v3381_v51, 16  ;;  %v3836_v24 = vshll.u32 %v3381_v51, 16  ;;  %v3711_v46 = vor.u32 %v3710_v27, %v3707_v56  ;;  %v3382_v23 = vrot.slane %v6768_v54, 5  ;;  %v12905_v27 = vld [vmem:[#allocation62_spill] sm:$0xff]  ;;  %7698 = vmatpush3.bf16.msra.mxu0 %v7956_v37 }
 0x2eb   : > { %vm12900_vm6 = vcmp.ne.s16.totalorder %v12899_v40, 0  ;;  %vm12902_vm12 = vnez %v12901_v18  ;;  %v11196_v5 = vadd.f32 %v10921_v41, %v10775_v57  ;;  %v11199_v2 = vadd.f32 %v7152_v30, %v10775_v57  ;;  %v7183_v30 = vpop.f32.mrf.mxu1 }
 0x2ec   : > { %v2540_v47 = vsel %vm12900_vm6, %v12898_v36, 0  ;;  %v2541_v1 = vsel %vm12902_vm12, %v10560_v43, 0  ;;  %v3384_v22 = vrot.slane %v11176_v39, 5  ;;  %v6770_v52 = vcombine.low %v2538_v60, %v2539_v4  ;;  %v12904_v43 = vld [vmem:[#allocation53_spill] sm:$0xff]  ;;  %v12912_v60 = vld [vmem:[#allocation43_spill] sm:$0xff]  ;;  %vm12924_vm12 = vmmov %vm12909_vm3 }
 0x2ed   : > { %v11204_v14 = vadd.f32 %v12903_v16, %v10822_v10  ;;  %v3703_v0 = vor.u32 %v3702_v49, %v3699_v48  ;;  %v3772_v38 = vrot.slane %v3770_v28, 3  ;;  %v3775_v56 = vrot.slane %v3773_v35, 4  ;;  %v12915_v4 = vld [vmem:[#allocation39_spill] sm:$0xff] }
 0x2ee   : > { %v7158_v51 = vadd.f32 %v12905_v27, %v12904_v43  ;;  %v3835_v41 = vrot.slane %v3833_v61, 3  ;;  %v3838_v54 = vrot.slane %v3836_v24, 4  ;;  %v11208_v17 = vcombine.low %v2540_v47, %v2541_v1  ;;  %v12918_v24 = vld [vmem:[#allocation45_spill] sm:$0xff]  ;;  %v12920_v36 = vld [vmem:[#allocation31_spill] sm:$0xff] }
 0x2ef   : > { %v4659_v39 = vsel %vm12906_vm1, %v11123_v13, %v4658_v20  ;;  %v4641_v10 = vsel %vm12907_vm9, %v11075_v42, %v4640_v53  ;;  %v3712_v48 = vsel %vm12908_vm5, %v3703_v0, %v3711_v46  ;;  %v3383_v49 = vsel %vm12909_vm3, %v3380_v9, %v3382_v23  ;;  %v7184_v13 = vpop.f32.mrf.mxu1  ;;  %v11223_v42 = vpop.f32.mrf.mxu0  ;;  %v12917_v53 = vld [vmem:[#allocation36_spill] sm:$0xff]  ;;  %vm12926_vm9 = vmmov %vm12906_vm1 }
 0x2f0   : > { %5703 = vmatmul.mubr.bf16.gmra.mxu1 %v4641_v10  ;;  %v3385_v28 = vsel %vm12910_vm4, %v3382_v23, %v3384_v22  ;;  %v3386_v35 = vrot.slane %v6770_v52, 5  ;;  %vm12913_vm11 = vcmp.ne.s16.totalorder %v12912_v60, 0  ;;  %vm12916_vm7 = vnez %v12915_v4  ;;  %v12921_v23 = vld [vmem:[#allocation32_spill] sm:$0xff]  ;;  %5864 = vmatmul.mubr.bf16.gmra.mxu0 %v4659_v39  ;;  %v12925_v39 = vld [vmem:[#allocation73_spill] sm:$0xff]  ;;  %vm12927_vm5 = vmmov %vm12909_vm3 }
 0x2f1   : > { %v2542_v31 = vsel %vm12913_vm11, %v12911_v45, 0  ;;  %v2543_v61 = vsel %vm12916_vm7, %v12914_v15, 0  ;;  %7661 = vmatprep.mubr.bf16.mxu1 %v3712_v48  ;;  %v3776_v20 = vor.u32 %v3775_v56, %v3772_v38  ;;  %vm12919_vm14 = vcmp.ne.s16.totalorder %v12918_v24, 0  ;;  %v7186_v16 = vpop.f32.mrf.mxu1  ;;  %v12931_v24 = vld [vmem:[#allocation41_spill] sm:$0xff]  ;;  %vm12940_vm11 = vmmov %vm12906_vm1 }
 0x2f2   : > { %v2544_v9 = vsel %vm12919_vm14, %v12917_v53, 0  ;;  %vm12922_vm6 = vnez %v12921_v23  ;;  %v11231_v47 = vadd.f32 %v7184_v13, %v7183_v30  ;;  %v11233_v18 = vor.u32 %v3838_v54, %v3835_v41  ;;  %v12923_v30 = vld [vmem:[#allocation90_spill] sm:$0xff]  ;;  %v12929_v13 = vld [vmem:[#allocation48_spill] sm:$0xff]  ;;  %vm12941_vm7 = vmmov %vm12906_vm1 }
 0x2f3   : > { %v2545_v40 = vsel %vm12922_vm6, %v12920_v36, 0  ;;  %v3896_v1 = vshrl.u32 %v3383_v49, 16  ;;  %v3899_v37 = vshll.u32 %v3383_v49, 16  ;;  %v3388_v52 = vrot.slane %v11208_v17, 5  ;;  %v7187_v17 = vpop.f32.mrf.mxu1 }
 0x2f4   : > { %v11238_v0 = vadd.f32 %v10995_v63, %v10775_v57  ;;  %v3959_v38 = vshrl.u32 %v3385_v28, 16  ;;  %v3962_v56 = vshll.u32 %v3385_v28, 16  ;;  %v6772_v43 = vcombine.low %v2542_v31, %v2543_v61 }
 0x2f5   : > { %v11241_v27 = vadd.f32 %v7158_v51, %v10775_v57  ;;  %v11245_v41 = vadd.f32 %v10954_v55, %v12923_v30  ;;  %v3387_v54 = vsel %vm12924_vm12, %v3384_v22, %v3386_v35  ;;  %v11248_v10 = vcombine.low %v2544_v9, %v2545_v40  ;;  %v11257_v51 = vpop.f32.mrf.mxu0  ;;  %v12933_v40 = vld [vmem:[#allocation97_spill] sm:$0xff] }
 0x2f6   : > { %v11252_v63 = vadd.f32 %v11065_v33, %v10775_v57  ;;  %v7164_v48 = vadd.f32 %v10981_v59, %v12925_v39  ;;  %v3777_v49 = vsel %vm12906_vm1, %v3711_v46, %v3776_v20  ;;  %v11259_v28 = vadd.f32 %v7187_v17, %v7186_v16  ;;  %v12928_v46 = vld [vmem:[#allocation95_spill] sm:$0xff]  ;;  %v12936_v16 = vld [vmem:[#allocation98_spill] sm:$0xff] }
 0x2f7   : > { %v3840_v55 = vsel %vm12926_vm9, %v3776_v20, %v11233_v18  ;;  %v3898_v22 = vrot.slane %v3896_v1, 3  ;;  %v3901_v45 = vrot.slane %v3899_v37, 4  ;;  %v3389_v60 = vsel %vm12927_vm5, %v3386_v35, %v3388_v52  ;;  %v7295_v35 = vpop.f32.mrf.mxu0  ;;  %v12934_v1 = vld [vmem:[#allocation57_spill] sm:$0xff] }
 0x2f8   : > { %v3961_v31 = vrot.slane %v3959_v38, 3  ;;  %v3964_v15 = vrot.slane %v3962_v56, 4  ;;  %v4022_v33 = vshrl.u32 %v3387_v54, 16  ;;  %v3390_v4 = vrot.slane %v6772_v43, 5  ;;  %7662 = vmatmul.mubr.bf16.vlgmr.msra.gmra.mxu1 %v3777_v49 }
 0x2f9   : > { %v4025_v61 = vshll.u32 %v3387_v54, 16  ;;  %v3392_v59 = vrot.slane %v11248_v10, 5  ;;  %vm12930_vm3 = vcmp.ne.s16.totalorder %v12929_v13, 0  ;;  %v2547_v20 = vsel %vm9811_vm2, %v12931_v24, 0  ;;  %7665 = vmatprep.mubr.bf16.mxu1 %v3840_v55  ;;  %v7296_v49 = vpop.f32.mrf.mxu0  ;;  %vm12938_vm2 = vmmov %vm12927_vm5 }
 0x2fa   : > { %v2546_v53 = vsel %vm12930_vm3, %v12928_v46, 0  ;;  %v4085_v36 = vshrl.u32 %v3389_v60, 16  ;;  %v4088_v23 = vshll.u32 %v3389_v60, 16  ;;  %vm12935_vm4 = vcmp.ne.s16.totalorder %v12934_v1, 0  ;;  %v7957_v46 = vld [vmem:[#allocation9 + $0x20] sm:$0xff]   ;;  %v7189_v1 = vpop.f32.mrf.mxu1  ;;  %vm12950_vm12 = vmmov %vm12938_vm2 }
 0x2fb   : > { %v2548_v37 = vsel %vm12935_vm4, %v12933_v40, 0  ;;  %v2549_v56 = vsel %vm12744_vm13, %v12936_v16, 0  ;;  %v11278_v43 = vadd.f32 %v7164_v48, %v10775_v57  ;;  %v11282_v30 = vadd.f32 %v11039_v34, %v11021_v25  ;;  %vm12939_vm13 = vmmov %vm12938_vm2  ;;  %7699 = vmatprep.subr.bf16.mxu0 %v7957_v46 }
 0x2fc   : > { %v7170_v54 = vadd.f32 %v11059_v7, %v11029_v44  ;;  %v3902_v10 = vor.u32 %v3901_v45, %v3898_v22  ;;  %v3965_v17 = vor.u32 %v3964_v15, %v3961_v31  ;;  %v4024_v39 = vrot.slane %v4022_v33, 3  ;;  %v11305_v45 = vpop.f32.mrf.mxu0  ;;  %7700 = vmatpush3.bf16.msra.mxu0 %v7957_v46  ;;  %v7190_v46 = vpop.f32.mrf.mxu1  ;;  %vm12953_vm9 = vmmov %vm12938_vm2 }
 0x2fd   : > { %v3391_v55 = vsel %vm12938_vm2, %v3388_v52, %v3390_v4  ;;  %v6774_v60 = vcombine.low %v2546_v53, %v2547_v20  ;;  %v4027_v13 = vrot.slane %v4025_v61, 4  ;;  %v11287_v24 = vadd.f32 %v7296_v49, %v7295_v35  ;;  %v12942_v20 = vld [vmem:[#allocation65_spill] sm:$0xff]  ;;  %vm12954_vm5 = vmmov %vm12906_vm1 }
 0x2fe   : > { %v3393_v48 = vsel %vm12939_vm13, %v3390_v4, %v3392_v59  ;;  %v11290_v9 = vcombine.low %v2548_v37, %v2549_v56  ;;  %v11294_v25 = vadd.f32 %v11094_v6, %v10775_v57  ;;  %v7176_v44 = vadd.f32 %v11111_v11, %v11096_v3  ;;  %v11328_v38 = vpop.f32.mrf.mxu0  ;;  %v12944_v56 = vld [vmem:[#allocation16_spill] sm:$0xff]  ;;  %vm12988_vm4 = vmmov %vm12906_vm1 }
 0x2ff   : > { %v4087_v34 = vrot.slane %v4085_v36, 3  ;;  %v4090_v7 = vrot.slane %v4088_v23, 4  ;;  %v11299_v52 = vadd.f32 %v7170_v54, %v10775_v57  ;;  %v11303_v22 = vadd.f32 %v11133_v62, %v10775_v57  ;;  %v12943_v62 = vld [vmem:[#allocation30_spill] sm:$0xff]  ;;  %v12945_v54 = vld [vmem:[#allocation67_spill] sm:$0xff]  ;;  %vm12990_vm13 = vmmov %vm12906_vm1 }
 0x300   : > { %v4148_v31 = vshrl.u32 %v3391_v55, 16  ;;  %v4151_v15 = vshll.u32 %v3391_v55, 16  ;;  %v3903_v6 = vsel %vm12940_vm11, %v11233_v18, %v3902_v10  ;;  %v4211_v33 = vshrl.u32 %v3393_v48, 16  ;;  %vm12993_vm11 = vmmov %vm12906_vm1 }
 0x301   : > { %v4214_v3 = vshll.u32 %v3393_v48, 16  ;;  %v3394_v11 = vrot.slane %v6774_v60, 5  ;;  %7666 = vmatmul.mubr.bf16.gmra.mxu1 %v3903_v6  ;;  %v3966_v4 = vsel %vm12941_vm7, %v3902_v10, %v3965_v17  ;;  %v4028_v61 = vor.u32 %v4027_v13, %v4024_v39  ;;  %v12952_v13 = vld [vmem:[#allocation21_spill] sm:$0xff]  ;;  %vm12994_vm7 = vmmov %vm12938_vm2 }
 0x302   : > { %v12210_v53 = vrot.slane %v11290_v9, 5  ;;  %v11313_v36 = vadd.f32 %v12943_v62, %v12942_v20  ;;  %7669 = vmatprep.mubr.bf16.mxu1 %v3966_v4  ;;  %v11317_v23 = vadd.f32 %v11126_v21, %v11101_v58  ;;  %v11320_v18 = vadd.f32 %v7176_v44, %v10775_v57  ;;  %v12947_v58 = vld [vmem:[#allocation46_spill] sm:$0xff]  ;;  %v12948_v21 = vld [vmem:[#allocation69_spill] sm:$0xff] }
 0x303   : > { %v11322_v35 = vor.u32 %v4090_v7, %v4087_v34  ;;  %v11326_v40 = vadd.f32 %v11172_v19, %v10775_v57  ;;  %v4150_v37 = vrot.slane %v4148_v31, 3  ;;  %v4153_v16 = vrot.slane %v4151_v15, 4  ;;  %v12951_v19 = vld [vmem:[#allocation23_spill] sm:$0xff]  ;;  %v7192_v15 = vpop.f32.mrf.mxu1 }
 0x304   : > { %vm12946_vm14 = vcmp.ne.s16.totalorder %v12945_v54, 0  ;;  %vm12949_vm6 = vnez %v12948_v21  ;;  %v4213_v49 = vrot.slane %v4211_v33, 3  ;;  %v4216_v55 = vrot.slane %v4214_v3, 4  ;;  %v12955_v33 = vld [vmem:[#allocation86_spill] sm:$0xff] }
 0x305   : > { %v2550_v10 = vsel %vm12946_vm14, %v12944_v56, 0  ;;  %v2551_v39 = vsel %vm12949_vm6, %v12947_v58, 0  ;;  %v3395_v60 = vsel %vm12950_vm12, %v3392_v59, %v3394_v11  ;;  %v11339_v48 = vadd.f32 %v12952_v13, %v12951_v19  ;;  %v12956_v3 = vld [vmem:[#allocation70_spill] sm:$0xff]  ;;  %v7301_v56 = vpop.f32.mrf.mxu0  ;;  %vm12995_vm14 = vmmov %vm12906_vm1 }
 0x306   : > { %v4029_v44 = vsel %vm12906_vm1, %v3965_v17, %v4028_v61  ;;  %v11344_v34 = vadd.f32 %v11178_v32, %v10775_v57  ;;  %v3397_v7 = vsel %vm12953_vm9, %v3394_v11, %v12210_v53  ;;  %v11349_v31 = vadd.f32 %v7190_v46, %v7189_v1  ;;  %v12958_v17 = vld [vmem:[#allocation82_spill] sm:$0xff]  ;;  %v12961_v1 = vld [vmem:[#allocation93_spill] sm:$0xff]  ;;  %vm12997_vm6 = vmmov %vm12906_vm1 }
 0x307   : > { %v4092_v59 = vsel %vm12954_vm5, %v4028_v61, %v11322_v35  ;;  %v6776_v6 = vcombine.low %v2550_v10, %v2551_v39  ;;  %vm12957_vm3 = vcmp.ne.s16.totalorder %v12956_v3, 0  ;;  %v2553_v32 = vsel %vm12773_vm0, %v12958_v17, 0  ;;  %v12960_v11 = vld [vmem:[#allocation58_spill] sm:$0xff]  ;;  %v7193_v10 = vpop.f32.mrf.mxu1  ;;  %v12962_v39 = vld [vmem:[#allocation63_spill] sm:$0xff]  ;;  %vm12998_vm12 = vmmov %vm12938_vm2 }
 0x308   : > { %v2552_v4 = vsel %vm12957_vm3, %v12955_v33, 0  ;;  %v4154_v62 = vor.u32 %v4153_v16, %v4150_v37  ;;  %v4274_v54 = vshrl.u32 %v3395_v60, 16  ;;  %v4277_v58 = vshll.u32 %v3395_v60, 16  ;;  %v12963_v19 = vld [vmem:[#allocation50_spill] sm:$0xff]  ;;  %v12964_v33 = vld [vmem:[#allocation99_spill] sm:$0xff]  ;;  %v7302_v37 = vpop.f32.mrf.mxu0  ;;  %vm12999_vm9 = vmmov %vm12906_vm1 }
 0x309   : > { %v11361_v21 = vadd.f32 %v12961_v1, %v12960_v11  ;;  %v11363_v46 = vor.u32 %v4216_v55, %v4213_v49  ;;  %v4337_v61 = vshrl.u32 %v3397_v7, 16  ;;  %v11367_v13 = vadd.f32 %v12963_v19, %v12962_v39  ;;  %v12965_v3 = vld [vmem:[#allocation94_spill] sm:$0xff]  ;;  %7670 = vmatmul.mubr.bf16.gmra.mxu1 %v4029_v44  ;;  %v12966_v11 = vld [vmem:[#allocation100_spill] sm:$0xff]  ;;  %vm13000_vm5 = vmmov %vm12906_vm1 }
 0x30a   : > { %v11371_v20 = vadd.f32 %v12965_v3, %v12964_v33  ;;  %v4340_v16 = vshll.u32 %v3397_v7, 16  ;;  %v11373_v60 = vadd.f32 %v7193_v10, %v7192_v15  ;;  %v11375_v17 = vcombine.low %v2552_v4, %v2553_v32  ;;  %v12967_v49 = vld [vmem:[#allocation68_spill] sm:$0xff]  ;;  %7673 = vmatprep.mubr.bf16.mxu1 %v4092_v59  ;;  %v7304_v7 = vpop.f32.mrf.mxu0  ;;  %v12970_v15 = vld [vmem:[#allocation38_spill] sm:$0xff]  ;;  %v12971_v4 = vld [vmem:[#allocation77_spill] sm:$0xff] }
 0x30b   : > { %v11379_v55 = vadd.f32 %v12967_v49, %v12966_v11  ;;  %v11381_v1 = vadd.f32 %v7302_v37, %v7301_v56  ;;  %v3398_v39 = vrot.slane %v6776_v6, 5  ;;  %v12968_v19 = vld [vmem:[#allocation96_spill] sm:$0xff]  ;;  %vm12972_vm0 = vcmp.ne.s16.totalorder %v12971_v4, 0  ;;  %v12975_v56 = vld [vmem:[#allocation78_spill] sm:$0xff]  ;;  %v12977_v11 = vld [vmem:[#allocation87_spill] sm:$0xff] }
 0x30c   : > { %v11385_v53 = vadd.f32 %v12968_v19, %v11003_v26  ;;  %v12969_v44 = vld [vmem:[#allocation76_spill] sm:$0xff]  ;;  %v2554_v32 = vsel %vm12972_vm0, %v12970_v15, 0  ;;  %v12980_v15 = vld [vmem:[#allocation75_spill] sm:$0xff]  ;;  %vm13001_vm3 = vmmov %vm12906_vm1 }
 0x30d   : > { %v11389_v33 = vadd.f32 %v12969_v44, %v11032_v12  ;;  %v12973_v10 = vld [vmem:[#allocation92_spill] sm:$0xff]  ;;  %v11411_v44 = vadd.f32 %v11140_v50, %v11199_v2  ;;  %v11415_v4 = vadd.f32 %v12980_v15, %v11238_v0  ;;  %v7958_v3 = vld [vmem:[#allocation9 + $0x18] sm:$0xff]   ;;  %v11428_v50 = vadd.f32 %v11245_v41, %v11278_v43 }
 0x30e   : > { %v2555_v59 = vsel %vm10240_vm8, %v12973_v10, 0  ;;  %v12976_v37 = vld [vmem:[#allocation64_spill] sm:$0xff]  ;;  %v11419_v10 = vadd.f32 %v11204_v14, %v11241_v27  ;;  %v12982_v2 = vld [vmem:[#allocation83_spill] sm:$0xff]  ;;  %v11438_v14 = vadd.f32 %v11282_v30, %v11299_v52  ;;  %v11442_v27 = vadd.f32 %v11121_v29, %v11303_v22  ;;  %7701 = vmatprep.subr.bf16.mxu0 %v7958_v3 }
 0x30f   : > { %v11399_v6 = vadd.f32 %v12976_v37, %v12975_v56  ;;  %v12978_v26 = vld [vmem:[#allocation80_spill] sm:$0xff]  ;;  %v7305_v56 = vpop.f32.mrf.mxu0  ;;  %v3400_v37 = vrot.slane %v11375_v17, 5  ;;  %v11432_v0 = vadd.f32 %v12982_v2, %v11294_v25  ;;  %v4276_v41 = vrot.slane %v4274_v54, 3  ;;  %v12983_v17 = vld [vmem:[#allocation71_spill] sm:$0xff]  ;;  %7702 = vmatpush3.bf16.msra.mxu0 %v7958_v3 }
 0x310   : > { %v11403_v49 = vadd.f32 %v12978_v26, %v12977_v11  ;;  %v12979_v12 = vld [vmem:[#allocation28_spill] sm:$0xff]  ;;  %v12981_v11 = vld [vmem:[#allocation81_spill] sm:$0xff]  ;;  %v11434_v26 = vadd.f32 %v7305_v56, %v7304_v7  ;;  %v4279_v43 = vrot.slane %v4277_v58, 4  ;;  %v4155_v29 = vsel %vm12988_vm4, %v11322_v35, %v4154_v62 }
 0x311   : > { %v11407_v19 = vadd.f32 %v12979_v12, %v11196_v5  ;;  %v11424_v5 = vadd.f32 %v12981_v11, %v11252_v63  ;;  %v11446_v63 = vadd.f32 %v11317_v23, %v11320_v18  ;;  %v12984_v25 = vld [vmem:[#allocation84_spill] sm:$0xff]  ;;  %v12989_v52 = vrot.slane %v11290_v9, 5  ;;  %7674 = vmatmul.mubr.bf16.gmra.mxu1 %v4155_v29  ;;  %v2525_v11 = vld [vmem:[#allocation2 + $0x98] sm:$0x1] }
 0x312   : > { %vm12985_vm8 = vcmp.ne.s16.totalorder %v12984_v25, 0  ;;  %v12986_v12 = vld [vmem:[#allocation72_spill] sm:$0xff]  ;;  %v6778_v23 = vcombine.low %v2554_v32, %v2555_v59  ;;  %v11461_v18 = vadd.f32 %v11170_v8, %v11326_v40  ;;  %v4218_v54 = vsel %vm12990_vm13, %v4154_v62, %v11363_v46 }
 0x313   : > { %v2556_v7 = vsel %vm12985_vm8, %v12983_v17, 0  ;;  %v2557_v30 = vsel %vm10326_vm15, %v12986_v12, 0  ;;  %v3399_v22 = vsel %vm12938_vm2, %v12989_v52, %v3398_v39  ;;  %v4339_v58 = vrot.slane %v4337_v61, 3  ;;  %7677 = vmatprep.mubr.bf16.mxu1 %v4218_v54  ;;  %vm12991_vm15 = vmmov %vm12938_vm2  ;;  %v7195_v61 = vpop.f32.mrf.mxu1 }
 0x314   : > { %v4342_v56 = vrot.slane %v4340_v16, 4  ;;  %v7294_v3 = vadd.f32 %v11257_v51, %v11223_v42  ;;  %v3401_v35 = vsel %vm12991_vm15, %v3398_v39, %v3400_v37  ;;  %v6779_v9 = vcombine.low %v2556_v7, %v2557_v30 }
 0x315   : > { %v4280_v2 = vor.u32 %v4279_v43, %v4276_v41  ;;  %v4400_v32 = vshrl.u32 %v3399_v22, 16  ;;  %v4403_v59 = vshll.u32 %v3399_v22, 16  ;;  %v5351_v8 = vadd.f32 %v11231_v47, %v10775_v57  ;;  %v7196_v12 = vpop.f32.mrf.mxu1 }
 0x316   : > { %v3402_v40 = vrot.slane %v6778_v23, 5  ;;  %v11471_v17 = vadd.f32 %v7294_v3, %v11344_v34  ;;  %v4343_v62 = vor.u32 %v4342_v56, %v4339_v58  ;;  %v4463_v16 = vshrl.u32 %v3401_v35, 16 }
 0x317   : > { %v4466_v25 = vshll.u32 %v3401_v35, 16  ;;  %v2558_v51 = vsel %vm10337_vm10, %v2525_v11, 0  ;;  %v3404_v39 = vrot.slane %v6779_v9, 5  ;;  %v5354_v41 = vadd.f32 %v11259_v28, %v10775_v57  ;;  %v7198_v54 = vpop.f32.mrf.mxu1  ;;  %vm12996_vm10 = vmmov %vm12938_vm2  ;;  %v7959_v11 = vld [vmem:[#allocation9 + $0x10] sm:$0xff]  }
 0x318   : > { %v4281_v43 = vsel %vm12993_vm11, %v11363_v46, %v4280_v2  ;;  %v4402_v7 = vrot.slane %v4400_v32, 3  ;;  %v4405_v47 = vrot.slane %v4403_v59, 4  ;;  %v7197_v15 = vadd.f32 %v7196_v12, %v7195_v61  ;;  %7703 = vmatprep.subr.bf16.mxu0 %v7959_v11 }
 0x319   : > { %v3403_v34 = vsel %vm12994_vm7, %v3400_v37, %v3402_v40  ;;  %v6780_v30 = vcombine.low %v2558_v51, %v2558_v51  ;;  %v11481_v29 = vadd.f32 %v11287_v24, %v5351_v8  ;;  %7678 = vmatmul.mubr.bf16.gmra.mxu1 %v4281_v43  ;;  %v4344_v52 = vsel %vm12995_vm14, %v4280_v2, %v4343_v62  ;;  %v7199_v58 = vpop.f32.mrf.mxu1  ;;  %v11490_v24 = vld [vmem:[%s11969_s4] ss:$0 sm:$0xff] }
 0x31a   : > { %v4465_v22 = vrot.slane %v4463_v16, 3  ;;  %v4468_v23 = vrot.slane %v4466_v25, 4  ;;  %v7300_v57 = vadd.f32 %v11328_v38, %v11305_v45  ;;  %7681 = vmatprep.mubr.bf16.mxu1 %v4344_v52  ;;  %v3405_v28 = vsel %vm12996_vm10, %v3402_v40, %v3404_v39  ;;  %v7307_v45 = vpop.f32.mrf.mxu0  ;;  %7704 = vmatpush3.bf16.msra.mxu0 %v7959_v11  ;;  %v7960_v11 = vld [vmem:[#allocation9 + $0x8] sm:$0xff]  }
 0x31b   : > { %v4406_v46 = vor.u32 %v4405_v47, %v4402_v7  ;;  %v4526_v56 = vshrl.u32 %v3403_v34, 16  ;;  %v4529_v37 = vshll.u32 %v3403_v34, 16  ;;  %v5359_v3 = vadd.f32 %v11490_v24, %v11349_v31  ;;  %7705 = vmatprep.subr.bf16.mxu0 %v7960_v11 }
 0x31c   : > { %v7200_v35 = vadd.f32 %v7199_v58, %v7198_v54  ;;  %v3406_v9 = vrot.slane %v6780_v30, 5  ;;  %v11494_v2 = vadd.f32 %v7300_v57, %v5354_v41  ;;  %v4469_v38 = vor.u32 %v4468_v23, %v4465_v22  ;;  %v7308_v8 = vpop.f32.mrf.mxu0 }
 0x31d   : > { %v4589_v32 = vshrl.u32 %v3405_v28, 16  ;;  %v4592_v59 = vshll.u32 %v3405_v28, 16  ;;  %v4407_v40 = vsel %vm12997_vm6, %v4343_v62, %v4406_v46  ;;  %v4528_v61 = vrot.slane %v4526_v56, 3 }
 0x31e   : > { %v4531_v16 = vrot.slane %v4529_v37, 4  ;;  %v5362_v25 = vadd.f32 %v11490_v24, %v11373_v60  ;;  %v7309_v31 = vadd.f32 %v7308_v8, %v7307_v45  ;;  %v3407_v42 = vsel %vm12998_vm12, %v3404_v39, %v3406_v9  ;;  %v7310_v41 = vpop.f32.mrf.mxu0  ;;  %7706 = vmatpush3.bf16.msra.mxu0 %v7960_v11 }
 0x31f   : > { %v11501_v51 = vadd.f32 %v11381_v1, %v5359_v3  ;;  %v4470_v43 = vsel %vm12906_vm1, %v4406_v46, %v4469_v38  ;;  %v4591_v7 = vrot.slane %v4589_v32, 3  ;;  %v4594_v47 = vrot.slane %v4592_v59, 4  ;;  %v7201_v1 = vpop.f32.mrf.mxu1 }
 0x320   : > { %v7311_v62 = vpop.f32.mrf.mxu0  ;;  %v4532_v12 = vor.u32 %v4531_v16, %v4528_v61  ;;  %v4670_v34 = vshrl.u32 %v3407_v42, 16  ;;  %v5367_v30 = vadd.f32 %v11490_v24, %v7197_v15  ;;  %v4673_v60 = vshll.u32 %v3407_v42, 16 }
 0x321   : > { %7682 = vmatmul.mubr.bf16.gmra.mxu1 %v4407_v40  ;;  %v7312_v52 = vadd.f32 %v7311_v62, %v7310_v41  ;;  %v11506_v22 = vadd.f32 %v11434_v26, %v5362_v25  ;;  %v4595_v39 = vor.u32 %v4594_v47, %v4591_v7  ;;  %v5370_v54 = vadd.f32 %v11490_v24, %v7200_v35  ;;  %v7202_v28 = vpop.f32.mrf.mxu1 }
 0x322   : > { %7685 = vmatprep.mubr.bf16.mxu1 %v4470_v43  ;;  %v4672_v23 = vrot.slane %v4670_v34, 3  ;;  %v4533_v57 = vsel %vm12999_vm9, %v4469_v38, %v4532_v12  ;;  %v4675_v46 = vrot.slane %v4673_v60, 4  ;;  %v11510_v58 = vadd.f32 %v7309_v31, %v5367_v30  ;;  %v7313_v3 = vpop.f32.mrf.mxu0 }
 0x323   : > { %v4596_v56 = vsel %vm13000_vm5, %v4532_v12, %v4595_v39  ;;  %v7203_v15 = vadd.f32 %v7202_v28, %v7201_v1  ;;  %v7204_v37 = vpop.f32.mrf.mxu1  ;;  %v11513_v45 = vadd.f32 %v7312_v52, %v5370_v54 }
 0x324   : > { %v4676_v9 = vor.u32 %v4675_v46, %v4672_v23  ;;  %v7314_v38 = vpop.f32.mrf.mxu0 }
 0x325   : > { %v7205_v26 = vpop.f32.mrf.mxu1  ;;  %v5375_v35 = vadd.f32 %v11490_v24, %v7203_v15  ;;  %v7315_v8 = vadd.f32 %v7314_v38, %v7313_v3  ;;  %v7961_v15 = vld [vmem:[#allocation9] sm:$0xff]  }
 0x326   : > { %v7206_v32 = vadd.f32 %v7205_v26, %v7204_v37  ;;  %v7316_v40 = vpop.f32.mrf.mxu0  ;;  %v4677_v61 = vsel %vm13001_vm3, %v4595_v39, %v4676_v9  ;;  %7707 = vmatprep.subr.bf16.mxu0 %v7961_v15 }
 0x327   : > { %v7207_v59 = vpop.f32.mrf.mxu1  ;;  %v11518_v42 = vadd.f32 %v7315_v8, %v5375_v35  ;;  %7708 = vmatpush3.bf16.msra.mxu0 %v7961_v15 }
 0x328   : > { %v5378_v25 = vadd.f32 %v11490_v24, %v7206_v32  ;;  %v7317_v41 = vpop.f32.mrf.mxu0 }
 0x329   : > { %7686 = vmatmul.mubr.bf16.gmra.mxu1 %v4533_v57  ;;  %v7208_v16 = vpop.f32.mrf.mxu1  ;;  %v7318_v7 = vadd.f32 %v7317_v41, %v7316_v40 }
 0x32a   : > { %7689 = vmatprep.mubr.bf16.mxu1 %v4596_v56  ;;  %v7209_v31 = vadd.f32 %v7208_v16, %v7207_v59  ;;  %v7319_v47 = vpop.f32.mrf.mxu0 }
 0x32b   : > { %v7210_v43 = vpop.f32.mrf.mxu1  ;;  %v11521_v30 = vadd.f32 %v7318_v7, %v5378_v25 }
 0x32c   : > { %v5383_v12 = vadd.f32 %v11490_v24, %v7209_v31  ;;  %v7320_v52 = vpop.f32.mrf.mxu0 }
 0x32d   : > { %v7211_v62 = vpop.f32.mrf.mxu1  ;;  %v7321_v60 = vadd.f32 %v7320_v52, %v7319_v47 }
 0x32e   : > { %v7212_v34 = vadd.f32 %v7211_v62, %v7210_v43  ;;  %v7322_v39 = vpop.f32.mrf.mxu0 }
 0x32f   : > { %v11524_v54 = vadd.f32 %v7321_v60, %v5383_v12 }
 0x330   : > { %v7341_v1 = vpop.f32.mrf.mxu1  ;;  %v5386_v23 = vadd.f32 %v11490_v24, %v7212_v34  ;;  %v7323_v57 = vpop.f32.mrf.mxu0 }
 0x331   : > { %7690 = vmatmul.mubr.bf16.gmra.mxu1 %v4677_v61  ;;  %v7324_v46 = vadd.f32 %v7323_v57, %v7322_v39 }
 0x332   : > { %v7342_v28 = vpop.f32.mrf.mxu1 }
 0x333   : > { %v7343_v56 = vadd.f32 %v7342_v28, %v7341_v1  ;;  %v7453_v37 = vpop.f32.mrf.mxu0  ;;  %v11527_v9 = vadd.f32 %v7324_v46, %v5386_v23 }
 0x334   : > { %v7344_v3 = vpop.f32.mrf.mxu1 }
 0x335   : > { %v5585_v26 = vadd.f32 %v7343_v56, %v11313_v36  ;;  %13002 = vst [vmem:[#allocation22_spill] sm:$0xff] %v11527_v9  ;;  %v7454_v11 = vpop.f32.mrf.mxu0 }
 0x336   : > { %v7345_v35 = vpop.f32.mrf.mxu1  ;;  %v7455_v32 = vadd.f32 %v7454_v11, %v7453_v37 }
 0x337   : > { %v7346_v38 = vadd.f32 %v7345_v35, %v7344_v3  ;;  %v7456_v24 = vpop.f32.mrf.mxu0 }
 0x338   : > { %v11530_v40 = vadd.f32 %v7455_v32, %v5585_v26 }
 0x339   : > { %v5588_v59 = vadd.f32 %v7346_v38, %v11339_v48  ;;  %v7457_v61 = vpop.f32.mrf.mxu0 }
 0x33a   : > { %v7458_v16 = vadd.f32 %v7457_v61, %v7456_v24 }
 0x33b   : > { %v7347_v8 = vpop.f32.mrf.mxu1 }
 0x33c   : > { %v11534_v43 = vadd.f32 %v7458_v16, %v5588_v59 }
 0x33d   : > { %v7348_v25 = vpop.f32.mrf.mxu1 }
 0x33e   : > { %v7349_v36 = vadd.f32 %v7348_v25, %v7347_v8 }
 0x33f   : > { %v11532_v31 = vpop.f32.mrf.mxu0  ;;  %v7350_v41 = vpop.f32.mrf.mxu1 }
 0x340   : > { %v11539_v47 = vadd.f32 %v7349_v36, %v11361_v21 }
 0x341   : > { %v11536_v7 = vpop.f32.mrf.mxu0  ;;  %v7351_v62 = vpop.f32.mrf.mxu1 }
 0x342   : > { %v7352_v48 = vadd.f32 %v7351_v62, %v7350_v41 }
 0x343   : > { %v11541_v12 = vpop.f32.mrf.mxu0  ;;  %v7353_v34 = vpop.f32.mrf.mxu1 }
 0x344   : > { %v11546_v60 = vadd.f32 %v7352_v48, %v11367_v13 }
 0x345   : > { %v11543_v52 = vpop.f32.mrf.mxu0  ;;  %v7354_v39 = vpop.f32.mrf.mxu1 }
 0x346   : > { %v7355_v23 = vadd.f32 %v7354_v39, %v7353_v34 }
 0x347   : > { %v11548_v1 = vpop.f32.mrf.mxu0  ;;  %v7356_v57 = vpop.f32.mrf.mxu1 }
 0x348   : > { %v11553_v21 = vadd.f32 %v7355_v23, %v11371_v20 }
 0x349   : > { %v11550_v28 = vpop.f32.mrf.mxu0  ;;  %v7357_v46 = vpop.f32.mrf.mxu1 }
 0x34a   : > { %v7358_v15 = vadd.f32 %v7357_v46, %v7356_v57 }
 0x34b   : > { %v11555_v56 = vpop.f32.mrf.mxu0  ;;  %v7359_v37 = vpop.f32.mrf.mxu1 }
 0x34c   : > { %v11560_v13 = vadd.f32 %v7358_v15, %v11379_v55 }
 0x34d   : > { %v11557_v3 = vpop.f32.mrf.mxu0  ;;  %v7360_v26 = vpop.f32.mrf.mxu1 }
 0x34e   : > { %v7361_v35 = vadd.f32 %v7360_v26, %v7359_v37 }
 0x34f   : > { %v11562_v11 = vpop.f32.mrf.mxu0  ;;  %v7362_v32 = vpop.f32.mrf.mxu1 }
 0x350   : > { %v11567_v20 = vadd.f32 %v7361_v35, %v11385_v53 }
 0x351   : > { %v11564_v38 = vpop.f32.mrf.mxu0  ;;  %v7363_v24 = vpop.f32.mrf.mxu1 }
 0x352   : > { %v7364_v8 = vadd.f32 %v7363_v24, %v7362_v32 }
 0x353   : > { %v11569_v59 = vpop.f32.mrf.mxu0  ;;  %v7365_v61 = vpop.f32.mrf.mxu1 }
 0x354   : > { %v11574_v55 = vadd.f32 %v7364_v8, %v11389_v33 }
 0x355   : > { %v11571_v16 = vpop.f32.mrf.mxu0  ;;  %v7366_v25 = vpop.f32.mrf.mxu1 }
 0x356   : > { %v7367_v41 = vadd.f32 %v7366_v25, %v7365_v61 }
 0x357   : > { %v11576_v36 = vpop.f32.mrf.mxu0  ;;  %v7368_v62 = vpop.f32.mrf.mxu1 }
 0x358   : > { %v11581_v53 = vadd.f32 %v7367_v41, %v11399_v6 }
 0x359   : > { %v11578_v48 = vpop.f32.mrf.mxu0  ;;  %v7369_v34 = vpop.f32.mrf.mxu1 }
 0x35a   : > { %v7370_v23 = vadd.f32 %v7369_v34, %v7368_v62 }
 0x35b   : > { %v11583_v39 = vpop.f32.mrf.mxu0  ;;  %v7371_v57 = vpop.f32.mrf.mxu1 }
 0x35c   : > { %v11588_v33 = vadd.f32 %v7370_v23, %v11403_v49 }
 0x35d   : > { %v11585_v46 = vpop.f32.mrf.mxu0  ;;  %v7372_v15 = vpop.f32.mrf.mxu1 }
 0x35e   : > { %13003 = vst [vmem:[#allocation17_spill] sm:$0xff] %v11588_v33  ;;  %v7373_v26 = vadd.f32 %v7372_v15, %v7371_v57 }
 0x35f   : > { %v11590_v37 = vpop.f32.mrf.mxu0  ;;  %v7374_v35 = vpop.f32.mrf.mxu1 }
 0x360   : > { %v11595_v6 = vadd.f32 %v7373_v26, %v11407_v19 }
 0x361   : > { %v11592_v32 = vpop.f32.mrf.mxu0  ;;  %v7375_v24 = vpop.f32.mrf.mxu1 }
 0x362   : > { %v7376_v61 = vadd.f32 %v7375_v24, %v7374_v35 }
 0x363   : > { %v11597_v8 = vpop.f32.mrf.mxu0  ;;  %v7377_v25 = vpop.f32.mrf.mxu1 }
 0x364   : > { %v11602_v49 = vadd.f32 %v7376_v61, %v11411_v44 }
 0x365   : > { %v11599_v41 = vpop.f32.mrf.mxu0  ;;  %v7378_v62 = vpop.f32.mrf.mxu1 }
 0x366   : > { %13004 = vst [vmem:[#allocation47_spill] sm:$0xff] %v11602_v49  ;;  %v7379_v23 = vadd.f32 %v7378_v62, %v7377_v25 }
 0x367   : > { %v11604_v34 = vpop.f32.mrf.mxu0  ;;  %v7380_v57 = vpop.f32.mrf.mxu1 }
 0x368   : > { %13005 = vst [vmem:[#allocation18_spill] sm:$0xff] %v11604_v34  ;;  %v11609_v19 = vadd.f32 %v7379_v23, %v11415_v4 }
 0x369   : > { %v11606_v15 = vpop.f32.mrf.mxu0  ;;  %v7381_v26 = vpop.f32.mrf.mxu1 }
 0x36a   : > { %13006 = vst [vmem:[#allocation20_spill] sm:$0xff] %v11609_v19  ;;  %v7382_v35 = vadd.f32 %v7381_v26, %v7380_v57 }
 0x36b   : > { %v11611_v9 = vpop.f32.mrf.mxu0  ;;  %v7383_v24 = vpop.f32.mrf.mxu1 }
 0x36c   : > { %13007 = vst [vmem:[#allocation19_spill] sm:$0xff] %v11611_v9  ;;  %v11616_v44 = vadd.f32 %v7382_v35, %v11419_v10 }
 0x36d   : > { %v11613_v33 = vpop.f32.mrf.mxu0  ;;  %v7384_v61 = vpop.f32.mrf.mxu1 }
 0x36e   : > { %13008 = vst [vmem:[#allocation85_spill] sm:$0xff] %v11613_v33  ;;  %13009 = vst [vmem:[#allocation55_spill] sm:$0xff] %v11616_v44  ;;  %v7385_v25 = vadd.f32 %v7384_v61, %v7383_v24 }
 0x36f   : > { %v11618_v49 = vpop.f32.mrf.mxu0  ;;  %v7386_v62 = vpop.f32.mrf.mxu1 }
 0x370   : > { %v11623_v4 = vadd.f32 %v7385_v25, %v11424_v5 }
 0x371   : > { %v11620_v34 = vpop.f32.mrf.mxu0  ;;  %v7387_v23 = vpop.f32.mrf.mxu1 }
 0x372   : > { %13010 = vst [vmem:[#allocation26_spill] sm:$0xff] %v11623_v4  ;;  %v7388_v57 = vadd.f32 %v7387_v23, %v7386_v62 }
 0x373   : > { %v11625_v19 = vpop.f32.mrf.mxu0  ;;  %v7389_v26 = vpop.f32.mrf.mxu1 }
 0x374   : > { %13011 = vst [vmem:[#allocation52_spill] sm:$0xff] %v11625_v19  ;;  %v11630_v10 = vadd.f32 %v7388_v57, %v11428_v50 }
 0x375   : > { %v11627_v9 = vpop.f32.mrf.mxu0  ;;  %v7390_v35 = vpop.f32.mrf.mxu1 }
 0x376   : > { %13012 = vst [vmem:[#allocation56_spill] sm:$0xff] %v11630_v10  ;;  %v7391_v24 = vadd.f32 %v7390_v35, %v7389_v26 }
 0x377   : > { %v11632_v44 = vpop.f32.mrf.mxu0  ;;  %v7392_v61 = vpop.f32.mrf.mxu1 }
 0x378   : > { %v11637_v5 = vadd.f32 %v7391_v24, %v11432_v0 }
 0x379   : > { %v11634_v33 = vpop.f32.mrf.mxu0  ;;  %v7393_v25 = vpop.f32.mrf.mxu1 }
 0x37a   : > { %13013 = vst [vmem:[#allocation51_spill] sm:$0xff] %v11634_v33  ;;  %13014 = vst [vmem:[#allocation27_spill] sm:$0xff] %v11637_v5  ;;  %v7394_v62 = vadd.f32 %v7393_v25, %v7392_v61 }
 0x37b   : > { %v11639_v4 = vpop.f32.mrf.mxu0  ;;  %v7395_v23 = vpop.f32.mrf.mxu1 }
 0x37c   : > { %13015 = vst [vmem:[#allocation54_spill] sm:$0xff] %v11639_v4  ;;  %v11644_v50 = vadd.f32 %v7394_v62, %v11438_v14 }
 0x37d   : > { %v11641_v19 = vpop.f32.mrf.mxu0  ;;  %v7396_v57 = vpop.f32.mrf.mxu1 }
 0x37e   : > { %13016 = vst [vmem:[#allocation25_spill] sm:$0xff] %v11641_v19  ;;  %13017 = vst [vmem:[#allocation59_spill] sm:$0xff] %v11644_v50  ;;  %v7397_v26 = vadd.f32 %v7396_v57, %v7395_v23 }
 0x37f   : > { %v11646_v10 = vpop.f32.mrf.mxu0  ;;  %v7398_v35 = vpop.f32.mrf.mxu1 }
 0x380   : > { %v11649_v33 = vadd.f32 %v7397_v26, %v11442_v27 }
 0x381   : > { %v11651_v0 = vpop.f32.mrf.mxu0  ;;  %v7399_v24 = vpop.f32.mrf.mxu1 }
 0x382   : > { %13018 = vst [vmem:[#allocation33_spill] sm:$0xff] %v11649_v33  ;;  %v7400_v5 = vadd.f32 %v7399_v24, %v7398_v35 }
 0x383   : > { %v7401_v4 = vpop.f32.mrf.mxu1  ;;  %v11656_v25 = vpop.f32.mrf.mxu0 }
 0x384   : > { %v11654_v61 = vadd.f32 %v7400_v5, %v11446_v63 }
 0x385   : > { %v7402_v14 = vpop.f32.mrf.mxu1  ;;  %v11661_v23 = vpop.f32.mrf.mxu0 }
 0x386   : > { %13019 = vst [vmem:[#allocation61_spill] sm:$0xff] %v11654_v61  ;;  %v7403_v62 = vadd.f32 %v7402_v14, %v7401_v4 }
 0x387   : > { %v7404_v50 = vpop.f32.mrf.mxu1  ;;  %v11666_v35 = vpop.f32.mrf.mxu0 }
 0x388   : > { %v11659_v19 = vadd.f32 %v7403_v62, %v11461_v18 }
 0x389   : > { %v7405_v27 = vpop.f32.mrf.mxu1  ;;  %v11671_v4 = vpop.f32.mrf.mxu0 }
 0x38a   : > { %13020 = vst [vmem:[#allocation60_spill] sm:$0xff] %v11659_v19  ;;  %v7406_v57 = vadd.f32 %v7405_v27, %v7404_v50 }
 0x38b   : > { %v7407_v26 = vpop.f32.mrf.mxu1  ;;  %v11676_v50 = vpop.f32.mrf.mxu0 }
 0x38c   : > { %v11664_v33 = vadd.f32 %v7406_v57, %v11471_v17 }
 0x38d   : > { %v7408_v63 = vpop.f32.mrf.mxu1 }
 0x38e   : > { %13021 = vst [vmem:[#allocation40_spill] sm:$0xff] %v11664_v33  ;;  %v7409_v5 = vadd.f32 %v7408_v63, %v7407_v26  ;;  %v11681_v26 = vpop.f32.mrf.mxu0 }
 0x38f   : > { %v7410_v24 = vpop.f32.mrf.mxu1 }
 0x390   : > { %v11669_v61 = vadd.f32 %v7409_v5, %v11481_v29 }
 0x391   : > { %v7411_v18 = vpop.f32.mrf.mxu1 }
 0x392   : > { %13022 = vst [vmem:[#allocation24_spill] sm:$0xff] %v11669_v61  ;;  %v7412_v14 = vadd.f32 %v7411_v18, %v7410_v24  ;;  %v11686_v24 = vpop.f32.mrf.mxu0 }
 0x393   : > { %v7413_v62 = vpop.f32.mrf.mxu1 }
 0x394   : > { %v11674_v19 = vadd.f32 %v7412_v14, %v11494_v2 }
 0x395   : > { %v7414_v17 = vpop.f32.mrf.mxu1 }
 0x396   : > { %13023 = vst [vmem:[#allocation35_spill] sm:$0xff] %v11674_v19  ;;  %v7415_v27 = vadd.f32 %v7414_v17, %v7413_v62  ;;  %v11691_v62 = vpop.f32.mrf.mxu0 }
 0x397   : > { %v7416_v57 = vpop.f32.mrf.mxu1 }
 0x398   : > { %v11679_v33 = vadd.f32 %v7415_v27, %v11501_v51 }
 0x399   : > { %v7417_v29 = vpop.f32.mrf.mxu1 }
 0x39a   : > { %13024 = vst [vmem:[#allocation91_spill] sm:$0xff] %v11679_v33  ;;  %v7418_v63 = vadd.f32 %v7417_v29, %v7416_v57  ;;  %v11696_v57 = vpop.f32.mrf.mxu0 }
 0x39b   : > { %v7419_v5 = vpop.f32.mrf.mxu1 }
 0x39c   : > { %v11684_v61 = vadd.f32 %v7418_v63, %v11506_v22 }
 0x39d   : > { %v7420_v2 = vpop.f32.mrf.mxu1 }
 0x39e   : > { %13025 = vst [vmem:[#allocation42_spill] sm:$0xff] %v11684_v61  ;;  %v7421_v18 = vadd.f32 %v7420_v2, %v7419_v5  ;;  %v11701_v5 = vpop.f32.mrf.mxu0 }
 0x39f   : > { %v7422_v14 = vpop.f32.mrf.mxu1 }
 0x3a0   : > { %v11689_v19 = vadd.f32 %v7421_v18, %v11510_v58 }
 0x3a1   : > { %v7423_v51 = vpop.f32.mrf.mxu1 }
 0x3a2   : > { %13026 = vst [vmem:[#allocation37_spill] sm:$0xff] %v11689_v19  ;;  %v7424_v17 = vadd.f32 %v7423_v51, %v7422_v14  ;;  %v11706_v14 = vpop.f32.mrf.mxu0 }
 0x3a3   : > { %v7425_v27 = vpop.f32.mrf.mxu1 }
 0x3a4   : > { %v11694_v33 = vadd.f32 %v7424_v17, %v11513_v45 }
 0x3a5   : > { %v7426_v22 = vpop.f32.mrf.mxu1 }
 0x3a6   : > { %13027 = vst [vmem:[#allocation66_spill] sm:$0xff] %v11694_v33  ;;  %v7427_v29 = vadd.f32 %v7426_v22, %v7425_v27  ;;  %v11713_v22 = vpop.f32.mrf.mxu0 }
 0x3a7   : > { %v7428_v63 = vpop.f32.mrf.mxu1 }
 0x3a8   : > { %v11699_v61 = vadd.f32 %v7427_v29, %v11518_v42  ;;  %v7461_v29 = vadd.f32 %v11536_v7, %v11532_v31 }
 0x3a9   : > { %v7429_v58 = vpop.f32.mrf.mxu1 }
 0x3aa   : > { %13028 = vst [vmem:[#allocation53_spill] sm:$0xff] %v11699_v61  ;;  %v7430_v2 = vadd.f32 %v7429_v58, %v7428_v63  ;;  %v5754_v58 = vadd.f32 %v7461_v29, %v11539_v47 }
 0x3ac   : > { %v11704_v19 = vadd.f32 %v7430_v2, %v11521_v30  ;;  %v7464_v30 = vadd.f32 %v11543_v52, %v11541_v12  ;;  %v11722_v2 = vpop.f32.mrf.mxu0  ;;  %v7467_v52 = vadd.f32 %v11550_v28, %v11548_v1 }
 0x3ae   : > { %13029 = vst [vmem:[#allocation62_spill] sm:$0xff] %v11704_v19  ;;  %v11728_v31 = vpop.f32.mrf.mxu0 }
 0x3b0   : > { %v7431_v18 = vpop.f32.mrf.mxu1 }
 0x3b2   : > { %v7432_v45 = vpop.f32.mrf.mxu1 }
 0x3b3   : > { %v7433_v51 = vadd.f32 %v7432_v45, %v7431_v18 }
 0x3b4   : > { %v11708_v17 = vpop.f32.mrf.mxu1 }
 0x3b5   : > { %v11711_v27 = vadd.f32 %v7433_v51, %v11524_v54  ;;  %v5757_v54 = vadd.f32 %v7464_v30, %v11546_v60 }
 0x3b6   : > { %v11715_v42 = vpop.f32.mrf.mxu1 }
 0x3b7   : > { %13030 = vst [vmem:[#allocation29_spill] sm:$0xff] %v11711_v27  ;;  %v7473_v27 = vadd.f32 %v11564_v38, %v11562_v11  ;;  %v11736_v11 = vpop.f32.mrf.mxu0  ;;  %v5762_v38 = vadd.f32 %v7467_v52, %v11553_v21 }
 0x3b8   : > { %v7663_v63 = vpop.f32.mrf.mxu1 }
 0x3b9   : > { %v5915_v45 = vadd.f32 %v7663_v63, %v5754_v58  ;;  %v5770_v29 = vadd.f32 %v7473_v27, %v11567_v20 }
 0x3ba   : > { %v5906_v18 = vpop.f32.mrf.mxu1 }
 0x3bb   : > { %v5907_v19 = vadd.f32 %v5906_v18, %v11530_v40  ;;  %v6035_v33 = vmax.f32 %v5915_v45, 0.0  ;;  %v7476_v40 = vadd.f32 %v11571_v16, %v11569_v59  ;;  %v7485_v16 = vadd.f32 %v11592_v32, %v11590_v37 }
 0x3bc   : > { %v7664_v51 = vpop.f32.mrf.mxu1 }
 0x3bd   : > { %v5918_v61 = vadd.f32 %v7664_v51, %v5757_v54  ;;  %v6033_v63 = vmax.f32 %v5907_v19, 0.0  ;;  %v5773_v1 = vadd.f32 %v7476_v40, %v11574_v55  ;;  %v5786_v55 = vadd.f32 %v7485_v16, %v11595_v6 }
 0x3be   : > { %v5909_v7 = vpop.f32.mrf.mxu1 }
 0x3bf   : > { %v6036_v12 = vmax.f32 %v5918_v61, 0.0  ;;  %v5910_v47 = vadd.f32 %v5909_v7, %v11534_v43  ;;  %v7470_v43 = vadd.f32 %v11557_v3, %v11555_v56  ;;  %v7479_v3 = vadd.f32 %v11578_v48, %v11576_v36  ;;  %v13031_v36 = vld [vmem:[#allocation47_spill] sm:$0xff] }
 0x3c0   : > { %v7488_v7 = vadd.f32 %v11599_v41, %v11597_v8  ;;  %v13032_v8 = vld [vmem:[#allocation17_spill] sm:$0xff] }
 0x3c1   : > { %v7667_v60 = vpop.f32.mrf.mxu1  ;;  %v6066_v30 = vpack.c.bf16 %v6036_v12, %v6035_v33  ;;  %v6034_v58 = vmax.f32 %v5910_v47, 0.0  ;;  %v5765_v59 = vadd.f32 %v7470_v43, %v11560_v13  ;;  %v11745_v33 = vpop.f32.mrf.mxu0  ;;  %v5778_v32 = vadd.f32 %v7479_v3, %v11581_v53  ;;  %v13038_v3 = vld [vmem:[#allocation85_spill] sm:$0xff] }
 0x3c2   : > { %v5931_v45 = vadd.f32 %v7667_v60, %v5770_v29  ;;  %v7482_v29 = vadd.f32 %v11585_v46, %v11583_v39  ;;  %v5789_v48 = vadd.f32 %v7488_v7, %v13031_v36  ;;  %v13033_v46 = vld [vmem:[#allocation18_spill] sm:$0xff] }
 0x3c3   : > { %v5922_v18 = vpop.f32.mrf.mxu1  ;;  %v6065_v61 = vpack.c.bf16 %v6034_v58, %v6033_v63  ;;  %v11752_v37 = vpop.f32.mrf.mxu0  ;;  %v7497_v58 = vadd.f32 %v11620_v34, %v11618_v49  ;;  %v13036_v34 = vld [vmem:[#allocation20_spill] sm:$0xff] }
 0x3c4   : > { %v5923_v20 = vadd.f32 %v5922_v18, %v5762_v38  ;;  %v6039_v19 = vmax.f32 %v5931_v45, 0.0  ;;  %v5781_v41 = vadd.f32 %v7482_v29, %v13032_v8  ;;  %v13034_v45 = vld [vmem:[#allocation26_spill] sm:$0xff]  ;;  %v7509_v29 = vadd.f32 %v11651_v0, %v11646_v10  ;;  %v13042_v8 = vld [vmem:[#allocation33_spill] sm:$0xff]  ;;  %v13043_v0 = vld [vmem:[#allocation27_spill] sm:$0xff] }
 0x3c5   : > { %v7668_v28 = vpop.f32.mrf.mxu1  ;;  %7709 = vmatprep.mubr.bf16.mxu0 %v6065_v61  ;;  %v11761_v38 = vpop.f32.mrf.mxu0  ;;  %v7491_v61 = vadd.f32 %v11606_v15, %v13033_v46  ;;  %v13039_v15 = vld [vmem:[#allocation56_spill] sm:$0xff] }
 0x3c6   : > { %v5934_v27 = vadd.f32 %v7668_v28, %v5773_v1  ;;  %7710 = vmatmul.mubr.bf16.vlgmr.msra.gmra.mxu0 %v6066_v30  ;;  %v6037_v13 = vmax.f32 %v5923_v20, 0.0  ;;  %v5802_v1 = vadd.f32 %v7497_v58, %v13034_v45  ;;  %v13035_v20 = vld [vmem:[#allocation52_spill] sm:$0xff]  ;;  %v13044_v45 = vld [vmem:[#allocation54_spill] sm:$0xff] }
 0x3c7   : > { %v5925_v21 = vpop.f32.mrf.mxu1  ;;  %v11768_v49 = vpop.f32.mrf.mxu0 }
 0x3c8   : > { %v6040_v54 = vmax.f32 %v5934_v27, 0.0  ;;  %v5926_v56 = vadd.f32 %v5925_v21, %v5765_v59  ;;  %v7500_v27 = vadd.f32 %v11627_v9, %v13035_v20  ;;  %v13040_v9 = vld [vmem:[#allocation55_spill] sm:$0xff] }
 0x3c9   : > { %v7671_v51 = vpop.f32.mrf.mxu1 }
 0x3ca   : > { %v6068_v12 = vpack.c.bf16 %v6040_v54, %v6039_v19  ;;  %v6038_v47 = vmax.f32 %v5926_v56, 0.0  ;;  %v5947_v40 = vadd.f32 %v7671_v51, %v5786_v55  ;;  %v5794_v19 = vadd.f32 %v7491_v61, %v13036_v34  ;;  %v13037_v56 = vld [vmem:[#allocation19_spill] sm:$0xff] }
 0x3cb   : > { %v5938_v52 = vpop.f32.mrf.mxu1  ;;  %v7494_v55 = vadd.f32 %v13038_v3, %v13037_v56 }
 0x3cc   : > { %v6067_v60 = vpack.c.bf16 %v6038_v47, %v6037_v13  ;;  %v5939_v63 = vadd.f32 %v5938_v52, %v5778_v32  ;;  %v6043_v18 = vmax.f32 %v5947_v40, 0.0  ;;  %v5805_v13 = vadd.f32 %v7500_v27, %v13039_v15  ;;  %v13048_v15 = vld [vmem:[#allocation24_spill] sm:$0xff] }
 0x3cd   : > { %v7672_v6 = vpop.f32.mrf.mxu1  ;;  %v5797_v52 = vadd.f32 %v7494_v55, %v13040_v9 }
 0x3ce   : > { %v5950_v30 = vadd.f32 %v7672_v6, %v5789_v48  ;;  %7713 = vmatprep.mubr.bf16.mxu0 %v6067_v60  ;;  %v6041_v59 = vmax.f32 %v5939_v63, 0.0  ;;  %v11777_v60 = vpop.f32.mrf.mxu0  ;;  %v13041_v63 = vld [vmem:[#allocation51_spill] sm:$0xff] }
 0x3cf   : > { %v5941_v53 = vpop.f32.mrf.mxu1  ;;  %7714 = vmatmul.mubr.bf16.gmra.mxu0 %v6068_v12 }
 0x3d0   : > { %v6044_v43 = vmax.f32 %v5950_v30, 0.0  ;;  %v5942_v39 = vadd.f32 %v5941_v53, %v5781_v41  ;;  %v7503_v30 = vadd.f32 %v13041_v63, %v11632_v44  ;;  %v5818_v41 = vadd.f32 %v7509_v29, %v13042_v8  ;;  %v11784_v10 = vpop.f32.mrf.mxu0  ;;  %v13046_v44 = vld [vmem:[#allocation61_spill] sm:$0xff]  ;;  %v13050_v63 = vld [vmem:[#allocation35_spill] sm:$0xff] }
 0x3d1   : > { %v7675_v28 = vpop.f32.mrf.mxu1  ;;  %v7512_v53 = vadd.f32 %v11661_v23, %v11656_v25  ;;  %v13047_v25 = vld [vmem:[#allocation59_spill] sm:$0xff] }
 0x3d2   : > { %v6070_v16 = vpack.c.bf16 %v6044_v43, %v6043_v18  ;;  %v6042_v21 = vmax.f32 %v5942_v39, 0.0  ;;  %v5963_v7 = vadd.f32 %v7675_v28, %v5802_v1  ;;  %v5810_v46 = vadd.f32 %v7503_v30, %v13043_v0  ;;  %v13045_v1 = vld [vmem:[#allocation25_spill] sm:$0xff] }
 0x3d3   : > { %v5954_v54 = vpop.f32.mrf.mxu1  ;;  %v7506_v28 = vadd.f32 %v13045_v1, %v13044_v45 }
 0x3d4   : > { %v6069_v51 = vpack.c.bf16 %v6042_v21, %v6041_v59  ;;  %v5955_v47 = vadd.f32 %v5954_v54, %v5794_v19  ;;  %v6047_v36 = vmax.f32 %v5963_v7, 0.0  ;;  %v5821_v59 = vadd.f32 %v7512_v53, %v13046_v44  ;;  %v11793_v54 = vpop.f32.mrf.mxu0 }
 0x3d5   : > { %v7676_v12 = vpop.f32.mrf.mxu1  ;;  %v5813_v23 = vadd.f32 %v7506_v28, %v13047_v25  ;;  %v7521_v19 = vadd.f32 %v11691_v62, %v11686_v24  ;;  %v7515_v7 = vadd.f32 %v11671_v4, %v11666_v35  ;;  %v13049_v62 = vld [vmem:[#allocation60_spill] sm:$0xff] }
 0x3d6   : > { %v5966_v32 = vadd.f32 %v7676_v12, %v5805_v13  ;;  %7717 = vmatprep.mubr.bf16.mxu0 %v6069_v51  ;;  %v6045_v18 = vmax.f32 %v5955_v47, 0.0  ;;  %v7524_v47 = vadd.f32 %v11701_v5, %v11696_v57  ;;  %v7543_v24 = vpop.f32.mrf.mxu0  ;;  %v7533_v5 = vadd.f32 %v11745_v33, %v11736_v11 }
 0x3d7   : > { %v5957_v40 = vpop.f32.mrf.mxu1  ;;  %7718 = vmatmul.mubr.bf16.gmra.mxu0 %v6070_v16  ;;  %v5834_v13 = vadd.f32 %v7521_v19, %v13048_v15  ;;  %v5826_v29 = vadd.f32 %v7515_v7, %v13049_v62  ;;  %v7530_v11 = vadd.f32 %v11728_v31, %v11722_v2  ;;  %v13056_v31 = vld [vmem:[#allocation22_spill] sm:$0xff] }
 0x3d8   : > { %v6048_v48 = vmax.f32 %v5966_v32, 0.0  ;;  %v5958_v6 = vadd.f32 %v5957_v40, %v5797_v52  ;;  %v5837_v35 = vadd.f32 %v7524_v47, %v13050_v63 }
 0x3d9   : > { %v7679_v58 = vpop.f32.mrf.mxu1 }
 0x3da   : > { %v6072_v43 = vpack.c.bf16 %v6048_v48, %v6047_v36  ;;  %v6046_v39 = vmax.f32 %v5958_v6, 0.0  ;;  %v5979_v27 = vadd.f32 %v7679_v58, %v5818_v41  ;;  %v7518_v36 = vadd.f32 %v11681_v26, %v11676_v50  ;;  %v13051_v41 = vld [vmem:[#allocation40_spill] sm:$0xff]  ;;  %v7544_v58 = vpop.f32.mrf.mxu0  ;;  %v13052_v26 = vld [vmem:[#allocation37_spill] sm:$0xff] }
 0x3db   : > { %v5970_v61 = vpop.f32.mrf.mxu1  ;;  %v7527_v50 = vadd.f32 %v11713_v22, %v11706_v14  ;;  %v5850_v0 = vadd.f32 %v7533_v5, %v13052_v26  ;;  %v7545_v19 = vadd.f32 %v7544_v58, %v7543_v24  ;;  %v7062_v58 = vld [vmem:[%s8382_s29 + $0x8] sm:$0xff]  }
 0x3dc   : > { %v6071_v20 = vpack.c.bf16 %v6046_v39, %v6045_v18  ;;  %v5971_v21 = vadd.f32 %v5970_v61, %v5810_v46  ;;  %v6051_v3 = vmax.f32 %v5979_v27, 0.0  ;;  %v5829_v57 = vadd.f32 %v7518_v36, %v13051_v41  ;;  %v7546_v33 = vpop.f32.mrf.mxu0 }
 0x3dd   : > { %v7680_v16 = vpop.f32.mrf.mxu1  ;;  %v7536_v61 = vadd.f32 %v11761_v38, %v11752_v37  ;;  %v13055_v38 = vld [vmem:[#allocation42_spill] sm:$0xff] }
 0x3de   : > { %v5982_v34 = vadd.f32 %v7680_v16, %v5821_v59  ;;  %7721 = vmatprep.mubr.bf16.mxu0 %v6071_v20  ;;  %v6049_v32 = vmax.f32 %v5971_v21, 0.0  ;;  %v13053_v20 = vld [vmem:[#allocation91_spill] sm:$0xff]  ;;  %v7436_v59 = vadd.f32 %v11715_v42, %v11708_v17  ;;  %v13054_v16 = vld [vmem:[#allocation66_spill] sm:$0xff]  ;;  %v7539_v17 = vadd.f32 %v11777_v60, %v11768_v49  ;;  %v13057_v42 = vld [vmem:[#allocation29_spill] sm:$0xff] }
 0x3df   : > { %v5973_v56 = vpop.f32.mrf.mxu1  ;;  %7722 = vmatmul.mubr.bf16.gmra.mxu0 %v6072_v43  ;;  %v5842_v27 = vadd.f32 %v7527_v50, %v13053_v20  ;;  %v5853_v21 = vadd.f32 %v7536_v61, %v13054_v16  ;;  %v5866_v15 = vadd.f32 %v7545_v19, %v13057_v42  ;;  %v13059_v60 = vld [vmem:[#allocation62_spill] sm:$0xff] }
 0x3e0   : > { %v6052_v55 = vmax.f32 %v5982_v34, 0.0  ;;  %v5974_v51 = vadd.f32 %v5973_v56, %v5813_v23  ;;  %v5845_v23 = vadd.f32 %v7530_v11, %v13055_v38  ;;  %v7547_v56 = vpop.f32.mrf.mxu0 }
 0x3e1   : > { %v7683_v12 = vpop.f32.mrf.mxu1 }
 0x3e2   : > { %v6074_v9 = vpack.c.bf16 %v6052_v55, %v6051_v3  ;;  %v6050_v52 = vmax.f32 %v5974_v51, 0.0  ;;  %v5995_v6 = vadd.f32 %v7683_v12, %v5834_v13  ;;  %v5708_v3 = vadd.f32 %v7436_v59, %v13056_v31  ;;  %v7063_v59 = vld [vmem:[%s8382_s29 + $0x10] sm:$0xff]  }
 0x3e3   : > { %v5986_v40 = vpop.f32.mrf.mxu1  ;;  %v7548_v12 = vadd.f32 %v7547_v56, %v7546_v33 }
 0x3e4   : > { %v6073_v48 = vpack.c.bf16 %v6050_v52, %v6049_v32  ;;  %v5987_v30 = vadd.f32 %v5986_v40, %v5826_v29  ;;  %v6055_v18 = vmax.f32 %v5995_v6, 0.0  ;;  %v13058_v52 = vld [vmem:[#allocation53_spill] sm:$0xff]  ;;  %v7542_v29 = vadd.f32 %v11793_v54, %v11784_v10 }
 0x3e5   : > { %v7684_v4 = vpop.f32.mrf.mxu1  ;;  %v5858_v24 = vadd.f32 %v7539_v17, %v13058_v52 }
 0x3e6   : > { %v5998_v8 = vadd.f32 %v7684_v4, %v5837_v35  ;;  %7725 = vmatprep.mubr.bf16.mxu0 %v6073_v48  ;;  %v6053_v45 = vmax.f32 %v5987_v30, 0.0  ;;  %v5869_v48 = vadd.f32 %v7548_v12, %v5708_v3  ;;  %v5861_v35 = vadd.f32 %v7542_v29, %v13059_v60  ;;  %v7065_v12 = vld [vmem:[%s8382_s29 + $0x20] sm:$0xff]  }
 0x3e7   : > { %v5989_v53 = vpop.f32.mrf.mxu1  ;;  %7726 = vmatmul.mubr.bf16.gmra.mxu0 %v6074_v9 }
 0x3e8   : > { %v6056_v43 = vmax.f32 %v5998_v8, 0.0  ;;  %v5990_v39 = vadd.f32 %v5989_v53, %v5829_v57  ;;  %v11831_v53 = vld [vmem:[%s11971_s6] ss:$0 sm:$0xff] }
 0x3e9   : > { %v7687_v46 = vpop.f32.mrf.mxu1 }
 0x3ea   : > { %v6076_v1 = vpack.c.bf16 %v6056_v43, %v6055_v18  ;;  %v6054_v28 = vmax.f32 %v5990_v39, 0.0  ;;  %v6011_v22 = vadd.f32 %v7687_v46, %v5850_v0  ;;  %v6983_v18 = vld [vmem:[%s8382_s29] sm:$0xff]   ;;  %v6988_v43 = vunpack.c.l.bf16 %v7062_v58 }
 0x3eb   : > { %v6002_v44 = vpop.f32.mrf.mxu1  ;;  %v6984_v26 = vunpack.c.l.bf16 %v6983_v18 }
 0x3ec   : > { %v6075_v14 = vpack.c.bf16 %v6054_v28, %v6053_v45  ;;  %v6003_v25 = vadd.f32 %v6002_v44, %v5842_v27  ;;  %v6059_v55 = vmax.f32 %v6011_v22, 0.0  ;;  %v6989_v45 = vunpack.c.h.bf16 %v7062_v58  ;;  %v7064_v28 = vld [vmem:[%s8382_s29 + $0x18] sm:$0xff]  }
 0x3ed   : > { %v7688_v34 = vpop.f32.mrf.mxu1  ;;  %v6985_v27 = vunpack.c.h.bf16 %v6983_v18  ;;  %v6997_v3 = vunpack.c.h.bf16 %v7064_v28 }
 0x3ee   : > { %v6014_v37 = vadd.f32 %v7688_v34, %v5853_v21  ;;  %7729 = vmatprep.mubr.bf16.mxu0 %v6075_v14  ;;  %v6057_v47 = vmax.f32 %v6003_v25, 0.0  ;;  %v6996_v21 = vunpack.c.l.bf16 %v7064_v28 }
 0x3ef   : > { %v6005_v2 = vpop.f32.mrf.mxu1  ;;  %7730 = vmatmul.mubr.bf16.gmra.mxu0 %v6076_v1 }
 0x3f0   : > { %v6060_v51 = vmax.f32 %v6014_v37, 0.0  ;;  %v6006_v7 = vadd.f32 %v6005_v2, %v5845_v23  ;;  %v6992_v23 = vunpack.c.l.bf16 %v7063_v59 }
 0x3f1   : > { %v7691_v13 = vpop.f32.mrf.mxu1 }
 0x3f2   : > { %v6078_v32 = vpack.c.bf16 %v6060_v51, %v6059_v55  ;;  %v6058_v9 = vmax.f32 %v6006_v7, 0.0  ;;  %v6027_v36 = vadd.f32 %v7691_v13, %v5866_v15  ;;  %v7066_v51 = vld [vmem:[%s8382_s29 + $0x28] sm:$0xff]   ;;  %v6993_v15 = vunpack.c.h.bf16 %v7063_v59 }
 0x3f3   : > { %v6018_v62 = vpop.f32.mrf.mxu1  ;;  %v7004_v52 = vunpack.c.l.bf16 %v7066_v51  ;;  %v7005_v60 = vunpack.c.h.bf16 %v7066_v51 }
 0x3f4   : > { %v6077_v40 = vpack.c.bf16 %v6058_v9, %v6057_v47  ;;  %v6019_v63 = vadd.f32 %v6018_v62, %v5858_v24  ;;  %v6063_v30 = vmax.f32 %v6027_v36, 0.0  ;;  %v7000_v36 = vunpack.c.l.bf16 %v7065_v12 }
 0x3f5   : > { %v7692_v6 = vpop.f32.mrf.mxu1 }
 0x3f6   : > { %v6030_v49 = vadd.f32 %v7692_v6, %v5869_v48  ;;  %7733 = vmatprep.mubr.bf16.mxu0 %v6077_v40  ;;  %v6061_v57 = vmax.f32 %v6019_v63, 0.0 }
 0x3f7   : > { %v6021_v4 = vpop.f32.mrf.mxu1  ;;  %7734 = vmatmul.mubr.bf16.gmra.mxu0 %v6078_v32 }
 0x3f8   : > { %v6064_v8 = vmax.f32 %v6030_v49, 0.0  ;;  %v6022_v41 = vadd.f32 %v6021_v4, %v5861_v35  ;;  %v7068_v4 = vld [vmem:[%s8382_s29 + $0x38] sm:$0xff]  }
 0x3fa   : > { %v6080_v5 = vpack.c.bf16 %v6064_v8, %v6063_v30  ;;  %v6062_v10 = vmax.f32 %v6022_v41, 0.0 }
 0x3fc   : > { %v6079_v54 = vpack.c.bf16 %v6062_v10, %v6061_v57  ;;  %v7001_v57 = vunpack.c.h.bf16 %v7065_v12  ;;  %v7067_v10 = vld [vmem:[%s8382_s29 + $0x30] sm:$0xff]  }
 0x3fe   : > { %7737 = vmatprep.mubr.bf16.mxu0 %v6079_v54 }
 0x3ff   : > { %7738 = vmatmul.mubr.bf16.gmra.mxu0 %v6080_v5 }
 0x486   : > { %v7711_v39 = vpop.f32.mrf.mxu0 }
 0x487   : > { %v6195_v50 = vadd.f32 %v7711_v39, %v11831_v53 }
 0x488   : > { %v6186_v0 = vpop.f32.mrf.mxu0 }
 0x489   : > { %v6379_v46 = vadd.f32 %v6988_v43, %v6195_v50  ;;  %v6187_v61 = vadd.f32 %v11831_v53, %v6186_v0  ;;  %v7012_v43 = vunpack.c.l.bf16 %v7068_v4 }
 0x48a   : > { %v7712_v1 = vpop.f32.mrf.mxu0 }
 0x48b   : > { %v6411_v11 = vmax.f32 %v6379_v46, 0.0  ;;  %v6377_v33 = vadd.f32 %v6984_v26, %v6187_v61  ;;  %v6198_v20 = vadd.f32 %v7712_v1, %v11831_v53  ;;  %v7008_v46 = vunpack.c.l.bf16 %v7067_v10 }
 0x48c   : > { %v6189_v44 = vpop.f32.mrf.mxu0 }
 0x48d   : > { %6443 = vst [vmem:[%s11840_s1 + $0x10] sm:$0xff] %v6411_v11  ;;  %v6409_v14 = vmax.f32 %v6377_v33, 0.0  ;;  %v6380_v22 = vadd.f32 %v6989_v45, %v6198_v20  ;;  %v6190_v16 = vadd.f32 %v11831_v53, %v6189_v44  ;;  %v7013_v11 = vunpack.c.h.bf16 %v7068_v4  ;;  %v7070_v20 = vld [vmem:[%s8382_s29 + $0x48] sm:$0xff]  }
 0x48f   : > { %v7715_v34 = vpop.f32.mrf.mxu0  ;;  %6441 = vst [vmem:[%s11840_s1] sm:$0xff] %v6409_v14  ;;  %v6412_v25 = vmax.f32 %v6380_v22, 0.0  ;;  %v6378_v37 = vadd.f32 %v6985_v27, %v6190_v16  ;;  %v7009_v14 = vunpack.c.h.bf16 %v7067_v10  ;;  %v7069_v16 = vld [vmem:[%s8382_s29 + $0x40] sm:$0xff]  }
 0x490   : > { %v6211_v38 = vadd.f32 %v7715_v34, %v11831_v53 }
 0x491   : > { %v6202_v19 = vpop.f32.mrf.mxu0  ;;  %6444 = vst [vmem:[%s11840_s1 + $0x18] sm:$0xff] %v6412_v25  ;;  %v6410_v56 = vmax.f32 %v6378_v37, 0.0  ;;  %v7020_v37 = vunpack.c.l.bf16 %v7070_v20 }
 0x492   : > { %v6383_v2 = vadd.f32 %v6996_v21, %v6211_v38  ;;  %v6203_v31 = vadd.f32 %v11831_v53, %v6202_v19 }
 0x493   : > { %v7716_v55 = vpop.f32.mrf.mxu0  ;;  %6442 = vst [vmem:[%s11840_s1 + $0x8] sm:$0xff] %v6410_v56 }
 0x494   : > { %v6415_v7 = vmax.f32 %v6383_v2, 0.0  ;;  %v6381_v17 = vadd.f32 %v6992_v23, %v6203_v31  ;;  %v6214_v42 = vadd.f32 %v7716_v55, %v11831_v53  ;;  %v7016_v2 = vunpack.c.l.bf16 %v7069_v16 }
 0x495   : > { %v6205_v13 = vpop.f32.mrf.mxu0 }
 0x496   : > { %6447 = vst [vmem:[%s11840_s1 + $0x30] sm:$0xff] %v6415_v7  ;;  %v6413_v47 = vmax.f32 %v6381_v17, 0.0  ;;  %v6384_v32 = vadd.f32 %v6997_v3, %v6214_v42  ;;  %v6206_v9 = vadd.f32 %v11831_v53, %v6205_v13  ;;  %v7021_v7 = vunpack.c.h.bf16 %v7070_v20  ;;  %v7072_v42 = vld [vmem:[%s8382_s29 + $0x58] sm:$0xff]  }
 0x497   : > { %v7719_v24 = vpop.f32.mrf.mxu0 }
 0x498   : > { %6445 = vst [vmem:[%s11840_s1 + $0x20] sm:$0xff] %v6413_v47  ;;  %v6416_v62 = vmax.f32 %v6384_v32, 0.0  ;;  %v6382_v29 = vadd.f32 %v6993_v15, %v6206_v9  ;;  %v6227_v40 = vadd.f32 %v7719_v24, %v11831_v53  ;;  %v7017_v47 = vunpack.c.h.bf16 %v7069_v16  ;;  %v7071_v9 = vld [vmem:[%s8382_s29 + $0x50] sm:$0xff]  }
 0x499   : > { %v6218_v48 = vpop.f32.mrf.mxu0 }
 0x49a   : > { %6448 = vst [vmem:[%s11840_s1 + $0x38] sm:$0xff] %v6416_v62  ;;  %v6414_v6 = vmax.f32 %v6382_v29, 0.0  ;;  %v6387_v63 = vadd.f32 %v7004_v52, %v6227_v40  ;;  %v6219_v49 = vadd.f32 %v11831_v53, %v6218_v48  ;;  %v7028_v29 = vunpack.c.l.bf16 %v7072_v42 }
 0x49b   : > { %v7720_v35 = vpop.f32.mrf.mxu0 }
 0x49c   : > { %6446 = vst [vmem:[%s11840_s1 + $0x28] sm:$0xff] %v6414_v6  ;;  %v6419_v30 = vmax.f32 %v6387_v63, 0.0  ;;  %v6385_v8 = vadd.f32 %v7000_v36, %v6219_v49  ;;  %v6230_v41 = vadd.f32 %v7720_v35, %v11831_v53  ;;  %v7024_v63 = vunpack.c.l.bf16 %v7071_v9 }
 0x49d   : > { %v6221_v5 = vpop.f32.mrf.mxu0 }
 0x49e   : > { %6451 = vst [vmem:[%s11840_s1 + $0x50] sm:$0xff] %v6419_v30  ;;  %v6417_v54 = vmax.f32 %v6385_v8, 0.0  ;;  %v6388_v58 = vadd.f32 %v7005_v60, %v6230_v41  ;;  %v6222_v18 = vadd.f32 %v11831_v53, %v6221_v5  ;;  %v7029_v30 = vunpack.c.h.bf16 %v7072_v42  ;;  %v7074_v41 = vld [vmem:[%s8382_s29 + $0x68] sm:$0xff]  }
 0x49f   : > { %v7723_v39 = vpop.f32.mrf.mxu0 }
 0x4a0   : > { %6449 = vst [vmem:[%s11840_s1 + $0x40] sm:$0xff] %v6417_v54  ;;  %v6420_v50 = vmax.f32 %v6388_v58, 0.0  ;;  %v6386_v26 = vadd.f32 %v7001_v57, %v6222_v18  ;;  %v6243_v0 = vadd.f32 %v7723_v39, %v11831_v53  ;;  %v7025_v54 = vunpack.c.h.bf16 %v7071_v9  ;;  %v7073_v18 = vld [vmem:[%s8382_s29 + $0x60] sm:$0xff]  }
 0x4a1   : > { %v6234_v61 = vpop.f32.mrf.mxu0 }
 0x4a2   : > { %6452 = vst [vmem:[%s11840_s1 + $0x58] sm:$0xff] %v6420_v50  ;;  %v6418_v45 = vmax.f32 %v6386_v26, 0.0  ;;  %v6391_v1 = vadd.f32 %v7012_v43, %v6243_v0  ;;  %v6235_v28 = vadd.f32 %v11831_v53, %v6234_v61  ;;  %v7036_v26 = vunpack.c.l.bf16 %v7074_v41 }
 0x4a3   : > { %v7724_v33 = vpop.f32.mrf.mxu0 }
 0x4a4   : > { %6450 = vst [vmem:[%s11840_s1 + $0x48] sm:$0xff] %v6418_v45  ;;  %v6423_v27 = vmax.f32 %v6391_v1, 0.0  ;;  %v6389_v44 = vadd.f32 %v7008_v46, %v6235_v28  ;;  %v6246_v59 = vadd.f32 %v7724_v33, %v11831_v53  ;;  %v7032_v1 = vunpack.c.l.bf16 %v7073_v18 }
 0x4a5   : > { %v6237_v22 = vpop.f32.mrf.mxu0 }
 0x4a6   : > { %6455 = vst [vmem:[%s11840_s1 + $0x70] sm:$0xff] %v6423_v27  ;;  %v6421_v21 = vmax.f32 %v6389_v44, 0.0  ;;  %v6392_v34 = vadd.f32 %v7013_v11, %v6246_v59  ;;  %v6238_v25 = vadd.f32 %v11831_v53, %v6237_v22  ;;  %v7037_v27 = vunpack.c.h.bf16 %v7074_v41  ;;  %v7076_v59 = vld [vmem:[%s8382_s29 + $0x78] sm:$0xff]  }
 0x4a7   : > { %v7727_v38 = vpop.f32.mrf.mxu0 }
 0x4a8   : > { %6453 = vst [vmem:[%s11840_s1 + $0x60] sm:$0xff] %v6421_v21  ;;  %v6424_v23 = vmax.f32 %v6392_v34, 0.0  ;;  %v6390_v19 = vadd.f32 %v7009_v14, %v6238_v25  ;;  %v6259_v56 = vadd.f32 %v7727_v38, %v11831_v53  ;;  %v7033_v21 = vunpack.c.h.bf16 %v7073_v18  ;;  %v7075_v25 = vld [vmem:[%s8382_s29 + $0x70] sm:$0xff]   ;;  %s6487_s29 = sshll.u32 %s11840_s1, 4  ;;  %s11920_s29 = int_to_ptr.vmem [resolvable:$true] %s6487_s29 }
 0x4a9   : > { %v6250_v31 = vpop.f32.mrf.mxu0  ;;  %v7041_v9 = vunpack.c.h.bf16 %v7075_v25  ;;  %s8106_s12 = scalar_lea.vmem %s11920_s29, 4096  ;;  %p8113_p13 = scmp.lt.s32.totalorder %s11920_s29, %s8111_s15 }
 0x4aa   : > { %6456 = vst [vmem:[%s11840_s1 + $0x78] sm:$0xff] %v6424_v23  ;;  %v6422_v3 = vmax.f32 %v6390_v19, 0.0  ;;  %v6395_v55 = vadd.f32 %v7020_v37, %v6259_v56  ;;  %v6251_v51 = vadd.f32 %v11831_v53, %v6250_v31  ;;  %v7044_v19 = vunpack.c.l.bf16 %v7076_v59  ;;  %p8107_p7 = scmp.ne.s32.totalorder %s11920_s29, %s8106_s12  ;;  %p8114_p0 = scmp.lt.s32.totalorder %s8112_s11, %s8106_s12 }
 0x4ab   : > { %v7728_v17 = vpop.f32.mrf.mxu0 }
 0x4ac   : > { %6454 = vst [vmem:[%s11840_s1 + $0x68] sm:$0xff] %v6422_v3  ;;  %v6427_v15 = vmax.f32 %v6395_v55, 0.0  ;;  %v6393_v13 = vadd.f32 %v7016_v2, %v6251_v51  ;;  %v6262_v12 = vadd.f32 %v7728_v17, %v11831_v53  ;;  %v7040_v55 = vunpack.c.l.bf16 %v7075_v25  ;;  %p8108_p12 = pnand %p8107_p7, %p13060_p1  ;;  %p8115_p2 = por %p8114_p0, %p8113_p13 }
 0x4ad   : > { %v6253_v32 = vpop.f32.mrf.mxu0 }
 0x4ae   : > { %6459 = vst [vmem:[%s11840_s1 + $0x90] sm:$0xff] %v6427_v15  ;;  %v6425_v52 = vmax.f32 %v6393_v13, 0.0  ;;  %v6396_v24 = vadd.f32 %v7021_v7, %v6262_v12  ;;  %v6254_v62 = vadd.f32 %v11831_v53, %v6253_v32  ;;  %v7045_v15 = vunpack.c.h.bf16 %v7076_v59  ;;  %p8109_p9 = pneg %p8108_p12 }
 0x4af   : > { %v7731_v40 = vpop.f32.mrf.mxu0 }
 0x4b0   : > { %6457 = vst [vmem:[%s11840_s1 + $0x80] sm:$0xff] %v6425_v52  ;;  %v6428_v36 = vmax.f32 %v6396_v24, 0.0  ;;  %v6394_v48 = vadd.f32 %v7017_v47, %v6254_v62  ;;  %v6275_v6 = vadd.f32 %v7731_v40, %v11831_v53  ;;  %p8116_p10 = pnand %p8115_p2, %p8109_p9 }
 0x4b1   : > { %v6266_v49 = vpop.f32.mrf.mxu0 }
 0x4b2   : > { %6460 = vst [vmem:[%s11840_s1 + $0x98] sm:$0xff] %v6428_v36  ;;  %v6426_v60 = vmax.f32 %v6394_v48, 0.0  ;;  %v6399_v35 = vadd.f32 %v7028_v29, %v6275_v6  ;;  %v6267_v4 = vadd.f32 %v11831_v53, %v6266_v49 }
 0x4b3   : > { %v7732_v8 = vpop.f32.mrf.mxu0 }
 0x4b4   : > { %6458 = vst [vmem:[%s11840_s1 + $0x88] sm:$0xff] %v6426_v60  ;;  %v6431_v57 = vmax.f32 %v6399_v35, 0.0  ;;  %v6397_v5 = vadd.f32 %v7024_v63, %v6267_v4  ;;  %v6278_v10 = vadd.f32 %v7732_v8, %v11831_v53 }
 0x4b5   : > { %v6269_v58 = vpop.f32.mrf.mxu0 }
 0x4b6   : > { %6463 = vst [vmem:[%s11840_s1 + $0xb0] sm:$0xff] %v6431_v57  ;;  %v6429_v43 = vmax.f32 %v6397_v5, 0.0  ;;  %v6400_v39 = vadd.f32 %v7029_v30, %v6278_v10  ;;  %v6270_v50 = vadd.f32 %v11831_v53, %v6269_v58 }
 0x4b7   : > { %v7735_v0 = vpop.f32.mrf.mxu0 }
 0x4b8   : > { %6461 = vst [vmem:[%s11840_s1 + $0xa0] sm:$0xff] %v6429_v43  ;;  %v6432_v46 = vmax.f32 %v6400_v39, 0.0  ;;  %v6398_v61 = vadd.f32 %v7025_v54, %v6270_v50  ;;  %v6291_v45 = vadd.f32 %v7735_v0, %v11831_v53 }
 0x4b9   : > { %v6282_v28 = vpop.f32.mrf.mxu0 }
 0x4ba   : > { %6464 = vst [vmem:[%s11840_s1 + $0xb8] sm:$0xff] %v6432_v46  ;;  %v6430_v11 = vmax.f32 %v6398_v61, 0.0  ;;  %v6403_v33 = vadd.f32 %v7036_v26, %v6291_v45  ;;  %v6283_v20 = vadd.f32 %v11831_v53, %v6282_v28 }
 0x4bb   : > { %v7736_v44 = vpop.f32.mrf.mxu0 }
 0x4bc   : > { %6462 = vst [vmem:[%s11840_s1 + $0xa8] sm:$0xff] %v6430_v11  ;;  %v6435_v14 = vmax.f32 %v6403_v33, 0.0  ;;  %v6401_v22 = vadd.f32 %v7032_v1, %v6283_v20  ;;  %v6294_v16 = vadd.f32 %v7736_v44, %v11831_v53 }
 0x4bd   : > { %v6285_v34 = vpop.f32.mrf.mxu0 }
 0x4be   : > { %6467 = vst [vmem:[%s11840_s1 + $0xd0] sm:$0xff] %v6435_v14  ;;  %v6433_v37 = vmax.f32 %v6401_v22, 0.0  ;;  %v6404_v38 = vadd.f32 %v7037_v27, %v6294_v16  ;;  %v6286_v23 = vadd.f32 %v11831_v53, %v6285_v34 }
 0x4bf   : > { %v7739_v56 = vpop.f32.mrf.mxu0 }
 0x4c0   : > { %6465 = vst [vmem:[%s11840_s1 + $0xc0] sm:$0xff] %v6433_v37  ;;  %v6436_v2 = vmax.f32 %v6404_v38, 0.0  ;;  %v6402_v31 = vadd.f32 %v7033_v21, %v6286_v23  ;;  %v6307_v3 = vadd.f32 %v7739_v56, %v11831_v53 }
 0x4c1   : > { %v6298_v51 = vpop.f32.mrf.mxu0 }
 0x4c2   : > { %6468 = vst [vmem:[%s11840_s1 + $0xd8] sm:$0xff] %v6436_v2  ;;  %v6434_v7 = vmax.f32 %v6402_v31, 0.0  ;;  %v6407_v17 = vadd.f32 %v7044_v19, %v6307_v3  ;;  %v6299_v42 = vadd.f32 %v11831_v53, %v6298_v51 }
 0x4c3   : > { %v7740_v13 = vpop.f32.mrf.mxu0 }
 0x4c4   : > { %6466 = vst [vmem:[%s11840_s1 + $0xc8] sm:$0xff] %v6434_v7  ;;  %v6439_v12 = vmax.f32 %v6407_v17, 0.0  ;;  %v6405_v47 = vadd.f32 %v7040_v55, %v6299_v42  ;;  %v6310_v32 = vadd.f32 %v7740_v13, %v11831_v53 }
 0x4c5   : > { %v6301_v52 = vpop.f32.mrf.mxu0 }
 0x4c6   : > { %6471 = vst [vmem:[%s11840_s1 + $0xf0] sm:$0xff] %v6439_v12  ;;  %v6437_v24 = vmax.f32 %v6405_v47, 0.0  ;;  %v6408_v62 = vadd.f32 %v7045_v15, %v6310_v32  ;;  %v6302_v29 = vadd.f32 %v11831_v53, %v6301_v52 }
 0x4c8   : > { %6469 = vst [vmem:[%s11840_s1 + $0xe0] sm:$0xff] %v6437_v24  ;;  %v6440_v40 = vmax.f32 %v6408_v62, 0.0  ;;  %v6406_v36 = vadd.f32 %v7041_v9, %v6302_v29 }
 0x4ca   : > { %6472 = vst [vmem:[%s11840_s1 + $0xf8] sm:$0xff] %v6440_v40  ;;  %v6438_v48 = vmax.f32 %v6406_v36, 0.0 }
 0x4cc   : > { %6470 = vst [vmem:[%s11840_s1 + $0xe8] sm:$0xff] %v6438_v48 }
 0x4cd   : > { %8119 = shalt.err (!%p8116_p10)
}
 0x4ce   : > { %s8120_s21 = scalar_lea.hbm %s11918_s10, 4096  ;;  %s8124_s23 = scalar_lea.hbm %s11972_s7, 8192 }
 0x4cf   : > { %p8121_p6 = scmp.ne.s32.totalorder %s11918_s10, %s8120_s21  ;;  %p8125_p3 = scmp.lt.s32.totalorder %s11918_s10, %s11972_s7 }
 0x4d0   : > { %p8126_p11 = scmp.lt.s32.totalorder %s8124_s23, %s8120_s21 }
 0x4d1   : > { %p8122_p4 = pnand %p8121_p6, %p13060_p1 }
 0x4d2   : > { %p8127_p5 = por %p8126_p11, %p8125_p3 }
 0x4d3   : > { %p8123_p8 = pneg %p8122_p4 }
 0x4d5   : > { %p8128_p7 = pnand %p8127_p5, %p8123_p8 }
 0x4d7   : > { %8131 = shalt.err (!%p8128_p7)
}
 0x4d8   : > { %s8189_s30 = smov 128   ;;  %s8190_s9 = smov 8  }
 0x4d9   : > { %7771 = dma.vmem_to_hbm [thread:$0]  (%p13060_p1), %s11920_s29, 4096, %s11918_s10, %s6474_s13, %s8189_s30, %s8189_s30, %s8190_s9  }
 0x4da PF: > { %s6502_s12 = sand.u32 1, %s8166_s24   ;;  %p13061_p12 = scmp.ne.s32.totalorder %s12213_s8, 0 }
 0x4db   : > { %p13062_p9 = scmp.ge.s32.totalorder %s8178_s27, 2  ;;  %s6503_s28 = scalar_lea.sflag [#allocation5], %s6502_s12 }
 0x4dd   : > { %p7788_p13 = pnand %p13062_p9, %p13061_p12 }
 0x4df   : > { %p7789_p0 = pneg %p7788_p13 }
 0x4e1   : > { %8161 = dma.done.wait (%p7789_p0), %s6503_s28, 4096  }
 0x4e2   : > { %8163 = vsyncadd (%p7789_p0), %s6503_s28, 4294963200  ;;  %p22_p2 = scmp.ge.s32.totalorder %s8320_s14, 4   ;;  %s13063_s24 = smov %s8170_s25 }
 0x4e3   : > { %s13064_s25 = smov %s8174_s26  ;;  %s13065_s26 = smov %s8330_s17 }
 0x4e4   : > { %s13066_s27 = smov %s8320_s14  ;;  %24 = sbr.rel (!%p22_p2) target bundleno = 9 (0x9), region = 105 }
 0x4e9   :  { %6508 = vsyncpa [#allocation4], 1 }
 0x4ea   :  { %6510 = vsyncpa [#allocation4 + $0x1], 1 }
 0x4eb   :  { %6511 = vsyncpa [#allocation7], 1 }
 0x4ec   :  { %6512 = vsyncpa [#allocation10], 1 }
 0x4ed   :  { %6513 = vsyncpa [#allocation5], 1 }
 0x4ee   :  { %6515 = vsyncpa [#allocation5 + $0x1], 1 }

</bundles_post_ra>
